<compile_context>
chip_gen: v7x
topology: tpu7x:2x2x1
jax: 0.10.0
libtpu: 0.0.40
codegen_flags: <defaults>
</compile_context>

<pallas_src>
import functools

import jax
import jax.numpy as jnp
from jax import lax
from jax.experimental import pallas as pl
from jax.experimental.pallas import tpu as pltpu


def _residual_block_kernel(xp_ref, w1_ref, s1_ref, b1_ref, a_ref,
                           w2_ref, s2_ref, b2_ref, o_ref, mid_ref,
                           *, H, W, C):
    """One batch element per grid step.

    xp_ref : (1, H+2, W+2, C) f32   zero-padded input (NHWC)
    w1_ref : (9*C, C) bf16          conv1 weights, row = (tap=dy*3+dx)*C + cin
    s1_ref : (1, C) f32             folded BN1 scale
    b1_ref : (1, C) f32             folded BN1 shift (includes conv1 bias)
    a_ref  : (1, C) f32             PReLU alpha (broadcast)
    w2_ref : (9*C, C) bf16          conv2 weights
    s2_ref : (1, C) f32             folded BN2 scale
    b2_ref : (1, C) f32             folded BN2 shift (includes conv2 bias)
    o_ref  : (1, H, W, C) f32       output
    mid_ref: (H+2, W+2, C) f32      VMEM scratch (padded intermediate)
    """
    Hp, Wp = H + 2, W + 2
    HW = H * W

    xp = xp_ref[0]  # (Hp, Wp, C) f32

    # ---- conv1 as ONE im2col matmul: (HW, 9C) @ (9C, C), bf16 operands, f32 acc ----
    cols = [xp[dy:dy + H, dx:dx + W, :].reshape(HW, C)
            for dy in range(3) for dx in range(3)]
    res = cols[4]  # center tap (dy=1, dx=1) == original x, kept in f32 for the skip
    patches = jnp.concatenate(cols, axis=1).astype(jnp.bfloat16)          # (HW, 9C)
    y = jnp.dot(patches, w1_ref[...], preferred_element_type=jnp.float32)  # (HW, C) f32

    # ---- folded BN1 + PReLU ----
    y = y * s1_ref[...] + b1_ref[...]
    y = jnp.where(y > 0, y, a_ref[...] * y)

    # ---- re-pad intermediate: zero ONLY the 1-px border (interior fully overwritten) ----
    zrow = jnp.zeros((1, Wp, C), jnp.float32)
    zcol = jnp.zeros((Hp, 1, C), jnp.float32)
    mid_ref[0:1, :, :] = zrow
    mid_ref[Hp - 1:Hp, :, :] = zrow
    mid_ref[:, 0:1, :] = zcol
    mid_ref[:, Wp - 1:Wp, :] = zcol
    mid_ref[1:1 + H, 1:1 + W, :] = y.reshape(H, W, C)

    # ---- conv2 as ONE im2col matmul; taps sliced straight from the scratch ref ----
    cols2 = [mid_ref[dy:dy + H, dx:dx + W, :].reshape(HW, C)
             for dy in range(3) for dx in range(3)]
    patches2 = jnp.concatenate(cols2, axis=1).astype(jnp.bfloat16)          # (HW, 9C)
    z = jnp.dot(patches2, w2_ref[...], preferred_element_type=jnp.float32)   # (HW, C)

    # ---- folded BN2 + residual add ----
    z = z * s2_ref[...] + b2_ref[...]
    o_ref[0] = (z + res).reshape(H, W, C)


@jax.jit
def residual_block_pallas(x_nchw, w1_mat, s1, b1, alpha, w2_mat, s2, b2):
    N, C, H, W = x_nchw.shape
    Hp, Wp = H + 2, W + 2

    x_nhwc = jnp.transpose(x_nchw, (0, 2, 3, 1)).astype(jnp.float32)
    x_pad = jnp.pad(x_nhwc, ((0, 0), (1, 1), (1, 1), (0, 0)))

    kernel = functools.partial(_residual_block_kernel, H=H, W=W, C=C)

    out_nhwc = pl.pallas_call(
        kernel,
        out_shape=jax.ShapeDtypeStruct((N, H, W, C), jnp.float32),
        grid_spec=pltpu.PrefetchScalarGridSpec(
            num_scalar_prefetch=0,
            grid=(N,),
            in_specs=[
                pl.BlockSpec((1, Hp, Wp, C), lambda n: (n, 0, 0, 0)),  # x_pad
                pl.BlockSpec((9 * C, C), lambda n: (0, 0)),            # w1 (bf16)
                pl.BlockSpec((1, C), lambda n: (0, 0)),                # s1
                pl.BlockSpec((1, C), lambda n: (0, 0)),                # b1
                pl.BlockSpec((1, C), lambda n: (0, 0)),                # alpha
                pl.BlockSpec((9 * C, C), lambda n: (0, 0)),            # w2 (bf16)
                pl.BlockSpec((1, C), lambda n: (0, 0)),                # s2
                pl.BlockSpec((1, C), lambda n: (0, 0)),                # b2
            ],
            out_specs=pl.BlockSpec((1, H, W, C), lambda n: (n, 0, 0, 0)),
            scratch_shapes=[pltpu.VMEM((Hp, Wp, C), jnp.float32)],
        ),
        compiler_params=pltpu.CompilerParams(
            dimension_semantics=("parallel",)),  # one image per TC on v7x
    )(x_pad, w1_mat, s1, b1, alpha, w2_mat, s2, b2)

    return jnp.transpose(out_nhwc, (0, 3, 1, 2))


def _ref_forward(x, w1, bias1, bn1, alpha, w2, bias2, bn2, eps,
                 round_matmul_operands):
    """Plain-JAX reference (NCHW). Follows the PyTorch module exactly; optionally
    rounds conv operands to bf16 to mirror the kernel's MXU operand precision."""
    if round_matmul_operands:
        rd = lambda a: a.astype(jnp.bfloat16).astype(jnp.float32)
    else:
        rd = lambda a: a
    dn = ("NCHW", "OIHW", "NCHW")
    g1, be1, m1, v1 = bn1
    g2, be2, m2, v2 = bn2

    def bn(u, g, be, m, v):
        inv = g / jnp.sqrt(v + eps)
        return (u - m[None, :, None, None]) * inv[None, :, None, None] \
            + be[None, :, None, None]

    y = lax.conv_general_dilated(rd(x), rd(w1), (1, 1), "SAME",
                                 dimension_numbers=dn,
                                 precision=lax.Precision.HIGHEST)
    y = y + bias1[None, :, None, None]
    y = bn(y, g1, be1, m1, v1)
    y = jnp.where(y > 0, y, alpha * y)
    z = lax.conv_general_dilated(rd(y), rd(w2), (1, 1), "SAME",
                                 dimension_numbers=dn,
                                 precision=lax.Precision.HIGHEST)
    z = z + bias2[None, :, None, None]
    z = bn(z, g2, be2, m2, v2)
    return x + z


if __name__ == "__main__":
    N, C, H, W = 2, 64, 16, 16   # channels fixed at 64 by the module definition
    key = jax.random.PRNGKey(0)
    ks = jax.random.split(key, 13)

    x = jax.random.normal(ks[0], (N, C, H, W), jnp.float32)

    # Conv params (OIHW like PyTorch), deterministic init.
    fan_in = C * 3 * 3
    bound = 1.0 / jnp.sqrt(fan_in)
    w1 = jax.random.uniform(ks[1], (C, C, 3, 3), jnp.float32, -bound, bound)
    bias1 = jax.random.uniform(ks[2], (C,), jnp.float32, -bound, bound)
    w2 = jax.random.uniform(ks[3], (C, C, 3, 3), jnp.float32, -bound, bound)
    bias2 = jax.random.uniform(ks[4], (C,), jnp.float32, -bound, bound)

    # Non-trivial eval-mode BatchNorm params (distinct per layer).
    eps = 1e-5
    gamma1 = jax.random.uniform(ks[5], (C,), jnp.float32, 0.5, 1.5)
    beta1 = 0.1 * jax.random.normal(ks[6], (C,), jnp.float32)
    mean1 = 0.1 * jax.random.normal(ks[7], (C,), jnp.float32)
    var1 = jax.random.uniform(ks[8], (C,), jnp.float32, 0.5, 1.5)
    gamma2 = jax.random.uniform(ks[9], (C,), jnp.float32, 0.5, 1.5)
    beta2 = 0.1 * jax.random.normal(ks[10], (C,), jnp.float32)
    mean2 = 0.1 * jax.random.normal(ks[11], (C,), jnp.float32)
    var2 = jax.random.uniform(ks[12], (C,), jnp.float32, 0.5, 1.5)

    # PReLU default: single learnable scalar init 0.25, broadcast over channels.
    alpha = jnp.float32(0.25)
    alpha_vec = jnp.full((1, C), alpha, jnp.float32)

    # Fold conv bias + BN into per-channel scale/shift:
    #   BN(conv + b) = conv*s + (s*(b - mean) + beta),  s = gamma/sqrt(var+eps)
    s1 = gamma1 / jnp.sqrt(var1 + eps)
    b1f = s1 * (bias1 - mean1) + beta1
    s2 = gamma2 / jnp.sqrt(var2 + eps)
    b2f = s2 * (bias2 - mean2) + beta2

    # Conv weights as a single im2col matrix: OIHW -> (kh, kw, Cin, Cout) -> (9*C, C), bf16.
    w1_mat = jnp.transpose(w1, (2, 3, 1, 0)).reshape(9 * C, C).astype(jnp.bfloat16)
    w2_mat = jnp.transpose(w2, (2, 3, 1, 0)).reshape(9 * C, C).astype(jnp.bfloat16)

    out = residual_block_pallas(
        x, w1_mat, s1.reshape(1, C), b1f.reshape(1, C), alpha_vec,
        w2_mat, s2.reshape(1, C), b2f.reshape(1, C))
    out = jax.block_until_ready(out)
    assert out.shape == (N, C, H, W)

    bn1 = (gamma1, beta1, mean1, var1)
    bn2 = (gamma2, beta2, mean2, var2)
    # Tight check: reference with conv operands rounded to bf16 (matches kernel MXU inputs).
    ref_tight = _ref_forward(x, w1, bias1, bn1, alpha, w2, bias2, bn2, eps,
                             round_matmul_operands=True)
    # Sanity check: pure f32 reference (bounds the bf16-operand error).
    ref_f32 = _ref_forward(x, w1, bias1, bn1, alpha, w2, bias2, bn2, eps,
                           round_matmul_operands=False)
    ref_tight = jax.block_until_ready(ref_tight)
    ref_f32 = jax.block_until_ready(ref_f32)

    err_tight = float(jnp.max(jnp.abs(out - ref_tight)))
    err_f32 = float(jnp.max(jnp.abs(out - ref_f32)))
    assert err_tight < 2e-3, f"mismatch vs bf16-operand reference: {err_tight}"
    assert err_f32 < 5e-2, f"mismatch vs f32 reference: {err_f32}"
    print("KERNEL_OK")
</pallas_src>

<mosaic_0001>
module attributes {stable_mosaic.version = 11 : i64} {
  func.func @_residual_block_kernel(%arg0: i32, %arg1: memref<1x18x18x64xf32, #tpu.memory_space<vmem>>, %arg2: memref<576x64xbf16, #tpu.memory_space<vmem>>, %arg3: memref<1x64xf32, #tpu.memory_space<vmem>>, %arg4: memref<1x64xf32, #tpu.memory_space<vmem>>, %arg5: memref<1x64xf32, #tpu.memory_space<vmem>>, %arg6: memref<576x64xbf16, #tpu.memory_space<vmem>>, %arg7: memref<1x64xf32, #tpu.memory_space<vmem>>, %arg8: memref<1x64xf32, #tpu.memory_space<vmem>>, %arg9: memref<1x16x16x64xf32, #tpu.memory_space<vmem>>, %arg10: memref<18x18x64xf32, #tpu.memory_space<vmem>>) attributes {dimension_semantics = [#tpu.dimension_semantics<parallel>], iteration_bounds = array<i64: 2>, scalar_prefetch = 0 : i64, scratch_operands = 1 : i64, tpu.core_type = #tpu.core_type<tc>, window_params = [{transform_indices = @transform_0, window_bounds = array<i64: 1, 18, 18, 64>}, {pipeline_mode = #tpu.pipeline_mode<synchronous>, transform_indices = @transform_1, window_bounds = array<i64: 576, 64>}, {pipeline_mode = #tpu.pipeline_mode<synchronous>, transform_indices = @transform_2, window_bounds = array<i64: 1, 64>}, {pipeline_mode = #tpu.pipeline_mode<synchronous>, transform_indices = @transform_3, window_bounds = array<i64: 1, 64>}, {pipeline_mode = #tpu.pipeline_mode<synchronous>, transform_indices = @transform_4, window_bounds = array<i64: 1, 64>}, {pipeline_mode = #tpu.pipeline_mode<synchronous>, transform_indices = @transform_5, window_bounds = array<i64: 576, 64>}, {pipeline_mode = #tpu.pipeline_mode<synchronous>, transform_indices = @transform_6, window_bounds = array<i64: 1, 64>}, {pipeline_mode = #tpu.pipeline_mode<synchronous>, transform_indices = @transform_7, window_bounds = array<i64: 1, 64>}, {transform_indices = @transform_8, window_bounds = array<i64: 1, 16, 16, 64>}]} {
    %c0 = arith.constant 0 : index
    %c0_0 = arith.constant 0 : index
    %c0_1 = arith.constant 0 : index
    %c0_2 = arith.constant 0 : index
    %0 = vector.load %arg1[%c0, %c0_0, %c0_1, %c0_2] : memref<1x18x18x64xf32, #tpu.memory_space<vmem>>, vector<1x18x18x64xf32>
    %1 = vector.shape_cast %0 : vector<1x18x18x64xf32> to vector<18x18x64xf32>
    %2 = vector.extract_strided_slice %1 {offsets = [0, 0, 0], sizes = [16, 16, 64], strides = [1, 1, 1]} : vector<18x18x64xf32> to vector<16x16x64xf32>
    %3 = vector.shape_cast %2 : vector<16x16x64xf32> to vector<256x64xf32>
    %4 = vector.extract_strided_slice %1 {offsets = [0, 1, 0], sizes = [16, 16, 64], strides = [1, 1, 1]} : vector<18x18x64xf32> to vector<16x16x64xf32>
    %5 = vector.shape_cast %4 : vector<16x16x64xf32> to vector<256x64xf32>
    %6 = vector.extract_strided_slice %1 {offsets = [0, 2, 0], sizes = [16, 16, 64], strides = [1, 1, 1]} : vector<18x18x64xf32> to vector<16x16x64xf32>
    %7 = vector.shape_cast %6 : vector<16x16x64xf32> to vector<256x64xf32>
    %8 = vector.extract_strided_slice %1 {offsets = [1, 0, 0], sizes = [16, 16, 64], strides = [1, 1, 1]} : vector<18x18x64xf32> to vector<16x16x64xf32>
    %9 = vector.shape_cast %8 : vector<16x16x64xf32> to vector<256x64xf32>
    %10 = vector.extract_strided_slice %1 {offsets = [1, 1, 0], sizes = [16, 16, 64], strides = [1, 1, 1]} : vector<18x18x64xf32> to vector<16x16x64xf32>
    %11 = vector.shape_cast %10 : vector<16x16x64xf32> to vector<256x64xf32>
    %12 = vector.extract_strided_slice %1 {offsets = [1, 2, 0], sizes = [16, 16, 64], strides = [1, 1, 1]} : vector<18x18x64xf32> to vector<16x16x64xf32>
    %13 = vector.shape_cast %12 : vector<16x16x64xf32> to vector<256x64xf32>
    %14 = vector.extract_strided_slice %1 {offsets = [2, 0, 0], sizes = [16, 16, 64], strides = [1, 1, 1]} : vector<18x18x64xf32> to vector<16x16x64xf32>
    %15 = vector.shape_cast %14 : vector<16x16x64xf32> to vector<256x64xf32>
    %16 = vector.extract_strided_slice %1 {offsets = [2, 1, 0], sizes = [16, 16, 64], strides = [1, 1, 1]} : vector<18x18x64xf32> to vector<16x16x64xf32>
    %17 = vector.shape_cast %16 : vector<16x16x64xf32> to vector<256x64xf32>
    %18 = vector.extract_strided_slice %1 {offsets = [2, 2, 0], sizes = [16, 16, 64], strides = [1, 1, 1]} : vector<18x18x64xf32> to vector<16x16x64xf32>
    %19 = vector.shape_cast %18 : vector<16x16x64xf32> to vector<256x64xf32>
    %20 = tpu.concatenate %3, %5, %7, %9, %11, %13, %15, %17, %19 in 1 : vector<256x64xf32>, vector<256x64xf32>, vector<256x64xf32>, vector<256x64xf32>, vector<256x64xf32>, vector<256x64xf32>, vector<256x64xf32>, vector<256x64xf32>, vector<256x64xf32> -> vector<256x576xf32>
    %21 = arith.truncf %20 : vector<256x576xf32> to vector<256x576xbf16>
    %c0_3 = arith.constant 0 : index
    %c0_4 = arith.constant 0 : index
    %22 = vector.load %arg2[%c0_3, %c0_4] : memref<576x64xbf16, #tpu.memory_space<vmem>>, vector<576x64xbf16>
    %cst = arith.constant dense<0.000000e+00> : vector<256x64xf32>
    %23 = tpu.matmul %21, %22, %cst {dimension_numbers = #tpu.dot_dimension_numbers<[1], [0], [0], [1], [0, 0, 1, 1], [], []>} : vector<256x576xbf16>, vector<576x64xbf16>, vector<256x64xf32> -> vector<256x64xf32>
    %c0_5 = arith.constant 0 : index
    %c0_6 = arith.constant 0 : index
    %24 = vector.load %arg3[%c0_5, %c0_6] : memref<1x64xf32, #tpu.memory_space<vmem>>, vector<1x64xf32>
    %25 = vector.broadcast %24 : vector<1x64xf32> to vector<256x64xf32>
    %26 = arith.mulf %23, %25 : vector<256x64xf32>
    %c0_7 = arith.constant 0 : index
    %c0_8 = arith.constant 0 : index
    %27 = vector.load %arg4[%c0_7, %c0_8] : memref<1x64xf32, #tpu.memory_space<vmem>>, vector<1x64xf32>
    %28 = vector.broadcast %27 : vector<1x64xf32> to vector<256x64xf32>
    %29 = arith.addf %26, %28 : vector<256x64xf32>
    %cst_9 = arith.constant 0.000000e+00 : f32
    %30 = vector.broadcast %cst_9 : f32 to vector<256x64xf32>
    %31 = arith.cmpf ogt, %29, %30 : vector<256x64xf32>
    %c0_10 = arith.constant 0 : index
    %c0_11 = arith.constant 0 : index
    %32 = vector.load %arg5[%c0_10, %c0_11] : memref<1x64xf32, #tpu.memory_space<vmem>>, vector<1x64xf32>
    %33 = vector.broadcast %32 : vector<1x64xf32> to vector<256x64xf32>
    %34 = arith.mulf %33, %29 : vector<256x64xf32>
    %35 = arith.select %31, %29, %34 : vector<256x64xi1>, vector<256x64xf32>
    %cst_12 = arith.constant 0.000000e+00 : f32
    %36 = vector.broadcast %cst_12 : f32 to vector<1x18x64xf32>
    %cst_13 = arith.constant 0.000000e+00 : f32
    %37 = vector.broadcast %cst_13 : f32 to vector<18x1x64xf32>
    %c0_14 = arith.constant 0 : index
    %c0_15 = arith.constant 0 : index
    %c0_16 = arith.constant 0 : index
    %38 = vector.load %arg10[%c0_14, %c0_15, %c0_16] : memref<18x18x64xf32, #tpu.memory_space<vmem>>, vector<1x18x64xf32>
    tpu.vector_store %arg10[%c0_14, %c0_15, %c0_16], %36 {strides = array<i32>} : memref<18x18x64xf32, #tpu.memory_space<vmem>>, vector<1x18x64xf32>,
    %c17 = arith.constant 17 : index
    %c0_17 = arith.constant 0 : index
    %c0_18 = arith.constant 0 : index
    %39 = vector.load %arg10[%c17, %c0_17, %c0_18] : memref<18x18x64xf32, #tpu.memory_space<vmem>>, vector<1x18x64xf32>
    tpu.vector_store %arg10[%c17, %c0_17, %c0_18], %36 {strides = array<i32>} : memref<18x18x64xf32, #tpu.memory_space<vmem>>, vector<1x18x64xf32>,
    %c0_19 = arith.constant 0 : index
    %c0_20 = arith.constant 0 : index
    %c0_21 = arith.constant 0 : index
    %40 = vector.load %arg10[%c0_19, %c0_20, %c0_21] : memref<18x18x64xf32, #tpu.memory_space<vmem>>, vector<18x1x64xf32>
    tpu.vector_store %arg10[%c0_19, %c0_20, %c0_21], %37 {strides = array<i32>} : memref<18x18x64xf32, #tpu.memory_space<vmem>>, vector<18x1x64xf32>,
    %c0_22 = arith.constant 0 : index
    %c17_23 = arith.constant 17 : index
    %c0_24 = arith.constant 0 : index
    %41 = vector.load %arg10[%c0_22, %c17_23, %c0_24] : memref<18x18x64xf32, #tpu.memory_space<vmem>>, vector<18x1x64xf32>
    tpu.vector_store %arg10[%c0_22, %c17_23, %c0_24], %37 {strides = array<i32>} : memref<18x18x64xf32, #tpu.memory_space<vmem>>, vector<18x1x64xf32>,
    %42 = vector.shape_cast %35 : vector<256x64xf32> to vector<16x16x64xf32>
    %c1 = arith.constant 1 : index
    %c1_25 = arith.constant 1 : index
    %c0_26 = arith.constant 0 : index
    %43 = vector.load %arg10[%c1, %c1_25, %c0_26] : memref<18x18x64xf32, #tpu.memory_space<vmem>>, vector<16x16x64xf32>
    tpu.vector_store %arg10[%c1, %c1_25, %c0_26], %42 {strides = array<i32>} : memref<18x18x64xf32, #tpu.memory_space<vmem>>, vector<16x16x64xf32>,
    %c0_27 = arith.constant 0 : index
    %c0_28 = arith.constant 0 : index
    %c0_29 = arith.constant 0 : index
    %44 = vector.load %arg10[%c0_27, %c0_28, %c0_29] : memref<18x18x64xf32, #tpu.memory_space<vmem>>, vector<16x16x64xf32>
    %45 = vector.shape_cast %44 : vector<16x16x64xf32> to vector<256x64xf32>
    %c0_30 = arith.constant 0 : index
    %c1_31 = arith.constant 1 : index
    %c0_32 = arith.constant 0 : index
    %46 = vector.load %arg10[%c0_30, %c1_31, %c0_32] : memref<18x18x64xf32, #tpu.memory_space<vmem>>, vector<16x16x64xf32>
    %47 = vector.shape_cast %46 : vector<16x16x64xf32> to vector<256x64xf32>
    %c0_33 = arith.constant 0 : index
    %c2 = arith.constant 2 : index
    %c0_34 = arith.constant 0 : index
    %48 = vector.load %arg10[%c0_33, %c2, %c0_34] : memref<18x18x64xf32, #tpu.memory_space<vmem>>, vector<16x16x64xf32>
    %49 = vector.shape_cast %48 : vector<16x16x64xf32> to vector<256x64xf32>
    %c1_35 = arith.constant 1 : index
    %c0_36 = arith.constant 0 : index
    %c0_37 = arith.constant 0 : index
    %50 = vector.load %arg10[%c1_35, %c0_36, %c0_37] : memref<18x18x64xf32, #tpu.memory_space<vmem>>, vector<16x16x64xf32>
    %51 = vector.shape_cast %50 : vector<16x16x64xf32> to vector<256x64xf32>
    %c1_38 = arith.constant 1 : index
    %c1_39 = arith.constant 1 : index
    %c0_40 = arith.constant 0 : index
    %52 = vector.load %arg10[%c1_38, %c1_39, %c0_40] : memref<18x18x64xf32, #tpu.memory_space<vmem>>, vector<16x16x64xf32>
    %53 = vector.shape_cast %52 : vector<16x16x64xf32> to vector<256x64xf32>
    %c1_41 = arith.constant 1 : index
    %c2_42 = arith.constant 2 : index
    %c0_43 = arith.constant 0 : index
    %54 = vector.load %arg10[%c1_41, %c2_42, %c0_43] : memref<18x18x64xf32, #tpu.memory_space<vmem>>, vector<16x16x64xf32>
    %55 = vector.shape_cast %54 : vector<16x16x64xf32> to vector<256x64xf32>
    %c2_44 = arith.constant 2 : index
    %c0_45 = arith.constant 0 : index
    %c0_46 = arith.constant 0 : index
    %56 = vector.load %arg10[%c2_44, %c0_45, %c0_46] : memref<18x18x64xf32, #tpu.memory_space<vmem>>, vector<16x16x64xf32>
    %57 = vector.shape_cast %56 : vector<16x16x64xf32> to vector<256x64xf32>
    %c2_47 = arith.constant 2 : index
    %c1_48 = arith.constant 1 : index
    %c0_49 = arith.constant 0 : index
    %58 = vector.load %arg10[%c2_47, %c1_48, %c0_49] : memref<18x18x64xf32, #tpu.memory_space<vmem>>, vector<16x16x64xf32>
    %59 = vector.shape_cast %58 : vector<16x16x64xf32> to vector<256x64xf32>
    %c2_50 = arith.constant 2 : index
    %c2_51 = arith.constant 2 : index
    %c0_52 = arith.constant 0 : index
    %60 = vector.load %arg10[%c2_50, %c2_51, %c0_52] : memref<18x18x64xf32, #tpu.memory_space<vmem>>, vector<16x16x64xf32>
    %61 = vector.shape_cast %60 : vector<16x16x64xf32> to vector<256x64xf32>
    %62 = tpu.concatenate %45, %47, %49, %51, %53, %55, %57, %59, %61 in 1 : vector<256x64xf32>, vector<256x64xf32>, vector<256x64xf32>, vector<256x64xf32>, vector<256x64xf32>, vector<256x64xf32>, vector<256x64xf32>, vector<256x64xf32>, vector<256x64xf32> -> vector<256x576xf32>
    %63 = arith.truncf %62 : vector<256x576xf32> to vector<256x576xbf16>
    %c0_53 = arith.constant 0 : index
    %c0_54 = arith.constant 0 : index
    %64 = vector.load %arg6[%c0_53, %c0_54] : memref<576x64xbf16, #tpu.memory_space<vmem>>, vector<576x64xbf16>
    %cst_55 = arith.constant dense<0.000000e+00> : vector<256x64xf32>
    %65 = tpu.matmul %63, %64, %cst_55 {dimension_numbers = #tpu.dot_dimension_numbers<[1], [0], [0], [1], [0, 0, 1, 1], [], []>} : vector<256x576xbf16>, vector<576x64xbf16>, vector<256x64xf32> -> vector<256x64xf32>
    %c0_56 = arith.constant 0 : index
    %c0_57 = arith.constant 0 : index
    %66 = vector.load %arg7[%c0_56, %c0_57] : memref<1x64xf32, #tpu.memory_space<vmem>>, vector<1x64xf32>
    %67 = vector.broadcast %66 : vector<1x64xf32> to vector<256x64xf32>
    %68 = arith.mulf %65, %67 : vector<256x64xf32>
    %c0_58 = arith.constant 0 : index
    %c0_59 = arith.constant 0 : index
    %69 = vector.load %arg8[%c0_58, %c0_59] : memref<1x64xf32, #tpu.memory_space<vmem>>, vector<1x64xf32>
    %70 = vector.broadcast %69 : vector<1x64xf32> to vector<256x64xf32>
    %71 = arith.addf %68, %70 : vector<256x64xf32>
    %72 = arith.addf %71, %11 : vector<256x64xf32>
    %73 = vector.shape_cast %72 : vector<256x64xf32> to vector<16x16x64xf32>
    %c0_60 = arith.constant 0 : index
    %c0_61 = arith.constant 0 : index
    %c0_62 = arith.constant 0 : index
    %c0_63 = arith.constant 0 : index
    %74 = vector.load %arg9[%c0_60, %c0_61, %c0_62, %c0_63] : memref<1x16x16x64xf32, #tpu.memory_space<vmem>>, vector<1x16x16x64xf32>
    %75 = vector.shape_cast %74 : vector<1x16x16x64xf32> to vector<16x16x64xf32>
    %76 = vector.shape_cast %73 : vector<16x16x64xf32> to vector<1x16x16x64xf32>
    tpu.vector_store %arg9[%c0_60, %c0_61, %c0_62, %c0_63], %76 {strides = array<i32>} : memref<1x16x16x64xf32, #tpu.memory_space<vmem>>, vector<1x16x16x64xf32>,
    return
  }
  func.func @transform_0(%arg0: i32) -> (i32, i32, i32, i32) {
    %c0_i32 = arith.constant 0 : i32
    %c0_i32_0 = arith.constant 0 : i32
    %c0_i32_1 = arith.constant 0 : i32
    %c0_i32_2 = arith.constant 0 : i32
    return %arg0, %c0_i32, %c0_i32_0, %c0_i32_1 : i32, i32, i32, i32
  }
  func.func @transform_1(%arg0: i32) -> (i32, i32) {
    %c0_i32 = arith.constant 0 : i32
    %c0_i32_0 = arith.constant 0 : i32
    %c0_i32_1 = arith.constant 0 : i32
    return %c0_i32, %c0_i32_0 : i32, i32
  }
  func.func @transform_2(%arg0: i32) -> (i32, i32) {
    %c0_i32 = arith.constant 0 : i32
    %c0_i32_0 = arith.constant 0 : i32
    %c0_i32_1 = arith.constant 0 : i32
    return %c0_i32, %c0_i32_0 : i32, i32
  }
  func.func @transform_3(%arg0: i32) -> (i32, i32) {
    %c0_i32 = arith.constant 0 : i32
    %c0_i32_0 = arith.constant 0 : i32
    %c0_i32_1 = arith.constant 0 : i32
    return %c0_i32, %c0_i32_0 : i32, i32
  }
  func.func @transform_4(%arg0: i32) -> (i32, i32) {
    %c0_i32 = arith.constant 0 : i32
    %c0_i32_0 = arith.constant 0 : i32
    %c0_i32_1 = arith.constant 0 : i32
    return %c0_i32, %c0_i32_0 : i32, i32
  }
  func.func @transform_5(%arg0: i32) -> (i32, i32) {
    %c0_i32 = arith.constant 0 : i32
    %c0_i32_0 = arith.constant 0 : i32
    %c0_i32_1 = arith.constant 0 : i32
    return %c0_i32, %c0_i32_0 : i32, i32
  }
  func.func @transform_6(%arg0: i32) -> (i32, i32) {
    %c0_i32 = arith.constant 0 : i32
    %c0_i32_0 = arith.constant 0 : i32
    %c0_i32_1 = arith.constant 0 : i32
    return %c0_i32, %c0_i32_0 : i32, i32
  }
  func.func @transform_7(%arg0: i32) -> (i32, i32) {
    %c0_i32 = arith.constant 0 : i32
    %c0_i32_0 = arith.constant 0 : i32
    %c0_i32_1 = arith.constant 0 : i32
    return %c0_i32, %c0_i32_0 : i32, i32
  }
  func.func @transform_8(%arg0: i32) -> (i32, i32, i32, i32) {
    %c0_i32 = arith.constant 0 : i32
    %c0_i32_0 = arith.constant 0 : i32
    %c0_i32_1 = arith.constant 0 : i32
    %c0_i32_2 = arith.constant 0 : i32
    return %arg0, %c0_i32, %c0_i32_0, %c0_i32_1 : i32, i32, i32, i32
  }
}

</mosaic_0001>

<bundles_post_ra>
// kernel: residual_block_pallas.1
= control target key start
LH: loop header
LB: loop body
LE: loop exit
PB: predicated region body
PF: predicated region fallthrough
CT: control target
= control target key end

     0   :  { %13 = vsyncpa [#allocation4], 0  ;;  %s8466_s0 = inlined_call_operand.vmem [shape: f32[2,18,18,64], index: 0, kind: input, shape index: {}]   ;;  %s8467_s1 = inlined_call_operand.vmem [shape: bf16[576,64], index: 1, kind: input, shape index: {}]   ;;  %s8468_s2 = inlined_call_operand.vmem [shape: f32[1,64], index: 2, kind: input, shape index: {}]   ;;  %s8469_s3 = inlined_call_operand.vmem [shape: f32[1,64], index: 3, kind: input, shape index: {}]   ;;  %s8470_s4 = inlined_call_operand.vmem [shape: f32[1,64], index: 4, kind: input, shape index: {}]   ;;  %s8471_s5 = inlined_call_operand.vmem [shape: bf16[576,64], index: 5, kind: input, shape index: {}]   ;;  %s8472_s6 = inlined_call_operand.vmem [shape: f32[1,64], index: 6, kind: input, shape index: {}]   ;;  %s8473_s7 = inlined_call_operand.vmem [shape: f32[1,64], index: 7, kind: input, shape index: {}]   ;;  %s8474_s8 = inlined_call_operand.hbm [shape: f32[2,16,16,64], index: 8, kind: output, shape index: {}]  }
   0x1   :  { %15 = vsyncpa [#allocation4 + $0x1], 0  ;;  %s5783_s27 = smov 0   ;;  %s5785_s28 = smov 0  }
   0x2   :  { %s5787_s29 = smov 0   ;;  %s5789_s30 = smov 0  }
   0x3 LB: > { %s5804_s9 = sadd.s32 4294967295, %s5731_s30   ;;  %s4254_s10 = sadd.s32 4294967294, %s5731_s30   ;;  %s5731_s30 = sphi %s5789_s30, %s8732_s30   ;;  %s5727_s29 = sphi %s5787_s29, %s8731_s29   ;;  %s5723_s28 = sphi %s5785_s28, %s8730_s28   ;;  %s5719_s27 = sphi %s5783_s27, %s8729_s27  }
   0x4   : > { %s5808_s11 = sadd.s32 1, %s5731_s30   ;;  %s201_s12 = sadd.s32 1, %s5727_s29 }
   0x5   : > { %s198_s13 = ssub.s32 %s5731_s30, %s5808_s11  ;;  %p211_p0 = scmp.ne.s32.totalorder %s5727_s29, %s5723_s28 }
   0x6   : > { %p199_p1 = scmp.eq.s32.totalorder %s198_s13, 0  ;;  %p212_p2 = scmp.eq.s32.totalorder %s5804_s9, 1 }
   0x7   : > { %p217_p3 = scmp.ne.s32.totalorder %s5723_s28, %s5719_s27  ;;  %p218_p4 = scmp.eq.s32.totalorder %s4254_s10, 1 }
   0x8   : > { %s5819_s14 = scalar_select %p199_p1, %s5727_s29, %s201_s12  }
   0x9   : > { %p5821_p5 = por %p212_p2, %p211_p0  ;;  %p5825_p6 = por %p218_p4, %p217_p3 }
   0xa   : > { %p4257_p7 = scmp.ge.s32.totalorder %s5731_s30, 1  ;;  %p265_p8 = scmp.lt.s32.totalorder %s5731_s30, 3 }
   0xc   : > { %p266_p9 = pnand %p4257_p7, %p265_p8 }
   0xe   : > { %269 = sbr.rel (%p266_p9) target bundleno = 1062 (0x426), region = 52 }
  0x15   : > { %p299_p10 = scmp.lt.s32.totalorder %s5804_s9, 1  ;;  %v5557_v0 = vld [vmem:[%s8467_s1 + $0x40] sm:$0xff]   ;;  %v5559_v2 = vld [vmem:[%s8467_s1 + $0x48] sm:$0xff]   ;;  %v5561_v4 = vld [vmem:[%s8467_s1 + $0x50] sm:$0xff]   ;;  %vm407_vm0 = vcmask 1046528   ;;  %vm488_vm1 = vcmask 1045504  }
  0x16   : > { %v5558_v1 = vld [vmem:[%s8467_s1] sm:$0xff]   ;;  %4375 = vmatprep.subr.bf16.mxu0 %v5557_v0  ;;  %v5560_v3 = vld [vmem:[%s8467_s1 + $0x8] sm:$0xff]   ;;  %v5562_v5 = vld [vmem:[%s8467_s1 + $0x10] sm:$0xff]   ;;  %vm963_vm2 = vcmask 523264   ;;  %vm2132_vm3 = vcmask 517120   ;;  %vm2138_vm4 = vcmask 516096  }
  0x17   : > { %s300_s19 = scalar_select %p299_p10, %s5804_s9, 1  ;;  %4376 = vmatpush3.bf16.msra.mxu0 %v5558_v1 }
  0x18   : > { %4377 = vmatprep.subr.bf16.mxu0 %v5559_v2  ;;  %s4374_s12 = sshll.u32 %s5804_s9, 12  ;;  %s5735_s23 = smov [#allocation3]  }
  0x19   : > { %s4943_s24 = smul.u32 432, %s300_s19  ;;  %s5733_s19 = smov 64  }
  0x1a   : > { %s8412_s21 = scalar_lea.hbm %s8474_s8, %s4374_s12 }
  0x1b   : > { %s5851_s18 = scalar_lea.vmem %s8466_s0, %s4943_s24  ;;  %4378 = vmatpush3.bf16.msra.mxu0 %v5560_v3  ;;  %s5673_s24 = sshll.u32 %s5735_s23, 4  ;;  %s5674_s24 = int_to_ptr.vmem [resolvable:$false] %s5673_s24 }
  0x1c   : > { %v5857_v6 = vld [vmem:[%s5851_s18 + $0x18] sm:$0xff]  ;;  %v5860_v7 = vld [vmem:[%s5851_s18 + $0x20] sm:$0xff]  ;;  %v5868_v12 = vld [vmem:[%s5851_s18 + $0x8] sm:$0xff]  ;;  %4379 = vmatprep.subr.bf16.mxu0 %v5561_v4  ;;  %s5675_s25 = scalar_lea.vmem %s5674_s24, 8192 }
  0x1d   : > { %v305_v8 = vld [vmem:[%s5851_s18] sm:$0xff]  ;;  %v414_v9 = vrot.slane %v5860_v7, 1  ;;  %v4987_v10 = vpack.i.bf16 %v5860_v7, %v5857_v6  ;;  %v413_v11 = vrot.slane %v5857_v6, 1  ;;  %8553 = vst [vmem:[#allocation6_spill] sm:$0xff] %v5868_v12  ;;  %v5871_v13 = vld [vmem:[%s5851_s18 + $0x10] sm:$0x3] }
  0x1e   : > { %8554 = vst [vmem:[#allocation7_spill] sm:$0xff] %v5871_v13  ;;  %v408_v14 = vrot.slane %v305_v8, 1  ;;  %v409_v15 = vrot.slane %v5868_v12, 1  ;;  %v411_v16 = vrot.slane %v5871_v13, 1  ;;  %v5876_v17 = vld [vmem:[%s5851_s18 + $0x30] sm:$0xff]  ;;  %v5879_v18 = vld [vmem:[%s5851_s18 + $0x38] sm:$0xff] }
  0x1f   : > { %8555 = vst [vmem:[#allocation8_spill] sm:$0xff] %v5876_v17  ;;  %4988 = vrot.lane.b32.xlu0 %v4987_v10, %s5733_s19  ;;  %v419_v19 = vrot.slane %v5879_v18, 1  ;;  %v4997_v20 = vpack.i.bf16 %v5879_v18, %v5876_v17  ;;  %v418_v21 = vrot.slane %v5876_v17, 1  ;;  %v5887_v22 = vld [vmem:[%s5851_s18 + $0x48] sm:$0xff]  ;;  %v5890_v23 = vld [vmem:[%s5851_s18 + $0x50] sm:$0xff]  ;;  %v5902_v29 = vsel %vm407_vm0, %v413_v11, %v414_v9  ;;  %4380 = vmatpush3.bf16.msra.mxu0 %v5562_v5  ;;  %v5924_v40 = vld [vmem:[%s5851_s18 + $0x60] sm:$0xff] }
  0x20   : > { %v5893_v24 = vld [vmem:[%s5851_s18 + $0x28] sm:$0x3]  ;;  %v410_v25 = vsel %vm407_vm0, %v408_v14, %v409_v15  ;;  %v412_v26 = vsel %vm407_vm0, %v409_v15, %v411_v16  ;;  %v5898_v27 = vld [vmem:[%s5851_s18 + $0x40] sm:$0x3]  ;;  %8556 = vst [vmem:[#allocation9_spill] sm:$0xff] %v5902_v29  ;;  %v5007_v32 = vpack.i.bf16 %v5890_v23, %v5887_v22  ;;  %v423_v36 = vrot.slane %v5887_v22, 1 }
  0x21   : > { %v4992_v28 = vpack.i.bf16 %v412_v26, %v410_v25  ;;  %4998 = vrot.lane.b32.xlu1 %v4997_v20, %s5733_s19  ;;  %v416_v30 = vrot.slane %v5893_v24, 1  ;;  %v5906_v31 = vld [vmem:[%s5851_s18 + $0x58] sm:$0x3]  ;;  %v5911_v33 = vsel %vm407_vm0, %v418_v21, %v419_v19  ;;  %v421_v34 = vrot.slane %v5898_v27, 1  ;;  %v5927_v41 = vld [vmem:[%s5851_s18 + $0x68] sm:$0xff]  ;;  %v5947_v49 = vld [vmem:[%s5851_s18 + $0x80] sm:$0xff] }
  0x22   : > { %8557 = vst [vmem:[#allocation10_spill] sm:$0xff] %v5911_v33  ;;  %v424_v37 = vrot.slane %v5890_v23, 1  ;;  %v426_v38 = vrot.slane %v5906_v31, 1  ;;  %v5933_v43 = vld [vmem:[%s5851_s18 + $0x70] sm:$0x3]  ;;  %v428_v45 = vrot.slane %v5924_v40, 1  ;;  %v5017_v47 = vpack.i.bf16 %v5927_v41, %v5924_v40 }
  0x23   : > { %4993 = vrot.lane.b32.xlu0 %v4992_v28, %s5733_s19  ;;  %v5916_v35 = vsel %vm407_vm0, %v414_v9, %v416_v30  ;;  %v5930_v42 = vsel %vm407_vm0, %v419_v19, %v421_v34  ;;  %v429_v46 = vrot.slane %v5927_v41, 1  ;;  %v5944_v48 = vld [vmem:[%s5851_s18 + $0x78] sm:$0xff]  ;;  %v431_v52 = vrot.slane %v5933_v43, 1  ;;  %v5957_v53 = vld [vmem:[%s5851_s18 + $0x88] sm:$0x3]  ;;  %v5975_v61 = vld [vmem:[%s5851_s18 + $0x90] sm:$0xff] }
  0x24   : > { %8558 = vst [vmem:[#allocation11_spill] sm:$0xff] %v5916_v35  ;;  %v5002_v39 = vpack.i.bf16 %v5916_v35, %v5902_v29  ;;  %8559 = vst [vmem:[#allocation12_spill] sm:$0xff] %v5930_v42  ;;  %v5012_v44 = vpack.i.bf16 %v5930_v42, %v5911_v33  ;;  %v5950_v50 = vsel %vm407_vm0, %v423_v36, %v424_v37  ;;  %v433_v58 = vrot.slane %v5944_v48, 1  ;;  %v5978_v62 = vld [vmem:[%s5851_s18 + $0x98] sm:$0xff]  ;;  %v5981_v63 = vld [vmem:[%s5851_s18 + $0xa0] sm:$0x3] }
  0x25   : > { %8560 = vst [vmem:[#allocation13_spill] sm:$0xff] %v5950_v50  ;;  %v5953_v51 = vsel %vm407_vm0, %v424_v37, %v426_v38  ;;  %v5027_v54 = vpack.i.bf16 %v5947_v49, %v5944_v48  ;;  %v5965_v56 = vsel %vm407_vm0, %v428_v45, %v429_v46  ;;  %v5969_v57 = vsel %vm407_vm0, %v429_v46, %v431_v52  ;;  %v5984_v0 = vld [vmem:[%s5851_s18 + $0xa8] sm:$0xff]  ;;  %v5987_v1 = vld [vmem:[%s5851_s18 + $0xb0] sm:$0xff]  ;;  %v5563_v4 = vld [vmem:[%s8467_s1 + $0x58] sm:$0xff]  }
  0x26   : > { %5003 = vrot.lane.b32.xlu1 %v5002_v39, %s5733_s19  ;;  %8561 = vst [vmem:[#allocation14_spill] sm:$0xff] %v5953_v51  ;;  %v5022_v55 = vpack.i.bf16 %v5953_v51, %v5950_v50  ;;  %8562 = vst [vmem:[#allocation15_spill] sm:$0xff] %v5965_v56  ;;  %v434_v59 = vrot.slane %v5947_v49, 1  ;;  %v436_v60 = vrot.slane %v5957_v53, 1  ;;  %v438_v2 = vrot.slane %v5975_v61, 1  ;;  %4381 = vmatprep.subr.bf16.mxu0 %v5563_v4  ;;  %v5564_v14 = vld [vmem:[%s8467_s1 + $0x18] sm:$0xff]  }
  0x27   : > { %5008 = vrot.lane.b32.xlu0 %v5007_v32, %s5733_s19  ;;  %8563 = vst [vmem:[#allocation16_spill] sm:$0xff] %v5969_v57  ;;  %v439_v3 = vrot.slane %v5978_v62, 1  ;;  %v5032_v5 = vpack.i.bf16 %v5969_v57, %v5965_v56  ;;  %v5037_v8 = vpack.i.bf16 %v5978_v62, %v5975_v61  ;;  %v441_v11 = vrot.slane %v5981_v63, 1  ;;  %v6011_v15 = vld [vmem:[%s5851_s18 + $0xb8] sm:$0x3]  ;;  %v5565_v16 = vld [vmem:[%s8467_s1 + $0x60] sm:$0xff]   ;;  %4382 = vmatpush3.bf16.msra.mxu0 %v5564_v14 }
  0x28   : > { %v6001_v9 = vsel %vm407_vm0, %v433_v58, %v434_v59  ;;  %v6004_v10 = vsel %vm407_vm0, %v434_v59, %v436_v60  ;;  %v6018_v20 = vld [vmem:[%s5851_s18 + $0xc0] sm:$0xff]  ;;  %v6021_v21 = vld [vmem:[%s5851_s18 + $0xc8] sm:$0xff]  ;;  %v5047_v28 = vpack.i.bf16 %v5987_v1, %v5984_v0  ;;  %v443_v32 = vrot.slane %v5984_v0, 1  ;;  %4383 = vmatprep.subr.bf16.mxu0 %v5565_v16  ;;  %v6050_v46 = vld [vmem:[%s5851_s18 + $0xd8] sm:$0xff] }
  0x29   : > { %8564 = vst [vmem:[#allocation17_spill] sm:$0xff] %v6001_v9  ;;  %8565 = vst [vmem:[#allocation18_spill] sm:$0xff] %v6004_v10  ;;  %v5566_v26 = vld [vmem:[%s8467_s1 + $0x20] sm:$0xff]   ;;  %v5042_v30 = vpack.i.bf16 %v6004_v10, %v6001_v9  ;;  %v5567_v34 = vld [vmem:[%s8467_s1 + $0x68] sm:$0xff]   ;;  %v6038_v36 = vsel %vm407_vm0, %v438_v2, %v439_v3  ;;  %v6041_v37 = vsel %vm407_vm0, %v439_v3, %v441_v11  ;;  %v444_v38 = vrot.slane %v5987_v1, 1 }
  0x2a   : > { %5013 = vrot.lane.b32.xlu1 %v5012_v44, %s5733_s19  ;;  %8566 = vst [vmem:[#allocation19_spill] sm:$0xff] %v6038_v36  ;;  %8567 = vst [vmem:[#allocation20_spill] sm:$0xff] %v6041_v37  ;;  %v446_v39 = vrot.slane %v6011_v15, 1  ;;  %v6046_v44 = vld [vmem:[%s5851_s18 + $0xd0] sm:$0x3]  ;;  %v5568_v52 = vld [vmem:[%s8467_s1 + $0x28] sm:$0xff]  }
  0x2b   : > { %5018 = vrot.lane.b32.xlu0 %v5017_v47, %s5733_s19  ;;  %v6053_v47 = vld [vmem:[%s5851_s18 + $0xe0] sm:$0xff]  ;;  %4384 = vmatpush3.bf16.msra.mxu0 %v5566_v26  ;;  %v448_v58 = vrot.slane %v6018_v20, 1  ;;  %v6065_v59 = vld [vmem:[%s5851_s18 + $0xe8] sm:$0x3]  ;;  %v5569_v60 = vld [vmem:[%s8467_s1 + $0x70] sm:$0xff]   ;;  %v6072_v2 = vsel %vm407_vm0, %v443_v32, %v444_v38  ;;  %v449_v4 = vrot.slane %v6021_v21, 1 }
  0x2c   : > { %4385 = vmatprep.subr.bf16.mxu0 %v5567_v34  ;;  %8568 = vst [vmem:[#allocation21_spill] sm:$0xff] %v6072_v2  ;;  %v6075_v3 = vsel %vm407_vm0, %v444_v38, %v446_v39  ;;  %v6083_v11 = vld [vmem:[%s5851_s18 + $0xf0] sm:$0xff]  ;;  %v6086_v14 = vld [vmem:[%s5851_s18 + $0xf8] sm:$0xff]  ;;  %v453_v16 = vrot.slane %v6050_v46, 1  ;;  %v5067_v32 = vpack.i.bf16 %v6053_v47, %v6050_v46  ;;  %v6102_v38 = vld [vmem:[%s5851_s18 + $0x108] sm:$0xff]  ;;  %v456_v39 = vrot.slane %v6065_v59, 1 }
  0x2d   : > { %8569 = vst [vmem:[#allocation22_spill] sm:$0xff] %v6075_v3  ;;  %v5570_v26 = vld [vmem:[%s8467_s1 + $0x30] sm:$0xff]   ;;  %v5062_v34 = vpack.i.bf16 %v6075_v3, %v6072_v2  ;;  %8571 = vst [vmem:[#allocation24_spill] sm:$0xff] %v6102_v38  ;;  %v6116_v19 = vsel %vm407_vm0, %v448_v58, %v449_v4  ;;  %v458_v2 = vrot.slane %v6083_v11, 1  ;;  %v6136_v58 = vld [vmem:[%s5851_s18 + $0x128] sm:$0xff]  ;;  %v5077_v10 = vpack.i.bf16 %v6086_v14, %v6083_v11 }
  0x2e   : > { %5023 = vrot.lane.b32.xlu1 %v5022_v55, %s5733_s19  ;;  %v5052_v55 = vpack.i.bf16 %v6041_v37, %v6038_v36  ;;  %v6109_v45 = vld [vmem:[%s5851_s18 + $0x130] sm:$0x3]  ;;  %8572 = vst [vmem:[#allocation25_spill] sm:$0xff] %v6116_v19  ;;  %v6127_v37 = vld [vmem:[%s5851_s18 + $0x148] sm:$0x3]  ;;  %v6133_v36 = vld [vmem:[%s5851_s18 + $0x120] sm:$0xff] }
  0x2f   : > { %5028 = vrot.lane.b32.xlu0 %v5027_v54, %s5733_s19  ;;  %v5057_v54 = vpack.i.bf16 %v6021_v21, %v6018_v20  ;;  %4386 = vmatpush3.bf16.msra.mxu0 %v5568_v52  ;;  %v6106_v52 = vld [vmem:[%s5851_s18 + $0x118] sm:$0x3]  ;;  %v6122_v3 = vld [vmem:[%s5851_s18 + $0x110] sm:$0xff]  ;;  %8574 = vst [vmem:[#allocation27_spill] sm:$0xff] %v6133_v36  ;;  %v463_v57 = vrot.slane %v6102_v38, 1  ;;  %v6157_v51 = vld [vmem:[%s8467_s1 + $0x100] sm:$0xff]  }
  0x30   : > { %4387 = vmatprep.subr.bf16.mxu0 %v5569_v60  ;;  %v459_v60 = vrot.slane %v6086_v14, 1  ;;  %v6145_v9 = vld [vmem:[%s5851_s18 + $0x138] sm:$0xff]  ;;  %v6152_v56 = vld [vmem:[%s5851_s18 + $0x160] sm:$0x3]  ;;  %8575 = vst [vmem:[#allocation28_spill] sm:$0xff] %v6157_v51  ;;  %v6170_v35 = vld [vmem:[%s5851_s18 + $0x150] sm:$0xff] }
  0x31   : > { %8578 = vst [vmem:[#allocation31_spill] sm:$0xff] %v6170_v35  ;;  %v5577_v29 = vld [vmem:[%s8467_s1 + $0xc8] sm:$0xff]   ;;  %v5579_v12 = vld [vmem:[%s8467_s1 + $0xd0] sm:$0xff]  }
  0x32   : > { %5033 = vrot.lane.b32.xlu1 %v5032_v5, %s5733_s19  ;;  %v451_v5 = vrot.slane %v6046_v44, 1  ;;  %v5580_v17 = vld [vmem:[%s8467_s1 + $0x90] sm:$0xff]  }
  0x33   : > { %5038 = vrot.lane.b32.xlu0 %v5037_v8, %s5733_s19  ;;  %v6080_v8 = vld [vmem:[%s5851_s18 + $0x100] sm:$0x3]  ;;  %4388 = vmatpush3.bf16.msra.mxu0 %v5570_v26  ;;  %v464_v26 = vrot.slane %v6122_v3, 1 }
  0x34   : > { %8570 = vst [vmem:[#allocation23_spill] sm:$0xff] %v6080_v8  ;;  %v6119_v25 = vsel %vm407_vm0, %v449_v4, %v451_v5  ;;  %v461_v4 = vrot.slane %v6080_v8, 1  ;;  %v5572_v5 = vld [vmem:[%s8467_s1 + $0x38] sm:$0xff]   ;;  %v8600_v8 = vrot.slane %v6152_v56, 1 }
  0x35   : > { %8573 = vst [vmem:[#allocation26_spill] sm:$0xff] %v6119_v25  ;;  %v5072_v50 = vpack.i.bf16 %v6119_v25, %v6116_v19  ;;  %v6178_v25 = vld [vmem:[%s5851_s18 + $0x158] sm:$0xff] }
  0x36   : > { %5043 = vrot.lane.b32.xlu1 %v5042_v30, %s5733_s19  ;;  %v5574_v30 = vld [vmem:[%s8467_s1 + $0xc0] sm:$0xff]   ;;  %v6184_v19 = vld [vmem:[%s5851_s18 + $0x178] sm:$0x3] }
  0x37   : > { %5048 = vrot.lane.b32.xlu0 %v5047_v28, %s5733_s19  ;;  %v454_v28 = vrot.slane %v6053_v47, 1  ;;  %4487 = vmatprep.subr.bf16.mxu1 %v5574_v30  ;;  %v6148_v30 = vld [vmem:[%s5851_s18 + $0x140] sm:$0xff] }
  0x39   : > { %v6163_v42 = vsel %vm407_vm0, %v453_v16, %v454_v28  ;;  %v6166_v33 = vsel %vm407_vm0, %v454_v28, %v456_v39  ;;  %v5578_v16 = vld [vmem:[%s8467_s1 + $0x88] sm:$0xff]   ;;  %v6196_v28 = vsel %vm407_vm0, %v458_v2, %v459_v60  ;;  %v6199_v39 = vsel %vm407_vm0, %v459_v60, %v461_v4 }
  0x3a   : > { %5053 = vrot.lane.b32.xlu1 %v5052_v55, %s5733_s19  ;;  %v5571_v55 = vld [vmem:[%s8467_s1 + $0x78] sm:$0xff]   ;;  %8576 = vst [vmem:[#allocation29_spill] sm:$0xff] %v6163_v42  ;;  %8577 = vst [vmem:[#allocation30_spill] sm:$0xff] %v6166_v33  ;;  %v5087_v60 = vpack.i.bf16 %v6122_v3, %v6102_v38  ;;  %v5092_v13 = vpack.i.bf16 %v6199_v39, %v6196_v28  ;;  %v6284_v2 = vld [vmem:[%s5851_s18 + $0x188] sm:$0xff] }
  0x3b   : > { %5058 = vrot.lane.b32.xlu0 %v5057_v54, %s5733_s19  ;;  %v5575_v54 = vld [vmem:[%s8467_s1 + $0x80] sm:$0xff]   ;;  %4389 = vmatprep.subr.bf16.mxu0 %v5571_v55  ;;  %v6187_v55 = vld [vmem:[%s5851_s18 + $0x168] sm:$0xff]  ;;  %8579 = vst [vmem:[#allocation32_spill] sm:$0xff] %v6196_v28  ;;  %8580 = vst [vmem:[#allocation33_spill] sm:$0xff] %v6199_v39  ;;  %v8592_v39 = vrot.slane %v6127_v37, 1 }
  0x3c   : > { %4488 = vmatpush3.bf16.msra.mxu1 %v5575_v54  ;;  %v6202_v54 = vld [vmem:[%s5851_s18 + $0x170] sm:$0xff]  ;;  %4390 = vmatpush3.bf16.msra.mxu0 %v5572_v5  ;;  %v5581_v5 = vld [vmem:[%s8467_s1 + $0xd8] sm:$0xff]  }
  0x3d   : > { %4489 = vmatprep.subr.bf16.mxu1 %v5577_v29  ;;  %v5082_v29 = vpack.i.bf16 %v6166_v33, %v6163_v42  ;;  %4863 = vmatprep.subr.bf16.mxu0 %v6157_v51  ;;  %v5127_v42 = vpack.i.bf16 %v6202_v54, %v6187_v55  ;;  %v6344_v51 = vld [vmem:[%s5851_s18 + $0x180] sm:$0xff] }
  0x3e   : > { %5063 = vrot.lane.b32.xlu1 %v5062_v34, %s5733_s19  ;;  %v466_v34 = vrot.slane %v6106_v52, 1 }
  0x3f   : > { %5068 = vrot.lane.b32.xlu0 %v5067_v32, %s5733_s19 }
  0x40   : > { %4490 = vmatpush3.bf16.msra.mxu1 %v5578_v16  ;;  %v6232_v16 = vsel %vm407_vm0, %v463_v57, %v464_v26  ;;  %v6235_v4 = vsel %vm407_vm0, %v464_v26, %v466_v34  ;;  %v5097_v57 = vpack.i.bf16 %v6136_v58, %v6133_v36  ;;  %v5582_v34 = vld [vmem:[%s8467_s1 + $0x98] sm:$0xff]   ;;  %v8584_v26 = vrot.slane %v6133_v36, 1 }
  0x41   : > { %4491 = vmatprep.subr.bf16.mxu1 %v5579_v12  ;;  %8581 = vst [vmem:[#allocation34_spill] sm:$0xff] %v6232_v16  ;;  %8582 = vst [vmem:[#allocation35_spill] sm:$0xff] %v6235_v4  ;;  %v5102_v12 = vpack.i.bf16 %v6235_v4, %v6232_v16  ;;  %v355_v4 = vld [vmem:[%s5851_s18 + $0x190] sm:$0x3]  ;;  %v8595_v16 = vrot.slane %v6178_v25, 1 }
  0x42   : > { %5073 = vrot.lane.b32.xlu1 %v5072_v50, %s5733_s19 }
  0x43   : > { %5078 = vrot.lane.b32.xlu0 %v5077_v10, %s5733_s19 }
  0x44   : > { %4492 = vmatpush3.bf16.msra.mxu1 %v5580_v17  ;;  %v8583_v17 = vrot.slane %v6136_v58, 1 }
  0x45   : > { %4493 = vmatprep.subr.bf16.mxu1 %v5581_v5  ;;  %v5584_v5 = vld [vmem:[%s8467_s1 + $0xa0] sm:$0xff]  }
  0x46   : > { %5083 = vrot.lane.b32.xlu1 %v5082_v29, %s5733_s19  ;;  %v5107_v29 = vpack.i.bf16 %v6148_v30, %v6145_v9  ;;  %v6274_v32 = vsel %vm407_vm0, %v8584_v26, %v8583_v17  ;;  %v8587_v50 = vmov %v8583_v17  ;;  %v5585_v26 = vld [vmem:[%s8467_s1 + $0xe8] sm:$0xff]   ;;  %v8589_v17 = vrot.slane %v6148_v30, 1 }
  0x47   : > { %5088 = vrot.lane.b32.xlu0 %v5087_v60, %s5733_s19  ;;  %v5583_v60 = vld [vmem:[%s8467_s1 + $0xe0] sm:$0xff]   ;;  %8585 = vst [vmem:[#allocation36_spill] sm:$0xff] %v6274_v32 }
  0x48   : > { %4494 = vmatpush3.bf16.msra.mxu1 %v5582_v34 }
  0x49   : > { %4495 = vmatprep.subr.bf16.mxu1 %v5583_v60  ;;  %v5587_v60 = vld [vmem:[%s8467_s1 + $0xf0] sm:$0xff]  }
  0x4a   : > { %5093 = vrot.lane.b32.xlu1 %v5092_v13, %s5733_s19  ;;  %v8586_v13 = vrot.slane %v6109_v45, 1 }
  0x4b   : > { %5098 = vrot.lane.b32.xlu0 %v5097_v57, %s5733_s19  ;;  %v8593_v57 = vmov %v8589_v17 }
  0x4c   : > { %v6281_v10 = vsel %vm407_vm0, %v8587_v50, %v8586_v13  ;;  %v8590_v50 = vrot.slane %v6145_v9, 1  ;;  %v6306_v34 = vsel %vm407_vm0, %v8593_v57, %v8592_v39  ;;  %v5586_v57 = vld [vmem:[%s8467_s1 + $0xa8] sm:$0xff]   ;;  %4496 = vmatpush3.bf16.msra.mxu1 %v5584_v5  ;;  %v607_v39 = vrot.slane %v355_v4, 1  ;;  %v356_v5 = vld [vmem:[%s5851_s18 + $0x198] sm:$0xff] }
  0x4d   : > { %8588 = vst [vmem:[#allocation37_spill] sm:$0xff] %v6281_v10  ;;  %8594 = vst [vmem:[#allocation39_spill] sm:$0xff] %v6306_v34  ;;  %4497 = vmatprep.subr.bf16.mxu1 %v5585_v26 }
  0x4e   : > { %v6299_v13 = vsel %vm407_vm0, %v8590_v50, %v8589_v17  ;;  %5103 = vrot.lane.b32.xlu1 %v5102_v12, %s5733_s19  ;;  %v5112_v17 = vpack.i.bf16 %v6281_v10, %v6274_v32  ;;  %v5117_v12 = vpack.i.bf16 %v6178_v25, %v6170_v35  ;;  %v357_v32 = vld [vmem:[%s5851_s18 + $0x1a0] sm:$0xff] }
  0x4f   : > { %8591 = vst [vmem:[#allocation38_spill] sm:$0xff] %v6299_v13  ;;  %5108 = vrot.lane.b32.xlu0 %v5107_v29, %s5733_s19  ;;  %v5122_v33 = vpack.i.bf16 %v6306_v34, %v6299_v13  ;;  %v8596_v29 = vrot.slane %v6170_v35, 1  ;;  %v8598_v13 = vrot.slane %v6284_v2, 1  ;;  %v650_v10 = vrot.slane %v357_v32, 1 }
  0x50   : > { %v8601_v34 = vrot.slane %v6178_v25, 1  ;;  %4498 = vmatpush3.bf16.msra.mxu1 %v5586_v57  ;;  %v642_v32 = vrot.slane %v6284_v2, 2  ;;  %v5590_v57 = vld [vmem:[%s8467_s1 + $0xb8] sm:$0xff]  }
  0x51   : > { %v6337_v28 = vsel %vm407_vm0, %v8596_v29, %v8595_v16  ;;  %v6351_v35 = vsel %vm407_vm0, %v8598_v13, %v607_v39  ;;  %v358_v16 = vld [vmem:[%s5851_s18 + $0x1a8] sm:$0x3]  ;;  %v649_v29 = vrot.slane %v356_v5, 1  ;;  %v641_v39 = vrot.slane %v6344_v51, 2  ;;  %4499 = vmatprep.subr.bf16.mxu1 %v5587_v60 }
  0x52   : > { %8597 = vst [vmem:[#allocation40_spill] sm:$0xff] %v6337_v28  ;;  %8599 = vst [vmem:[#allocation41_spill] sm:$0xff] %v6351_v35  ;;  %5113 = vrot.lane.b32.xlu1 %v5112_v17, %s5733_s19  ;;  %v652_v38 = vrot.slane %v358_v16, 1  ;;  %v6363_v36 = vsel %vm407_vm0, %v8601_v34, %v8600_v8  ;;  %v5588_v17 = vld [vmem:[%s8467_s1 + $0xb0] sm:$0xff]   ;;  %v644_v34 = vrot.slane %v355_v4, 2  ;;  %v5137_v60 = vpack.i.bf16 %v6284_v2, %v6344_v51 }
  0x53   : > { %5118 = vrot.lane.b32.xlu0 %v5117_v12, %s5733_s19  ;;  %8602 = vst [vmem:[#allocation42_spill] sm:$0xff] %v6363_v36  ;;  %v5589_v12 = vld [vmem:[%s8467_s1 + $0xf8] sm:$0xff]   ;;  %v6375_v5 = vsel %vm407_vm0, %v649_v29, %v650_v10  ;;  %v5132_v29 = vpack.i.bf16 %v6363_v36, %v6337_v28  ;;  %v6391_v13 = vsel %vm488_vm1, %v641_v39, %v642_v32  ;;  %v8605_v4 = vrot.slane %v6202_v54, 1 }
  0x54   : > { %v6378_v8 = vsel %vm407_vm0, %v650_v10, %v652_v38  ;;  %8603 = vst [vmem:[#allocation43_spill] sm:$0xff] %v6391_v13  ;;  %v6394_v38 = vsel %vm488_vm1, %v642_v32, %v644_v34  ;;  %v8606_v10 = vrot.slane %v6187_v55, 1  ;;  %v8608_v16 = vrot.slane %v6184_v19, 1  ;;  %4500 = vmatpush3.bf16.msra.mxu1 %v5588_v17 }
  0x55   : > { %8604 = vst [vmem:[#allocation44_spill] sm:$0xff] %v6394_v38  ;;  %v8609_v26 = vmov %v8605_v4  ;;  %v8612_v32 = vrot.slane %v5857_v6, 2  ;;  %v557_v17 = vrot.slane %v6127_v37, 2  ;;  %4501 = vmatprep.subr.bf16.mxu1 %v5589_v12  ;;  %v8618_v37 = vrot.slane %v5898_v27, 2 }
  0x56   : > { %5123 = vrot.lane.b32.xlu1 %v5122_v33, %s5733_s19  ;;  %v6402_v33 = vsel %vm407_vm0, %v8606_v10, %v8605_v4  ;;  %v6409_v50 = vsel %vm407_vm0, %v8609_v26, %v8608_v16  ;;  %v8613_v4 = vrot.slane %v5893_v24, 2  ;;  %v555_v26 = vrot.slane %v6148_v30, 2  ;;  %v8616_v16 = vld [vmem:[#allocation8_spill] sm:$0xff] }
  0x57   : > { %5128 = vrot.lane.b32.xlu0 %v5127_v42, %s5733_s19  ;;  %8607 = vst [vmem:[#allocation45_spill] sm:$0xff] %v6402_v33  ;;  %8610 = vst [vmem:[#allocation46_spill] sm:$0xff] %v6409_v50  ;;  %v8611_v42 = vrot.slane %v5860_v7, 2  ;;  %v5142_v6 = vpack.i.bf16 %v6409_v50, %v6402_v33  ;;  %v8615_v7 = vrot.slane %v5879_v18, 2  ;;  %v8624_v27 = vrot.slane %v5927_v41, 2  ;;  %v8674_v33 = vld [vmem:[#allocation11_spill] sm:$0xff] }
  0x58   : > { %4502 = vmatpush3.bf16.msra.mxu1 %v5590_v57  ;;  %v8625_v57 = vrot.slane %v5924_v40, 2 }
  0x59   : > { %v6418_v34 = vsel %vm488_vm1, %v8612_v32, %v8611_v42  ;;  %v8614_v10 = vmov %v8611_v42  ;;  %v8617_v42 = vrot.slane %v8616_v16, 2  ;;  %v8619_v30 = vmov %v8615_v7 }
  0x5a   : > { %v6425_v36 = vsel %vm488_vm1, %v8614_v10, %v8613_v4  ;;  %5133 = vrot.lane.b32.xlu1 %v5132_v29, %s5733_s19  ;;  %v6447_v12 = vsel %vm488_vm1, %v8619_v30, %v8618_v37  ;;  %v8621_v29 = vrot.slane %v5887_v22, 2  ;;  %v8622_v10 = vrot.slane %v5906_v31, 2 }
  0x5b   : > { %5138 = vrot.lane.b32.xlu0 %v5137_v60, %s5733_s19  ;;  %v5147_v24 = vpack.i.bf16 %v6425_v36, %v6418_v34  ;;  %v6440_v32 = vsel %vm488_vm1, %v8617_v42, %v8615_v7  ;;  %v8620_v60 = vrot.slane %v5890_v23, 2  ;;  %v6474_v31 = vsel %vm488_vm1, %v8625_v57, %v8624_v27 }
  0x5c   : > { %v5152_v18 = vpack.i.bf16 %v6447_v12, %v6440_v32  ;;  %v8626_v23 = vrot.slane %v5933_v43, 2  ;;  %v8627_v42 = vmov %v8624_v27  ;;  %v8628_v37 = vrot.slane %v5947_v49, 2 }
  0x5d   : > { %v6454_v4 = vsel %vm488_vm1, %v8621_v29, %v8620_v60  ;;  %v8623_v7 = vmov %v8620_v60  ;;  %v8630_v60 = vrot.slane %v5957_v53, 2  ;;  %v8634_v49 = vrot.slane %v5981_v63, 2 }
  0x5e   : > { %v6461_v16 = vsel %vm488_vm1, %v8623_v7, %v8622_v10  ;;  %5143 = vrot.lane.b32.xlu1 %v5142_v6, %s5733_s19  ;;  %v6481_v6 = vsel %vm488_vm1, %v8627_v42, %v8626_v23  ;;  %v8631_v40 = vmov %v8628_v37  ;;  %v8633_v10 = vrot.slane %v5975_v61, 2 }
  0x5f   : > { %5148 = vrot.lane.b32.xlu0 %v5147_v24, %s5733_s19  ;;  %v5157_v22 = vpack.i.bf16 %v6461_v16, %v6454_v4  ;;  %v8629_v24 = vrot.slane %v5944_v48, 2  ;;  %v6495_v29 = vsel %vm488_vm1, %v8631_v40, %v8630_v60  ;;  %v5162_v41 = vpack.i.bf16 %v6481_v6, %v6474_v31 }
  0x60   : > { %v8632_v48 = vrot.slane %v5978_v62, 2  ;;  %v8636_v27 = vrot.slane %v5987_v1, 2  ;;  %v8638_v23 = vrot.slane %v6011_v15, 2  ;;  %v8643_v1 = vrot.slane %v6046_v44, 2 }
  0x61   : > { %v6488_v30 = vsel %vm488_vm1, %v8629_v24, %v8628_v37  ;;  %v8641_v37 = vrot.slane %v6018_v20, 2  ;;  %v8646_v40 = vrot.slane %v6053_v47, 2  ;;  %v8652_v47 = vld [vmem:[#allocation23_spill] sm:$0xff] }
  0x62   : > { %5153 = vrot.lane.b32.xlu1 %v5152_v18, %s5733_s19  ;;  %v5167_v43 = vpack.i.bf16 %v6495_v29, %v6488_v30  ;;  %v6508_v53 = vsel %vm488_vm1, %v8633_v10, %v8632_v48  ;;  %v8635_v7 = vmov %v8632_v48  ;;  %v8639_v61 = vmov %v8636_v27 }
  0x63   : > { %5158 = vrot.lane.b32.xlu0 %v5157_v22, %s5733_s19  ;;  %v6515_v18 = vsel %vm488_vm1, %v8635_v7, %v8634_v49  ;;  %v8637_v22 = vrot.slane %v5984_v0, 2  ;;  %v6529_v42 = vsel %vm488_vm1, %v8639_v61, %v8638_v23  ;;  %v8640_v0 = vrot.slane %v6021_v21, 2  ;;  %v8656_v61 = vld [vmem:[#allocation24_spill] sm:$0xff] }
  0x64   : > { %v5172_v62 = vpack.i.bf16 %v6515_v18, %v6508_v53  ;;  %v8648_v48 = vrot.slane %v6065_v59, 2  ;;  %v8649_v20 = vmov %v8646_v40  ;;  %v8651_v49 = vrot.slane %v6083_v11, 2 }
  0x65   : > { %v6522_v57 = vsel %vm488_vm1, %v8637_v22, %v8636_v27  ;;  %v6542_v15 = vsel %vm488_vm1, %v8641_v37, %v8640_v0  ;;  %v8644_v24 = vmov %v8640_v0  ;;  %v8653_v7 = vrot.slane %v8652_v47, 2 }
  0x66   : > { %5163 = vrot.lane.b32.xlu1 %v5162_v41, %s5733_s19  ;;  %v5177_v63 = vpack.i.bf16 %v6529_v42, %v6522_v57  ;;  %8642 = vst [vmem:[#allocation8_spill] sm:$0xff] %v6542_v15  ;;  %v6549_v60 = vsel %vm488_vm1, %v8644_v24, %v8643_v1  ;;  %v8647_v41 = vrot.slane %v6050_v46, 2  ;;  %v6563_v10 = vsel %vm488_vm1, %v8649_v20, %v8648_v48  ;;  %v8660_v1 = vld [vmem:[#allocation31_spill] sm:$0xff] }
  0x67   : > { %5168 = vrot.lane.b32.xlu0 %v5167_v43, %s5733_s19  ;;  %8645 = vst [vmem:[#allocation47_spill] sm:$0xff] %v6549_v60  ;;  %v5182_v21 = vpack.i.bf16 %v6549_v60, %v6542_v15  ;;  %v8650_v46 = vrot.slane %v6086_v14, 2  ;;  %v8655_v23 = vrot.slane %v6122_v3, 2  ;;  %v8658_v0 = vrot.slane %v6106_v52, 2  ;;  %v8662_v3 = vld [vmem:[#allocation27_spill] sm:$0xff] }
  0x68   : > { %v6556_v43 = vsel %vm488_vm1, %v8647_v41, %v8646_v40  ;;  %v559_v24 = vrot.slane %v8660_v1, 2  ;;  %v560_v40 = vrot.slane %v6178_v25, 2  ;;  %v8661_v52 = vrot.slane %v6136_v58, 2 }
  0x69   : > { %v5187_v44 = vpack.i.bf16 %v6563_v10, %v6556_v43  ;;  %v6576_v59 = vsel %vm488_vm1, %v8651_v49, %v8650_v46  ;;  %v8654_v27 = vmov %v8650_v46  ;;  %v8659_v11 = vmov %v8655_v23 }
  0x6a   : > { %5173 = vrot.lane.b32.xlu1 %v5172_v62, %s5733_s19  ;;  %v6583_v22 = vsel %vm488_vm1, %v8654_v27, %v8653_v7  ;;  %v8657_v62 = vrot.slane %v8656_v61, 2  ;;  %v6597_v37 = vsel %vm488_vm1, %v8659_v11, %v8658_v0  ;;  %v8663_v48 = vrot.slane %v8662_v3, 2 }
  0x6b   : > { %5178 = vrot.lane.b32.xlu0 %v5177_v63, %s5733_s19  ;;  %v5192_v14 = vpack.i.bf16 %v6583_v22, %v6576_v59  ;;  %v8665_v46 = vmov %v8661_v52  ;;  %v562_v25 = vrot.slane %v6152_v56, 2  ;;  %v6628_v7 = vsel %vm488_vm1, %v555_v26, %v557_v17 }
  0x6c   : > { %v6590_v63 = vsel %vm488_vm1, %v8657_v62, %v8655_v23  ;;  %v6612_v20 = vsel %vm488_vm1, %v8663_v48, %v8661_v52  ;;  %v604_v27 = vrot.slane %v6344_v51, 1  ;;  %v6635_v58 = vsel %vm488_vm1, %v559_v24, %v560_v40  ;;  %v8670_v24 = vld [vmem:[#allocation6_spill] sm:$0xff] }
  0x6d   : > { %v5197_v41 = vpack.i.bf16 %v6597_v37, %v6590_v63  ;;  %v564_v56 = vrot.slane %v6187_v55, 2  ;;  %v565_v51 = vrot.slane %v6202_v54, 2  ;;  %v567_v17 = vrot.slane %v6184_v19, 2 }
  0x6e   : > { %5183 = vrot.lane.b32.xlu1 %v5182_v21, %s5733_s19  ;;  %v8664_v21 = vrot.slane %v6109_v45, 2  ;;  %v8667_v23 = vrot.slane %v6284_v2, 1  ;;  %v5232_v0 = vpack.i.bf16 %v6394_v38, %v6391_v13  ;;  %v8669_v11 = vpack.i.bf16 %v6378_v8, %v6375_v5 }
  0x6f   : > { %5188 = vrot.lane.b32.xlu0 %v5187_v44, %s5733_s19  ;;  %v8666_v44 = vrot.slane %v6145_v9, 2  ;;  %v6658_v54 = vsel %vm488_vm1, %v564_v56, %v565_v51  ;;  %v6661_v19 = vsel %vm488_vm1, %v565_v51, %v567_v17 }
  0x70   : > { %v6619_v49 = vsel %vm488_vm1, %v8665_v46, %v8664_v21  ;;  %v6649_v61 = vsel %vm407_vm0, %v604_v27, %v8667_v23  ;;  %v5222_v2 = vpack.i.bf16 %v6661_v19, %v6658_v54 }
  0x71   : > { %v6625_v47 = vsel %vm488_vm1, %v8666_v44, %v555_v26  ;;  %v5202_v45 = vpack.i.bf16 %v6619_v49, %v6612_v20  ;;  %v6642_v26 = vsel %vm488_vm1, %v560_v40, %v562_v25  ;;  %8668 = vst [vmem:[#allocation23_spill] sm:$0xff] %v6649_v61  ;;  %v5217_v62 = vpack.i.bf16 %v6351_v35, %v6649_v61 }
  0x72   : > { %5193 = vrot.lane.b32.xlu1 %v5192_v14, %s5733_s19  ;;  %v5207_v9 = vpack.i.bf16 %v6628_v7, %v6625_v47  ;;  %v5212_v55 = vpack.i.bf16 %v6642_v26, %v6635_v58  ;;  %v5629_v14 = vld [vmem:[%s5851_s18] sm:$0xff]  ;;  %v490_v40 = vrot.slane %v8670_v24, 2 }
  0x73   : > { %5198 = vrot.lane.b32.xlu0 %v5197_v41, %s5733_s19  ;;  %v489_v1 = vrot.slane %v5629_v14, 2  ;;  %v8671_v41 = vld [vmem:[#allocation7_spill] sm:$0xff] }
  0x74   : > { %v492_v52 = vrot.slane %v8671_v41, 2 }
  0x75   : > { %v491_v48 = vsel %vm488_vm1, %v489_v1, %v490_v40 }
  0x76   : > { %5203 = vrot.lane.b32.xlu1 %v5202_v45, %s5733_s19  ;;  %v493_v21 = vsel %vm488_vm1, %v490_v40, %v492_v52 }
  0x77   : > { %5208 = vrot.lane.b32.xlu0 %v5207_v9, %s5733_s19 }
  0x7a   : > { %5213 = vrot.lane.b32.xlu1 %v5212_v55, %s5733_s19 }
  0x7b   : > { %5218 = vrot.lane.b32.xlu0 %v5217_v62, %s5733_s19 }
  0x7e   : > { %5223 = vrot.lane.b32.xlu1 %v5222_v2, %s5733_s19  ;;  %v5630_v2 = vld [vmem:[%s5851_s18 + $0x8] sm:$0xff] }
  0x7f   : > { %5228 = vrot.lane.b32.xlu0 %v8669_v11, %s5733_s19 }
  0x82   : > { %5233 = vrot.lane.b32.xlu1 %v5232_v0, %s5733_s19 }
  0x91   : > { %v4989_v3 = vpop.permute.xlu0 %4988 }
  0x92   : > { %v4991_v46 = vunpack.i.h.bf16 %v4989_v3  ;;  %v4990_v25 = vunpack.i.l.bf16 %v4989_v3 }
  0x93   : > { %v4999_v44 = vpop.permute.xlu1 %4998 }
  0x94   : > { %v996_v5 = vsel %vm963_vm2, %v491_v48, %v4990_v25  ;;  %v997_v8 = vsel %vm963_vm2, %v493_v21, %v4991_v46  ;;  %v5001_v27 = vunpack.i.h.bf16 %v4999_v44  ;;  %v5000_v45 = vunpack.i.l.bf16 %v4999_v44  ;;  %v8672_v48 = vld [vmem:[#allocation28_spill] sm:$0xff]  ;;  %v5631_v21 = vld [vmem:[%s5851_s18 + $0x18] sm:$0xff] }
  0x95   : > { %v4994_v56 = vpop.permute.xlu0 %4993  ;;  %v1065_v9 = vpack.c.bf16 %v997_v8, %v996_v5  ;;  %v5632_v25 = vld [vmem:[%s5851_s18 + $0x20] sm:$0xff] }
  0x96   : > { %v4996_v51 = vunpack.i.h.bf16 %v4994_v56  ;;  %v4995_v17 = vunpack.i.l.bf16 %v4994_v56  ;;  %v998_v23 = vsel %vm963_vm2, %v6418_v34, %v5000_v45  ;;  %v999_v55 = vsel %vm963_vm2, %v6425_v36, %v5001_v27  ;;  %v5576_v34 = vld [vmem:[%s8467_s1 + $0x108] sm:$0xff]  }
  0x97   : > { %1498 = vmatprep.mubr.bf16.mxu0 %v1065_v9  ;;  %v1070_v1 = vpack.c.bf16 %v999_v55, %v998_v23  ;;  %v5591_v9 = vld [vmem:[%s8467_s1 + $0x110] sm:$0xff]   ;;  %v5634_v55 = vld [vmem:[%s5851_s18 + $0x38] sm:$0xff] }
  0x98   : > { %v964_v62 = vsel %vm963_vm2, %v5629_v14, %v4995_v17  ;;  %v965_v0 = vsel %vm963_vm2, %v5630_v2, %v4996_v51  ;;  %v5004_v11 = vpop.permute.xlu1 %5003  ;;  %v5633_v17 = vld [vmem:[%s5851_s18 + $0x30] sm:$0xff] }
  0x99   : > { %v5009_v24 = vpop.permute.xlu0 %5008  ;;  %v1064_v40 = vpack.c.bf16 %v965_v0, %v964_v62  ;;  %v5006_v41 = vunpack.i.h.bf16 %v5004_v11  ;;  %v5005_v52 = vunpack.i.l.bf16 %v5004_v11 }
  0x9a   : > { %v5011_v3 = vunpack.i.h.bf16 %v5009_v24  ;;  %v5010_v36 = vunpack.i.l.bf16 %v5009_v24 }
  0x9b   : > { %1499 = vmatmul.mubr.bf16.vlgmr.msra.gmra.mrb[0].mxu0 %v1064_v40  ;;  %v966_v46 = vsel %vm963_vm2, %v5631_v21, %v5005_v52  ;;  %v967_v44 = vsel %vm963_vm2, %v5632_v25, %v5006_v41  ;;  %v5592_v41 = vld [vmem:[%s8467_s1 + $0x118] sm:$0xff]  }
  0x9c   : > { %4864 = vmatpush3.bf16.msra.mxu0 %v8672_v48  ;;  %1506 = vmatprep.mubr.bf16.mxu0 %v1070_v1  ;;  %v5014_v14 = vpop.permute.xlu1 %5013  ;;  %v1000_v45 = vsel %vm963_vm2, %v6440_v32, %v5010_v36  ;;  %v1001_v56 = vsel %vm963_vm2, %v6447_v12, %v5011_v3  ;;  %v1069_v51 = vpack.c.bf16 %v967_v44, %v966_v46 }
  0x9d   : > { %v5019_v5 = vpop.permute.xlu0 %5018  ;;  %v5016_v8 = vunpack.i.h.bf16 %v5014_v14  ;;  %v5015_v27 = vunpack.i.l.bf16 %v5014_v14  ;;  %4865 = vmatprep.subr.bf16.mxu0 %v5576_v34  ;;  %v1074_v0 = vpack.c.bf16 %v1001_v56, %v1000_v45  ;;  %v5636_v56 = vld [vmem:[%s5851_s18 + $0x50] sm:$0xff] }
  0x9e   : > { %v5021_v1 = vunpack.i.h.bf16 %v5019_v5  ;;  %v5020_v24 = vunpack.i.l.bf16 %v5019_v5 }
  0x9f   : > { %v968_v23 = vsel %vm963_vm2, %v5633_v17, %v5015_v27  ;;  %v969_v62 = vsel %vm963_vm2, %v5634_v55, %v5016_v8  ;;  %v5635_v27 = vld [vmem:[%s5851_s18 + $0x48] sm:$0xff] }
  0xa0   : > { %v5024_v2 = vpop.permute.xlu1 %5023  ;;  %v1067_v11 = vpack.c.bf16 %v969_v62, %v968_v23  ;;  %4866 = vmatpush3.bf16.msra.mxu0 %v5576_v34  ;;  %v1002_v36 = vsel %vm963_vm2, %v6454_v4, %v5020_v24  ;;  %v1003_v34 = vsel %vm963_vm2, %v6461_v16, %v5021_v1 }
  0xa1   : > { %v5029_v40 = vpop.permute.xlu0 %5028  ;;  %4867 = vmatprep.subr.bf16.mxu0 %v5591_v9  ;;  %v5026_v48 = vunpack.i.h.bf16 %v5024_v2  ;;  %v5025_v14 = vunpack.i.l.bf16 %v5024_v2  ;;  %v1078_v46 = vpack.c.bf16 %v1003_v34, %v1002_v36  ;;  %v5637_v36 = vld [vmem:[%s5851_s18 + $0x60] sm:$0xff] }
  0xa2   : > { %1659 = vmatprep.mubr.bf16.mxu1 %v1067_v11  ;;  %v5031_v25 = vunpack.i.h.bf16 %v5029_v40  ;;  %v5030_v44 = vunpack.i.l.bf16 %v5029_v40 }
  0xa3   : > { %1507 = vmatmul.mubr.bf16.gmra.mrb[4].mxu0 %v1069_v51  ;;  %v970_v45 = vsel %vm963_vm2, %v5635_v27, %v5025_v14 }
  0xa4   : > { %v5034_v52 = vpop.permute.xlu1 %5033  ;;  %1514 = vmatprep.mubr.bf16.mxu0 %v1074_v0  ;;  %4868 = vmatpush3.bf16.msra.mxu0 %v5591_v9  ;;  %v971_v9 = vsel %vm963_vm2, %v5636_v56, %v5026_v48  ;;  %v1004_v17 = vsel %vm963_vm2, %v6474_v31, %v5030_v44  ;;  %v1005_v23 = vsel %vm963_vm2, %v6481_v6, %v5031_v25  ;;  %v5638_v48 = vld [vmem:[%s5851_s18 + $0x68] sm:$0xff] }
  0xa5   : > { %v5039_v3 = vpop.permute.xlu0 %5038  ;;  %4869 = vmatprep.subr.bf16.mxu0 %v5592_v41  ;;  %v6723_v55 = vpack.c.bf16 %v971_v9, %v970_v45  ;;  %v5036_v62 = vunpack.i.h.bf16 %v5034_v52  ;;  %v5035_v2 = vunpack.i.l.bf16 %v5034_v52 }
  0xa6   : > { %v5041_v1 = vunpack.i.h.bf16 %v5039_v3  ;;  %v5040_v24 = vunpack.i.l.bf16 %v5039_v3 }
  0xa7   : > { %v972_v34 = vsel %vm963_vm2, %v5637_v36, %v5035_v2  ;;  %v973_v14 = vsel %vm963_vm2, %v5638_v48, %v5036_v62  ;;  %v5639_v2 = vld [vmem:[%s5851_s18 + $0x78] sm:$0xff] }
  0xa8   : > { %v5044_v21 = vpop.permute.xlu1 %5043  ;;  %4870 = vmatpush3.bf16.msra.mxu0 %v5592_v41  ;;  %v1006_v3 = vsel %vm963_vm2, %v6488_v30, %v5040_v24  ;;  %v6742_v25 = vpack.c.bf16 %v973_v14, %v972_v34 }
  0xa9   : > { %v5049_v5 = vpop.permute.xlu0 %5048  ;;  %v5046_v44 = vunpack.i.h.bf16 %v5044_v21  ;;  %v5045_v27 = vunpack.i.l.bf16 %v5044_v21 }
  0xaa   : > { %v5051_v9 = vunpack.i.h.bf16 %v5049_v5 }
  0xab   : > { %1515 = vmatmul.mubr.bf16.gmra.mrb[8].mxu0 %v1067_v11  ;;  %v1082_v11 = vpack.c.bf16 %v1005_v23, %v1004_v17  ;;  %v5050_v17 = vunpack.i.l.bf16 %v5049_v5 }
  0xac   : > { %v5054_v8 = vpop.permute.xlu1 %5053  ;;  %1522 = vmatprep.mubr.bf16.mxu0 %v1078_v46  ;;  %v1007_v46 = vsel %vm963_vm2, %v6495_v29, %v5041_v1  ;;  %v5640_v1 = vld [vmem:[%s5851_s18 + $0x80] sm:$0xff]  ;;  %v1009_v36 = vsel %vm963_vm2, %v6515_v18, %v5051_v9  ;;  %v5642_v9 = vld [vmem:[%s5851_s18 + $0x98] sm:$0xff] }
  0xad   : > { %v5059_v51 = vpop.permute.xlu0 %5058  ;;  %v1086_v56 = vpack.c.bf16 %v1007_v46, %v1006_v3  ;;  %v975_v24 = vsel %vm963_vm2, %v5640_v1, %v5046_v44  ;;  %v1008_v5 = vsel %vm963_vm2, %v6508_v53, %v5050_v17  ;;  %v5056_v48 = vunpack.i.h.bf16 %v5054_v8  ;;  %v5641_v17 = vld [vmem:[%s5851_s18 + $0x90] sm:$0xff] }
  0xae   : > { %v5055_v14 = vunpack.i.l.bf16 %v5054_v8  ;;  %v1090_v46 = vpack.c.bf16 %v1009_v36, %v1008_v5 }
  0xb0   : > { %v6725_v0 = vpop.permute.xlu1 %5063  ;;  %v976_v1 = vsel %vm963_vm2, %v5641_v17, %v5055_v14 }
  0xb1   : > { %v6727_v40 = vpop.permute.xlu0 %5068  ;;  %v5066_v36 = vunpack.i.h.bf16 %v6725_v0 }
  0xb3   : > { %1523 = vmatmul.mubr.bf16.gmra.mrb[12].mxu0 %v6723_v55 }
  0xb4   : > { %v6730_v41 = vpop.permute.xlu1 %5073  ;;  %1530 = vmatprep.mubr.bf16.mxu0 %v1082_v11  ;;  %v974_v11 = vsel %vm963_vm2, %v5639_v2, %v5045_v27  ;;  %v5061_v27 = vunpack.i.h.bf16 %v5059_v51 }
  0xb5   : > { %v6736_v52 = vpop.permute.xlu0 %5078  ;;  %v6761_v34 = vpack.c.bf16 %v975_v24, %v974_v11  ;;  %v977_v11 = vsel %vm963_vm2, %v5642_v9, %v5056_v48  ;;  %v5071_v48 = vunpack.i.h.bf16 %v6727_v40  ;;  %v5070_v9 = vunpack.i.l.bf16 %v6727_v40 }
  0xb6   : > { %v1011_v24 = vsel %vm963_vm2, %v6529_v42, %v5061_v27  ;;  %v6780_v5 = vpack.c.bf16 %v977_v11, %v976_v1  ;;  %v5643_v27 = vld [vmem:[%s5851_s18 + $0xa8] sm:$0xff]  ;;  %v5644_v11 = vld [vmem:[%s5851_s18 + $0xb0] sm:$0xff] }
  0xb7   : > { %v1013_v40 = vsel %vm963_vm2, %v6549_v60, %v5071_v48  ;;  %v5645_v48 = vld [vmem:[%s5851_s18 + $0xc0] sm:$0xff]  ;;  %v5646_v60 = vld [vmem:[%s5851_s18 + $0xc8] sm:$0xff] }
  0xb8   : > { %v6744_v45 = vpop.permute.xlu1 %5083 }
  0xb9   : > { %v6746_v23 = vpop.permute.xlu0 %5088 }
  0xbb   : > { %1531 = vmatmul.mubr.bf16.gmra.mrb[16].mxu0 %v6742_v25 }
  0xbc   : > { %v6749_v62 = vpop.permute.xlu1 %5093  ;;  %1538 = vmatprep.mubr.bf16.mxu0 %v1086_v56  ;;  %v5060_v56 = vunpack.i.l.bf16 %v5059_v51 }
  0xbd   : > { %v6755_v21 = vpop.permute.xlu0 %5098 }
  0xbe   : > { %v1010_v51 = vsel %vm963_vm2, %v6522_v57, %v5060_v56 }
  0xbf   : > { %v1094_v17 = vpack.c.bf16 %v1011_v24, %v1010_v51  ;;  %v1012_v51 = vsel %vm963_vm2, %v6542_v15, %v5070_v9  ;;  %v5075_v24 = vunpack.i.l.bf16 %v6730_v41 }
  0xc0   : > { %v6763_v3 = vpop.permute.xlu1 %5103 }
  0xc1   : > { %v6765_v2 = vpop.permute.xlu0 %5108  ;;  %v980_v50 = vsel %vm963_vm2, %v5645_v48, %v5075_v24  ;;  %v5086_v48 = vunpack.i.h.bf16 %v6744_v45 }
  0xc3   : > { %1539 = vmatmul.mubr.bf16.gmra.mrb[20].mxu0 %v6761_v34 }
  0xc4   : > { %v6768_v44 = vpop.permute.xlu1 %5113  ;;  %1546 = vmatprep.mubr.bf16.mxu0 %v1090_v46  ;;  %v5065_v46 = vunpack.i.l.bf16 %v6725_v0  ;;  %v979_v0 = vsel %vm963_vm2, %v5644_v11, %v5066_v36  ;;  %v1098_v36 = vpack.c.bf16 %v1013_v40, %v1012_v51  ;;  %v5081_v11 = vunpack.i.h.bf16 %v6736_v52 }
  0xc5   : > { %v6774_v8 = vpop.permute.xlu0 %5118 }
  0xc6   : > { %v978_v1 = vsel %vm963_vm2, %v5643_v27, %v5065_v46  ;;  %v5076_v46 = vunpack.i.h.bf16 %v6730_v41  ;;  %v1015_v24 = vsel %vm963_vm2, %v6563_v10, %v5081_v11  ;;  %v5091_v11 = vunpack.i.h.bf16 %v6746_v23 }
  0xc7   : > { %v6804_v38 = vpack.c.bf16 %v979_v0, %v978_v1  ;;  %v8673_v1 = vld [vmem:[#allocation9_spill] sm:$0xff] }
  0xc8   : > { %v6784_v14 = vpop.permute.xlu1 %5123  ;;  %v981_v51 = vsel %vm963_vm2, %v5646_v60, %v5076_v46  ;;  %v8675_v60 = vld [vmem:[#allocation10_spill] sm:$0xff] }
  0xc9   : > { %v6788_v39 = vpop.permute.xlu0 %5128 }
  0xcb   : > { %1547 = vmatmul.mubr.bf16.gmra.mrb[24].mxu0 %v6780_v5 }
  0xcc   : > { %v6791_v56 = vpop.permute.xlu1 %5133  ;;  %1554 = vmatprep.mubr.bf16.mxu0 %v1094_v17  ;;  %v5080_v17 = vunpack.i.l.bf16 %v6736_v52 }
  0xcd   : > { %v6797_v13 = vpop.permute.xlu0 %5138 }
  0xce   : > { %v1014_v52 = vsel %vm963_vm2, %v6556_v43, %v5080_v17 }
  0xd0   : > { %v6808_v27 = vpop.permute.xlu1 %5143 }
  0xd1   : > { %v5149_v35 = vpop.permute.xlu0 %5148 }
  0xd2   : > { %v5151_v61 = vunpack.i.h.bf16 %v5149_v35  ;;  %v5150_v9 = vunpack.i.l.bf16 %v5149_v35 }
  0xd3   : > { %1555 = vmatmul.mubr.bf16.gmra.mrb[28].mxu0 %v6804_v38 }
  0xd4   : > { %v1028_v0 = vsel %vm963_vm2, %v8673_v1, %v5150_v9  ;;  %v1029_v28 = vsel %vm963_vm2, %v8674_v33, %v5151_v61  ;;  %v5154_v41 = vpop.permute.xlu1 %5153  ;;  %1562 = vmatprep.mubr.bf16.mxu0 %v1098_v36  ;;  %v6825_v9 = vpack.c.bf16 %v981_v51, %v980_v50  ;;  %v5085_v61 = vunpack.i.l.bf16 %v6744_v45  ;;  %v5647_v45 = vld [vmem:[%s5851_s18 + $0xd8] sm:$0xff]  ;;  %v5648_v33 = vld [vmem:[%s5851_s18 + $0xe0] sm:$0xff] }
  0xd5   : > { %v1066_v35 = vpack.c.bf16 %v1029_v28, %v1028_v0  ;;  %v5156_v40 = vunpack.i.h.bf16 %v5154_v41  ;;  %v5155_v15 = vunpack.i.l.bf16 %v5154_v41  ;;  %v8676_v28 = vld [vmem:[#allocation12_spill] sm:$0xff]  ;;  %v1102_v36 = vpack.c.bf16 %v1015_v24, %v1014_v52  ;;  %v5159_v41 = vpop.permute.xlu0 %5158 }
  0xd6   : > { %v5090_v0 = vunpack.i.l.bf16 %v6746_v23  ;;  %v5161_v51 = vunpack.i.h.bf16 %v5159_v41  ;;  %v5096_v23 = vunpack.i.h.bf16 %v6749_v62 }
  0xd7   : > { %1660 = vmatmul.mubr.bf16.vlgmr.msra.gmra.mrb[0].mxu1 %v1066_v35  ;;  %v1030_v17 = vsel %vm963_vm2, %v8675_v60, %v5155_v15  ;;  %v1031_v46 = vsel %vm963_vm2, %v8676_v28, %v5156_v40  ;;  %v5160_v35 = vunpack.i.l.bf16 %v5159_v41  ;;  %v983_v15 = vsel %vm963_vm2, %v5648_v33, %v5086_v48  ;;  %v8678_v48 = vld [vmem:[#allocation14_spill] sm:$0xff] }
  0xd8   : > { %1667 = vmatprep.mubr.bf16.mxu1 %v6723_v55  ;;  %v1071_v50 = vpack.c.bf16 %v1031_v46, %v1030_v17  ;;  %v982_v55 = vsel %vm963_vm2, %v5647_v45, %v5085_v61  ;;  %v1016_v52 = vsel %vm963_vm2, %v6576_v59, %v5090_v0  ;;  %v1017_v40 = vsel %vm963_vm2, %v6583_v22, %v5091_v11  ;;  %v8677_v61 = vld [vmem:[#allocation13_spill] sm:$0xff]  ;;  %v5164_v41 = vpop.permute.xlu1 %5163 }
  0xd9   : > { %v6845_v24 = vpack.c.bf16 %v983_v15, %v982_v55  ;;  %v5095_v17 = vunpack.i.l.bf16 %v6749_v62  ;;  %v1032_v33 = vsel %vm963_vm2, %v8677_v61, %v5160_v35  ;;  %v1033_v46 = vsel %vm963_vm2, %v8678_v48, %v5161_v51  ;;  %v5649_v62 = vld [vmem:[%s5851_s18 + $0xf0] sm:$0xff]  ;;  %v5650_v15 = vld [vmem:[%s5851_s18 + $0xf8] sm:$0xff] }
  0xda   : > { %v5101_v11 = vunpack.i.h.bf16 %v6755_v21  ;;  %v5100_v0 = vunpack.i.l.bf16 %v6755_v21  ;;  %v5166_v45 = vunpack.i.h.bf16 %v5164_v41  ;;  %v5165_v55 = vunpack.i.l.bf16 %v5164_v41 }
  0xdb   : > { %1563 = vmatmul.mubr.bf16.gmra.mrb[32].mxu0 %v6825_v9  ;;  %v985_v35 = vsel %vm963_vm2, %v5650_v15, %v5096_v23  ;;  %v5106_v21 = vunpack.i.h.bf16 %v6763_v3  ;;  %v5110_v41 = vunpack.i.l.bf16 %v6765_v2 }
  0xdc   : > { %1570 = vmatprep.mubr.bf16.mxu0 %v1102_v36  ;;  %v1106_v36 = vpack.c.bf16 %v1017_v40, %v1016_v52  ;;  %v1018_v51 = vsel %vm963_vm2, %v6590_v63, %v5100_v0  ;;  %v1019_v52 = vsel %vm963_vm2, %v6597_v37, %v5101_v11  ;;  %v5111_v11 = vunpack.i.h.bf16 %v6765_v2 }
  0xdd   : > { %v1110_v0 = vpack.c.bf16 %v1019_v52, %v1018_v51  ;;  %v5116_v2 = vunpack.i.h.bf16 %v6768_v44 }
  0xde   : > { %v1021_v51 = vsel %vm963_vm2, %v6619_v49, %v5111_v11  ;;  %v5121_v11 = vunpack.i.h.bf16 %v6774_v8 }
  0xdf   : > { %1668 = vmatmul.mubr.bf16.gmra.mrb[4].mxu1 %v1071_v50  ;;  %v1075_v50 = vpack.c.bf16 %v1033_v46, %v1032_v33  ;;  %v5105_v33 = vunpack.i.l.bf16 %v6763_v3  ;;  %v8680_v46 = vld [vmem:[#allocation16_spill] sm:$0xff]  ;;  %v5651_v3 = vld [vmem:[%s5851_s18 + $0x108] sm:$0xff] }
  0xe0   : > { %1675 = vmatprep.mubr.bf16.mxu1 %v6742_v25  ;;  %v984_v25 = vsel %vm963_vm2, %v5649_v62, %v5095_v17  ;;  %v8679_v17 = vld [vmem:[#allocation15_spill] sm:$0xff]  ;;  %v5169_v62 = vpop.permute.xlu0 %5168 }
  0xe1   : > { %v6865_v40 = vpack.c.bf16 %v985_v35, %v984_v25  ;;  %v1034_v23 = vsel %vm963_vm2, %v8679_v17, %v5165_v55  ;;  %v5171_v25 = vunpack.i.h.bf16 %v5169_v62  ;;  %v5170_v15 = vunpack.i.l.bf16 %v5169_v62  ;;  %v5652_v35 = vld [vmem:[%s5851_s18 + $0x110] sm:$0xff] }
  0xe2   : > { %v987_v55 = vsel %vm963_vm2, %v5652_v35, %v5106_v21  ;;  %v5120_v62 = vunpack.i.l.bf16 %v6774_v8  ;;  %v5126_v8 = vunpack.i.h.bf16 %v6784_v14 }
  0xe3   : > { %1571 = vmatmul.mubr.bf16.gmra.mrb[36].mxu0 %v6845_v24 }
  0xe4   : > { %1578 = vmatprep.mubr.bf16.mxu0 %v1106_v36  ;;  %v1035_v36 = vsel %vm963_vm2, %v8680_v46, %v5166_v45  ;;  %v1020_v45 = vsel %vm963_vm2, %v6612_v20, %v5110_v41 }
  0xe5   : > { %v1114_v41 = vpack.c.bf16 %v1021_v51, %v1020_v45  ;;  %v1023_v45 = vsel %vm963_vm2, %v6628_v7, %v5121_v11  ;;  %v5131_v11 = vunpack.i.h.bf16 %v6788_v39 }
  0xe7   : > { %1676 = vmatmul.mubr.bf16.gmra.mrb[8].mxu1 %v1075_v50  ;;  %v1079_v50 = vpack.c.bf16 %v1035_v36, %v1034_v23  ;;  %v5115_v23 = vunpack.i.l.bf16 %v6768_v44  ;;  %v8682_v36 = vld [vmem:[#allocation18_spill] sm:$0xff]  ;;  %v5653_v44 = vld [vmem:[%s5851_s18 + $0x120] sm:$0xff] }
  0xe8   : > { %1683 = vmatprep.mubr.bf16.mxu1 %v6761_v34  ;;  %v986_v34 = vsel %vm963_vm2, %v5651_v3, %v5105_v33  ;;  %v8681_v33 = vld [vmem:[#allocation17_spill] sm:$0xff]  ;;  %v5174_v3 = vpop.permute.xlu1 %5173 }
  0xe9   : > { %v6885_v52 = vpack.c.bf16 %v987_v55, %v986_v34  ;;  %v1036_v21 = vsel %vm963_vm2, %v8681_v33, %v5170_v15  ;;  %v5176_v34 = vunpack.i.h.bf16 %v5174_v3  ;;  %v5175_v35 = vunpack.i.l.bf16 %v5174_v3  ;;  %v5654_v55 = vld [vmem:[%s5851_s18 + $0x128] sm:$0xff] }
  0xea   : > { %v989_v15 = vsel %vm963_vm2, %v5654_v55, %v5116_v2  ;;  %v5130_v3 = vunpack.i.l.bf16 %v6788_v39  ;;  %v5136_v39 = vunpack.i.h.bf16 %v6791_v56 }
  0xeb   : > { %1579 = vmatmul.mubr.bf16.gmra.mrb[40].mxu0 %v6865_v40 }
  0xec   : > { %1586 = vmatprep.mubr.bf16.mxu0 %v1110_v0  ;;  %v1037_v0 = vsel %vm963_vm2, %v8682_v36, %v5171_v25  ;;  %v1022_v25 = vsel %vm963_vm2, %v6625_v47, %v5120_v62 }
  0xed   : > { %v1118_v62 = vpack.c.bf16 %v1023_v45, %v1022_v25  ;;  %v1025_v25 = vsel %vm963_vm2, %v6642_v26, %v5131_v11  ;;  %v5141_v11 = vunpack.i.h.bf16 %v6797_v13 }
  0xef   : > { %1684 = vmatmul.mubr.bf16.gmra.mrb[12].mxu1 %v1079_v50  ;;  %v1083_v50 = vpack.c.bf16 %v1037_v0, %v1036_v21  ;;  %v5125_v21 = vunpack.i.l.bf16 %v6784_v14  ;;  %v8684_v0 = vld [vmem:[#allocation20_spill] sm:$0xff]  ;;  %v5655_v14 = vld [vmem:[%s5851_s18 + $0x138] sm:$0xff] }
  0xf0   : > { %1691 = vmatprep.mubr.bf16.mxu1 %v6780_v5  ;;  %v988_v5 = vsel %vm963_vm2, %v5653_v44, %v5115_v23  ;;  %v8683_v23 = vld [vmem:[#allocation19_spill] sm:$0xff]  ;;  %v5179_v44 = vpop.permute.xlu0 %5178 }
  0xf1   : > { %v6905_v51 = vpack.c.bf16 %v989_v15, %v988_v5  ;;  %v1038_v2 = vsel %vm963_vm2, %v8683_v23, %v5175_v35  ;;  %v5181_v5 = vunpack.i.h.bf16 %v5179_v44  ;;  %v5180_v55 = vunpack.i.l.bf16 %v5179_v44  ;;  %v5656_v15 = vld [vmem:[%s5851_s18 + $0x140] sm:$0xff] }
  0xf2   : > { %v991_v35 = vsel %vm963_vm2, %v5656_v15, %v5126_v8  ;;  %v5140_v44 = vunpack.i.l.bf16 %v6797_v13  ;;  %v1027_v13 = vsel %vm963_vm2, %v6661_v19, %v5141_v11 }
  0xf3   : > { %1587 = vmatmul.mubr.bf16.gmra.mrb[44].mxu0 %v6885_v52 }
  0xf4   : > { %1594 = vmatprep.mubr.bf16.mxu0 %v1114_v41  ;;  %v1039_v41 = vsel %vm963_vm2, %v8684_v0, %v5176_v34  ;;  %v1024_v34 = vsel %vm963_vm2, %v6635_v58, %v5130_v3 }
  0xf5   : > { %v1122_v3 = vpack.c.bf16 %v1025_v25, %v1024_v34  ;;  %v5146_v34 = vunpack.i.h.bf16 %v6808_v27 }
  0xf7   : > { %1692 = vmatmul.mubr.bf16.gmra.mrb[16].mxu1 %v1083_v50  ;;  %v1087_v50 = vpack.c.bf16 %v1039_v41, %v1038_v2  ;;  %v5135_v2 = vunpack.i.l.bf16 %v6791_v56  ;;  %v8686_v41 = vld [vmem:[#allocation22_spill] sm:$0xff] }
  0xf8   : > { %1699 = vmatprep.mubr.bf16.mxu1 %v6804_v38  ;;  %v990_v38 = vsel %vm963_vm2, %v5655_v14, %v5125_v21  ;;  %v8685_v21 = vld [vmem:[#allocation21_spill] sm:$0xff]  ;;  %v5184_v14 = vpop.permute.xlu1 %5183  ;;  %v5657_v56 = vld [vmem:[%s5851_s18 + $0x150] sm:$0xff] }
  0xf9   : > { %v6925_v45 = vpack.c.bf16 %v991_v35, %v990_v38  ;;  %v1040_v8 = vsel %vm963_vm2, %v8685_v21, %v5180_v55  ;;  %v5186_v38 = vunpack.i.h.bf16 %v5184_v14  ;;  %v5185_v15 = vunpack.i.l.bf16 %v5184_v14  ;;  %v5658_v35 = vld [vmem:[%s5851_s18 + $0x158] sm:$0xff]  ;;  %v5189_v14 = vpop.permute.xlu0 %5188 }
  0xfa   : > { %v993_v55 = vsel %vm963_vm2, %v5658_v35, %v5136_v39  ;;  %v5190_v35 = vunpack.i.l.bf16 %v5189_v14 }
  0xfb   : > { %1595 = vmatmul.mubr.bf16.gmra.mrb[48].mxu0 %v6905_v51 }
  0xfc   : > { %1602 = vmatprep.mubr.bf16.mxu0 %v1118_v62  ;;  %v1041_v62 = vsel %vm963_vm2, %v8686_v41, %v5181_v5  ;;  %v1026_v5 = vsel %vm963_vm2, %v6658_v54, %v5140_v44 }
  0xfd   : > { %v1126_v44 = vpack.c.bf16 %v1027_v13, %v1026_v5  ;;  %v8690_v5 = vld [vmem:[#allocation30_spill] sm:$0xff] }
  0xff   : > { %1700 = vmatmul.mubr.bf16.gmra.mrb[20].mxu1 %v1087_v50  ;;  %v1091_v50 = vpack.c.bf16 %v1041_v62, %v1040_v8  ;;  %v5145_v8 = vunpack.i.l.bf16 %v6808_v27  ;;  %v8688_v62 = vld [vmem:[#allocation26_spill] sm:$0xff] }
 0x100   : > { %1707 = vmatprep.mubr.bf16.mxu1 %v6825_v9  ;;  %v992_v9 = vsel %vm963_vm2, %v5657_v56, %v5135_v2  ;;  %v8687_v2 = vld [vmem:[#allocation25_spill] sm:$0xff]  ;;  %v5191_v56 = vunpack.i.h.bf16 %v5189_v14  ;;  %v5660_v27 = vld [vmem:[%s5851_s18 + $0x170] sm:$0xff]  ;;  %v8691_v14 = vld [vmem:[#allocation32_spill] sm:$0xff] }
 0x101   : > { %v6945_v25 = vpack.c.bf16 %v993_v55, %v992_v9  ;;  %v1042_v39 = vsel %vm963_vm2, %v8687_v2, %v5185_v15 }
 0x102   : > { %v1045_v13 = vsel %vm963_vm2, %v8690_v5, %v5191_v56  ;;  %v8692_v56 = vld [vmem:[#allocation33_spill] sm:$0xff] }
 0x103   : > { %1603 = vmatmul.mubr.bf16.gmra.mrb[52].mxu0 %v6925_v45 }
 0x104   : > { %1610 = vmatprep.mubr.bf16.mxu0 %v1122_v3  ;;  %v1043_v3 = vsel %vm963_vm2, %v8688_v62, %v5186_v38  ;;  %v8689_v38 = vld [vmem:[#allocation29_spill] sm:$0xff] }
 0x105   : > { %v1095_v11 = vpack.c.bf16 %v1043_v3, %v1042_v39  ;;  %v1044_v15 = vsel %vm963_vm2, %v8689_v38, %v5190_v35  ;;  %v1068_v39 = vpack.c.bf16 %v6447_v12, %v6440_v32  ;;  %v5194_v3 = vpop.permute.xlu1 %5193  ;;  %v1077_v12 = vpack.c.bf16 %v6481_v6, %v6474_v31  ;;  %v5199_v35 = vpop.permute.xlu0 %5198 }
 0x106   : > { %v1085_v6 = vpack.c.bf16 %v6515_v18, %v6508_v53  ;;  %v8697_v18 = vld [vmem:[#allocation8_spill] sm:$0xff] }
 0x107   : > { %1708 = vmatmul.mubr.bf16.gmra.mrb[24].mxu1 %v1091_v50  ;;  %v5659_v50 = vld [vmem:[%s5851_s18 + $0x168] sm:$0xff] }
 0x108   : > { %1715 = vmatprep.mubr.bf16.mxu1 %v6845_v24  ;;  %v994_v9 = vsel %vm963_vm2, %v5659_v50, %v5145_v8  ;;  %v995_v24 = vsel %vm963_vm2, %v5660_v27, %v5146_v34  ;;  %v1099_v8 = vpack.c.bf16 %v1045_v13, %v1044_v15  ;;  %v5195_v34 = vunpack.i.l.bf16 %v5194_v3 }
 0x109   : > { %v6958_v55 = vpack.c.bf16 %v995_v24, %v994_v9  ;;  %v5201_v9 = vunpack.i.h.bf16 %v5199_v35  ;;  %v5200_v27 = vunpack.i.l.bf16 %v5199_v35  ;;  %v8694_v24 = vld [vmem:[#allocation35_spill] sm:$0xff]  ;;  %v5204_v15 = vpop.permute.xlu1 %5203 }
 0x10a   : > { %v8700_v35 = vld [vmem:[#allocation39_spill] sm:$0xff] }
 0x10b   : > { %1611 = vmatmul.mubr.bf16.gmra.mrb[56].mxu0 %v6945_v25  ;;  %v1049_v31 = vsel %vm963_vm2, %v8694_v24, %v5201_v9  ;;  %v1101_v9 = vpack.c.bf16 %v6583_v22, %v6576_v59  ;;  %v8701_v59 = vld [vmem:[#allocation40_spill] sm:$0xff] }
 0x10c   : > { %1618 = vmatprep.mubr.bf16.mxu0 %v1126_v44  ;;  %v5196_v44 = vunpack.i.h.bf16 %v5194_v3  ;;  %v5205_v3 = vunpack.i.l.bf16 %v5204_v15 }
 0x10e   : > { %v1047_v32 = vsel %vm963_vm2, %v8692_v56, %v5196_v44  ;;  %v8698_v44 = vld [vmem:[#allocation47_spill] sm:$0xff] }
 0x10f   : > { %1716 = vmatmul.mubr.bf16.gmra.mrb[28].mxu1 %v1095_v11  ;;  %v1046_v11 = vsel %vm963_vm2, %v8691_v14, %v5195_v34  ;;  %v1093_v34 = vpack.c.bf16 %v8698_v44, %v8697_v18 }
 0x110   : > { %1723 = vmatprep.mubr.bf16.mxu1 %v6865_v40  ;;  %v1073_v40 = vpack.c.bf16 %v6461_v16, %v6454_v4  ;;  %v1103_v50 = vpack.c.bf16 %v1047_v32, %v1046_v11  ;;  %v1081_v4 = vpack.c.bf16 %v6495_v29, %v6488_v30  ;;  %v8693_v16 = vld [vmem:[#allocation34_spill] sm:$0xff]  ;;  %v1089_v30 = vpack.c.bf16 %v6529_v42, %v6522_v57  ;;  %v8695_v29 = vld [vmem:[#allocation36_spill] sm:$0xff] }
 0x111   : > { %v1097_v57 = vpack.c.bf16 %v6563_v10, %v6556_v43  ;;  %v8699_v42 = vld [vmem:[#allocation38_spill] sm:$0xff] }
 0x113   : > { %1619 = vmatmul.mubr.bf16.gmra.mrb[60].mxu0 %v6958_v55 }
 0x114   : > { %4871 = vmatprep.mubr.msk.bf16.mxu0 %vm963_vm2, %v1068_v39  ;;  %v5206_v39 = vunpack.i.h.bf16 %v5204_v15  ;;  %v8702_v15 = vld [vmem:[#allocation42_spill] sm:$0xff] }
 0x117   : > { %1724 = vmatmul.mubr.bf16.gmra.mrb[32].mxu1 %v1099_v8  ;;  %v8696_v8 = vld [vmem:[#allocation37_spill] sm:$0xff] }
 0x118   : > { %1731 = vmatprep.mubr.bf16.mxu1 %v6885_v52  ;;  %v1048_v52 = vsel %vm963_vm2, %v8693_v16, %v5200_v27  ;;  %v1051_v53 = vsel %vm963_vm2, %v8696_v8, %v5206_v39  ;;  %v5214_v27 = vpop.permute.xlu1 %5213  ;;  %v1109_v39 = vpack.c.bf16 %v6619_v49, %v6612_v20  ;;  %v1113_v49 = vpack.c.bf16 %v6628_v7, %v6625_v47 }
 0x119   : > { %v1107_v13 = vpack.c.bf16 %v1049_v31, %v1048_v52  ;;  %v5216_v31 = vunpack.i.h.bf16 %v5214_v27  ;;  %v5215_v43 = vunpack.i.l.bf16 %v5214_v27 }
 0x11b   : > { %4872 = vmatmul.mubr.msk.bf16.vlgmr.msra.gmra.mrb[64].mxu0 %vm963_vm2, %v1073_v40  ;;  %v5209_v40 = vpop.permute.xlu0 %5208  ;;  %v1054_v22 = vsel %vm963_vm2, %v8701_v59, %v5215_v43 }
 0x11c   : > { %4875 = vmatprep.mubr.msk.bf16.mxu0 %vm963_vm2, %v1077_v12  ;;  %v5211_v32 = vunpack.i.h.bf16 %v5209_v40  ;;  %v5210_v12 = vunpack.i.l.bf16 %v5209_v40 }
 0x11f   : > { %1732 = vmatmul.mubr.bf16.gmra.mrb[36].mxu1 %v1103_v50  ;;  %v1053_v50 = vsel %vm963_vm2, %v8700_v35, %v5211_v32 }
 0x120   : > { %1739 = vmatprep.mubr.bf16.mxu1 %v6905_v51  ;;  %v1050_v51 = vsel %vm963_vm2, %v8695_v29, %v5205_v3  ;;  %v5224_v3 = vpop.permute.xlu1 %5223 }
 0x121   : > { %v1111_v11 = vpack.c.bf16 %v1051_v53, %v1050_v51  ;;  %v5662_v53 = vld [vmem:[%s5851_s18 + $0x188] sm:$0xff] }
 0x123   : > { %4876 = vmatmul.mubr.msk.bf16.gmra.mrb[68].mxu0 %vm963_vm2, %v1081_v4  ;;  %v5219_v4 = vpop.permute.xlu0 %5218 }
 0x124   : > { %4879 = vmatprep.mubr.msk.bf16.mxu0 %vm963_vm2, %v1085_v6  ;;  %v5221_v10 = vunpack.i.h.bf16 %v5219_v4  ;;  %v1105_v6 = vpack.c.bf16 %v6597_v37, %v6590_v63  ;;  %v5226_v37 = vunpack.i.h.bf16 %v5224_v3 }
 0x126   : > { %v1061_v18 = vsel %vm963_vm2, %v5662_v53, %v5221_v10  ;;  %v5665_v10 = vld [vmem:[%s5851_s18 + $0x1a8] sm:$0x3]  ;;  %v8708_v53 = vld [vmem:[#allocation43_spill] sm:$0xff] }
 0x127   : > { %1740 = vmatmul.mubr.bf16.gmra.mrb[40].mxu1 %v1107_v13  ;;  %v1055_v13 = vsel %vm963_vm2, %v8702_v15, %v5216_v31  ;;  %v5229_v44 = vpop.permute.xlu0 %5228 }
 0x128   : > { %1747 = vmatprep.mubr.bf16.mxu1 %v6925_v45  ;;  %v1052_v45 = vsel %vm963_vm2, %v8699_v42, %v5210_v12  ;;  %v1119_v63 = vpack.c.bf16 %v1055_v13, %v1054_v22  ;;  %v5231_v40 = vunpack.i.h.bf16 %v5229_v44  ;;  %v5230_v20 = vunpack.i.l.bf16 %v5229_v44  ;;  %v8704_v12 = vld [vmem:[#allocation46_spill] sm:$0xff]  ;;  %v8706_v22 = vld [vmem:[#allocation41_spill] sm:$0xff] }
 0x129   : > { %v1115_v52 = vpack.c.bf16 %v1053_v50, %v1052_v45  ;;  %v1117_v45 = vpack.c.bf16 %v6642_v26, %v6635_v58  ;;  %v5234_v50 = vpop.permute.xlu1 %5233  ;;  %v1121_v58 = vpack.c.bf16 %v6661_v19, %v6658_v54  ;;  %v8705_v26 = vld [vmem:[#allocation23_spill] sm:$0xff] }
 0x12a   : > { %v5236_v7 = vunpack.i.h.bf16 %v5234_v50  ;;  %v5235_v31 = vunpack.i.l.bf16 %v5234_v50 }
 0x12b   : > { %4880 = vmatmul.mubr.msk.bf16.gmra.mrb[72].mxu0 %vm963_vm2, %v1089_v30  ;;  %v5661_v30 = vld [vmem:[%s5851_s18 + $0x180] sm:$0xff] }
 0x12c   : > { %4883 = vmatprep.mubr.msk.bf16.mxu0 %vm963_vm2, %v1093_v34  ;;  %v1059_v13 = vsel %vm963_vm2, %v8706_v22, %v5236_v7 }
 0x12f   : > { %1748 = vmatmul.mubr.bf16.gmra.mrb[44].mxu1 %v1111_v11  ;;  %v8703_v11 = vld [vmem:[#allocation45_spill] sm:$0xff] }
 0x130   : > { %1755 = vmatprep.mubr.bf16.mxu1 %v6945_v25  ;;  %v5220_v25 = vunpack.i.l.bf16 %v5219_v4  ;;  %v5664_v4 = vld [vmem:[%s5851_s18 + $0x1a0] sm:$0xff] }
 0x132   : > { %v1060_v51 = vsel %vm963_vm2, %v5661_v30, %v5220_v25  ;;  %v657_v25 = vrot.slane %v5665_v10, 2 }
 0x133   : > { %4884 = vmatmul.mubr.msk.bf16.gmra.mrb[76].mxu0 %vm963_vm2, %v1097_v57  ;;  %v1124_v34 = vpack.c.bf16 %v1061_v18, %v1060_v51  ;;  %v1057_v57 = vsel %vm963_vm2, %v8704_v12, %v5226_v37  ;;  %v8707_v51 = vld [vmem:[#allocation44_spill] sm:$0xff] }
 0x134   : > { %4887 = vmatprep.mubr.msk.bf16.mxu0 %vm963_vm2, %v1101_v9  ;;  %v5663_v9 = vld [vmem:[%s5851_s18 + $0x198] sm:$0xff]  ;;  %v8709_v18 = vpack.c.bf16 %v8707_v51, %v8708_v53  ;;  %v5594_v51 = vld [vmem:[%s8471_s5] sm:$0xff]  }
 0x135   : > { %v1062_v27 = vsel %vm963_vm2, %v5663_v9, %v5230_v20  ;;  %v5601_v12 = vld [vmem:[%s8471_s5 + $0x60] sm:$0xff]  }
 0x137   : > { %1756 = vmatmul.mubr.bf16.gmra.mrb[48].mxu1 %v1115_v52  ;;  %v1063_v52 = vsel %vm963_vm2, %v5664_v4, %v5231_v40 }
 0x138   : > { %1763 = vmatprep.mubr.bf16.mxu1 %v6958_v55  ;;  %v5225_v55 = vunpack.i.l.bf16 %v5224_v3  ;;  %v1128_v43 = vpack.c.bf16 %v1063_v52, %v1062_v27  ;;  %v655_v3 = vrot.slane %v5664_v4, 2 }
 0x13a   : > { %v1056_v32 = vsel %vm963_vm2, %v8703_v11, %v5225_v55  ;;  %v658_v54 = vsel %vm488_vm1, %v655_v3, %v657_v25 }
 0x13b   : > { %4888 = vmatmul.mubr.msk.bf16.gmra.mrb[80].mxu0 %vm963_vm2, %v1105_v6  ;;  %v1123_v47 = vpack.c.bf16 %v1057_v57, %v1056_v32  ;;  %v1058_v6 = vsel %vm963_vm2, %v8705_v26, %v5235_v31  ;;  %v5734_v57 = vmov 0.0  }
 0x13c   : > { %4891 = vmatprep.mubr.msk.bf16.mxu0 %vm963_vm2, %v1109_v39  ;;  %v654_v39 = vrot.slane %v5663_v9, 2  ;;  %v1127_v30 = vpack.c.bf16 %v1059_v13, %v1058_v6  ;;  %2130 = vst.msk [vmem:[#allocation2] sm:$0xff] %vm963_vm2, %v5734_v57  ;;  %2131 = vst.msk [vmem:[#allocation2 + $0x8] sm:$0xff] %vm963_vm2, %v5734_v57  ;;  %v5593_v6 = vld [vmem:[%s8471_s5 + $0x40] sm:$0xff]  }
 0x13d   : > { %2133 = vst.msk [vmem:[#allocation2 + $0x10] sm:$0x3] %vm2132_vm3, %v5734_v57  ;;  %2137 = vst.msk [vmem:[#allocation2 + $0x1a8] sm:$0x3] %vm2132_vm3, %v5734_v57  ;;  %4619 = vmatprep.subr.bf16.mxu1 %v5593_v6 }
 0x13e   : > { %v656_v44 = vsel %vm488_vm1, %v654_v39, %v655_v3  ;;  %2135 = vst.msk [vmem:[#allocation2 + $0x198] sm:$0xff] %vm963_vm2, %v5734_v57  ;;  %2136 = vst.msk [vmem:[#allocation2 + $0x1a0] sm:$0xff] %vm963_vm2, %v5734_v57  ;;  %4620 = vmatpush3.bf16.msra.mxu1 %v5594_v51 }
 0x13f   : > { %1764 = vmatmul.mubr.bf16.gmra.mrb[52].mxu1 %v1119_v63  ;;  %v1129_v19 = vpack.c.bf16 %v658_v54, %v656_v44  ;;  %2140 = vst.msk [vmem:[#allocation2 + $0x18] sm:$0x1] %vm2138_vm4, %v5734_v57  ;;  %2139 = vst.msk [vmem:[#allocation2] sm:$0x1] %vm2138_vm4, %v5734_v57 }
 0x140   : > { %1771 = vmatprep.mubr.bf16.mxu1 %v1124_v34  ;;  %2141 = vst.msk [vmem:[#allocation2 + $0x30] sm:$0x1] %vm2138_vm4, %v5734_v57  ;;  %2142 = vst.msk [vmem:[#allocation2 + $0x48] sm:$0x1] %vm2138_vm4, %v5734_v57 }
 0x141   : > { %2143 = vst.msk [vmem:[#allocation2 + $0x60] sm:$0x1] %vm2138_vm4, %v5734_v57  ;;  %2144 = vst.msk [vmem:[#allocation2 + $0x78] sm:$0x1] %vm2138_vm4, %v5734_v57 }
 0x142   : > { %2145 = vst.msk [vmem:[#allocation2 + $0x90] sm:$0x1] %vm2138_vm4, %v5734_v57  ;;  %2146 = vst.msk [vmem:[#allocation2 + $0xa8] sm:$0x1] %vm2138_vm4, %v5734_v57 }
 0x143   : > { %4892 = vmatmul.mubr.msk.bf16.gmra.mrb[84].mxu0 %vm963_vm2, %v1113_v49  ;;  %2147 = vst.msk [vmem:[#allocation2 + $0xc0] sm:$0x1] %vm2138_vm4, %v5734_v57  ;;  %2148 = vst.msk [vmem:[#allocation2 + $0xd8] sm:$0x1] %vm2138_vm4, %v5734_v57  ;;  %v2240_v52 = vld [vmem:[#allocation2 + $0x1] sm:$0xff] }
 0x144   : > { %4895 = vmatprep.mubr.msk.bf16.mxu0 %vm963_vm2, %v1117_v45  ;;  %2149 = vst.msk [vmem:[#allocation2 + $0xf0] sm:$0x1] %vm2138_vm4, %v5734_v57  ;;  %2150 = vst.msk [vmem:[#allocation2 + $0x108] sm:$0x1] %vm2138_vm4, %v5734_v57 }
 0x145   : > { %2151 = vst.msk [vmem:[#allocation2 + $0x120] sm:$0x1] %vm2138_vm4, %v5734_v57  ;;  %2152 = vst.msk [vmem:[#allocation2 + $0x138] sm:$0x1] %vm2138_vm4, %v5734_v57 }
 0x146   : > { %2153 = vst.msk [vmem:[#allocation2 + $0x150] sm:$0x1] %vm2138_vm4, %v5734_v57  ;;  %2154 = vst.msk [vmem:[#allocation2 + $0x168] sm:$0x1] %vm2138_vm4, %v5734_v57 }
 0x147   : > { %1772 = vmatmul.mubr.bf16.gmra.mrb[56].mxu1 %v1123_v47  ;;  %2155 = vst.msk [vmem:[#allocation2 + $0x180] sm:$0x1] %vm2138_vm4, %v5734_v57  ;;  %2156 = vst.msk [vmem:[#allocation2 + $0x198] sm:$0x1] %vm2138_vm4, %v5734_v57  ;;  %v2241_v47 = vld [vmem:[#allocation2 + $0x9] sm:$0xff] }
 0x148   : > { %1779 = vmatprep.mubr.bf16.mxu1 %v1128_v43  ;;  %2157 = vst.msk [vmem:[#allocation2 + $0x11] sm:$0x1] %vm2138_vm4, %v5734_v57  ;;  %2158 = vst.msk [vmem:[#allocation2 + $0x29] sm:$0x1] %vm2138_vm4, %v5734_v57  ;;  %v5242_v31 = vpack.i.bf16 %v2241_v47, %v2240_v52 }
 0x149   : > { %2159 = vst.msk [vmem:[#allocation2 + $0x41] sm:$0x1] %vm2138_vm4, %v5734_v57  ;;  %2160 = vst.msk [vmem:[#allocation2 + $0x59] sm:$0x1] %vm2138_vm4, %v5734_v57 }
 0x14a   : > { %2161 = vst.msk [vmem:[#allocation2 + $0x71] sm:$0x1] %vm2138_vm4, %v5734_v57  ;;  %2162 = vst.msk [vmem:[#allocation2 + $0x89] sm:$0x1] %vm2138_vm4, %v5734_v57  ;;  %5243 = vrot.lane.b32.xlu1 %v5242_v31, %s5733_s19 }
 0x14b   : > { %4896 = vmatmul.mubr.msk.bf16.gmra.mrb[88].mxu0 %vm963_vm2, %v1121_v58  ;;  %2163 = vst.msk [vmem:[#allocation2 + $0xa1] sm:$0x1] %vm2138_vm4, %v5734_v57  ;;  %2164 = vst.msk [vmem:[#allocation2 + $0xb9] sm:$0x1] %vm2138_vm4, %v5734_v57 }
 0x14c   : > { %4899 = vmatprep.mubr.msk.bf16.mxu0 %vm963_vm2, %v8709_v18  ;;  %2165 = vst.msk [vmem:[#allocation2 + $0xd1] sm:$0x1] %vm2138_vm4, %v5734_v57  ;;  %2166 = vst.msk [vmem:[#allocation2 + $0xe9] sm:$0x1] %vm2138_vm4, %v5734_v57 }
 0x14d   : > { %2167 = vst.msk [vmem:[#allocation2 + $0x101] sm:$0x1] %vm2138_vm4, %v5734_v57  ;;  %2168 = vst.msk [vmem:[#allocation2 + $0x119] sm:$0x1] %vm2138_vm4, %v5734_v57 }
 0x14e   : > { %2169 = vst.msk [vmem:[#allocation2 + $0x131] sm:$0x1] %vm2138_vm4, %v5734_v57  ;;  %2170 = vst.msk [vmem:[#allocation2 + $0x149] sm:$0x1] %vm2138_vm4, %v5734_v57 }
 0x14f   : > { %1780 = vmatmul.mubr.bf16.gmra.mrb[60].mxu1 %v1127_v30  ;;  %2171 = vst.msk [vmem:[#allocation2 + $0x161] sm:$0x1] %vm2138_vm4, %v5734_v57  ;;  %2172 = vst.msk [vmem:[#allocation2 + $0x179] sm:$0x1] %vm2138_vm4, %v5734_v57 }
 0x150   : > { %2173 = vst.msk [vmem:[#allocation2 + $0x191] sm:$0x1] %vm2138_vm4, %v5734_v57  ;;  %2174 = vst.msk [vmem:[#allocation2 + $0x1a9] sm:$0x1] %vm2138_vm4, %v5734_v57 }
 0x153   : > { %4900 = vmatmul.mubr.msk.bf16.gmra.mrb[92].mxu0 %vm963_vm2, %v1129_v19 }
 0x16e   : > { %v4391_v63 = vpop.f32.mrb[0].mxu0 }
 0x16f   : > { %v4392_v37 = vpop.f32.mrb[1].mxu0 }
 0x170   : > { %v7057_v55 = vadd.f32 %v4392_v37, %v4391_v63  ;;  %v4394_v34 = vpop.f32.mrb[2].mxu0 }
 0x171   : > { %v4395_v40 = vpop.f32.mrb[3].mxu0 }
 0x172   : > { %v7059_v20 = vadd.f32 %v4395_v40, %v4394_v34  ;;  %v5595_v40 = vld [vmem:[%s8471_s5 + $0x48] sm:$0xff]  }
 0x173   : > { %4621 = vmatprep.subr.bf16.mxu1 %v5595_v40 }
 0x176   : > { %v4397_v49 = vpop.f32.mrb[4].mxu0 }
 0x177   : > { %v4398_v32 = vpop.f32.mrb[5].mxu0 }
 0x178   : > { %v7065_v45 = vadd.f32 %v4398_v32, %v4397_v49  ;;  %v4400_v50 = vpop.f32.mrb[6].mxu0 }
 0x179   : > { %v4401_v9 = vpop.f32.mrb[7].mxu0 }
 0x17a   : > { %v7103_v27 = vadd.f32 %v4401_v9, %v4400_v50  ;;  %v5596_v9 = vld [vmem:[%s8471_s5 + $0x8] sm:$0xff]  }
 0x17b   : > { %4622 = vmatpush3.bf16.msra.mxu1 %v5596_v9 }
 0x17e   : > { %v4403_v4 = vpop.f32.mrb[8].mxu0 }
 0x17f   : > { %v4404_v7 = vpop.f32.mrb[9].mxu0 }
 0x180   : > { %v7105_v43 = vadd.f32 %v4404_v7, %v4403_v4  ;;  %v4406_v10 = vpop.f32.mrb[10].mxu0 }
 0x181   : > { %v4407_v25 = vpop.f32.mrb[11].mxu0 }
 0x182   : > { %v7108_v58 = vadd.f32 %v4407_v25, %v4406_v10 }
 0x186   : > { %v4409_v13 = vpop.f32.mrb[12].mxu0 }
 0x187   : > { %v4410_v39 = vpop.f32.mrb[13].mxu0 }
 0x188   : > { %v7113_v3 = vadd.f32 %v4410_v39, %v4409_v13  ;;  %v4412_v30 = vpop.f32.mrb[14].mxu0  ;;  %v5597_v13 = vld [vmem:[%s8471_s5 + $0x50] sm:$0xff]  }
 0x189   : > { %v4413_v53 = vpop.f32.mrb[15].mxu0  ;;  %4623 = vmatprep.subr.bf16.mxu1 %v5597_v13 }
 0x18a   : > { %v7118_v18 = vadd.f32 %v4413_v53, %v4412_v30 }
 0x18e   : > { %v4415_v44 = vpop.f32.mrb[16].mxu0 }
 0x18f   : > { %v4416_v54 = vpop.f32.mrb[17].mxu0 }
 0x190   : > { %v7120_v19 = vadd.f32 %v4416_v54, %v4415_v44  ;;  %v4418_v63 = vpop.f32.mrb[18].mxu0  ;;  %v5598_v44 = vld [vmem:[%s8471_s5 + $0x10] sm:$0xff]  }
 0x191   : > { %v4419_v37 = vpop.f32.mrb[19].mxu0  ;;  %4624 = vmatpush3.bf16.msra.mxu1 %v5598_v44 }
 0x192   : > { %v7122_v34 = vadd.f32 %v4419_v37, %v4418_v63 }
 0x196   : > { %v4421_v49 = vpop.f32.mrb[20].mxu0 }
 0x197   : > { %v4422_v32 = vpop.f32.mrb[21].mxu0 }
 0x198   : > { %v7127_v57 = vadd.f32 %v4422_v32, %v4421_v49  ;;  %v4424_v50 = vpop.f32.mrb[22].mxu0 }
 0x199   : > { %v4425_v4 = vpop.f32.mrb[23].mxu0 }
 0x19a   : > { %v7132_v52 = vadd.f32 %v4425_v4, %v4424_v50 }
 0x19e   : > { %v4427_v47 = vpop.f32.mrb[24].mxu0 }
 0x19f   : > { %v4428_v7 = vpop.f32.mrb[25].mxu0 }
 0x1a0   : > { %v7134_v31 = vadd.f32 %v4428_v7, %v4427_v47  ;;  %v4430_v10 = vpop.f32.mrb[26].mxu0 }
 0x1a1   : > { %v4431_v25 = vpop.f32.mrb[27].mxu0 }
 0x1a2   : > { %v7136_v6 = vadd.f32 %v4431_v25, %v4430_v10 }
 0x1a6   : > { %v4433_v39 = vpop.f32.mrb[28].mxu0 }
 0x1a7   : > { %v4434_v30 = vpop.f32.mrb[29].mxu0 }
 0x1a8   : > { %v7141_v51 = vadd.f32 %v4434_v30, %v4433_v39  ;;  %v4436_v53 = vpop.f32.mrb[30].mxu0 }
 0x1a9   : > { %v4437_v54 = vpop.f32.mrb[31].mxu0 }
 0x1aa   : > { %v7146_v63 = vadd.f32 %v4437_v54, %v4436_v53  ;;  %v4503_v37 = vpop.f32.mrb[0].mxu1 }
 0x1ab   : > { %v4504_v40 = vpop.f32.mrb[1].mxu1 }
 0x1ac   : > { %v4505_v49 = vadd.f32 %v4504_v40, %v4503_v37  ;;  %v4506_v32 = vpop.f32.mrb[2].mxu1 }
 0x1ad   : > { %v4507_v50 = vpop.f32.mrb[3].mxu1 }
 0x1ae   : > { %v4508_v9 = vadd.f32 %v4507_v50, %v4506_v32  ;;  %v4439_v4 = vpop.f32.mrb[32].mxu0  ;;  %v7149_v47 = vadd.f32 %v4505_v49, %v7057_v55  ;;  %v5599_v49 = vld [vmem:[%s8471_s5 + $0x58] sm:$0xff]  }
 0x1af   : > { %v4440_v7 = vpop.f32.mrb[33].mxu0  ;;  %4625 = vmatprep.subr.bf16.mxu1 %v5599_v49 }
 0x1b0   : > { %v7151_v10 = vadd.f32 %v4440_v7, %v4439_v4  ;;  %v4442_v25 = vpop.f32.mrb[34].mxu0  ;;  %v7154_v13 = vadd.f32 %v4508_v9, %v7059_v20  ;;  %v5600_v20 = vld [vmem:[%s8471_s5 + $0x18] sm:$0xff]  }
 0x1b1   : > { %v4443_v39 = vpop.f32.mrb[35].mxu0  ;;  %4626 = vmatpush3.bf16.msra.mxu1 %v5600_v20 }
 0x1b2   : > { %v7156_v30 = vadd.f32 %v4443_v39, %v4442_v25  ;;  %v4509_v53 = vpop.f32.mrb[4].mxu1  ;;  %4627 = vmatprep.subr.bf16.mxu1 %v5601_v12 }
 0x1b3   : > { %v4510_v44 = vpop.f32.mrb[5].mxu1 }
 0x1b4   : > { %v4511_v54 = vadd.f32 %v4510_v44, %v4509_v53  ;;  %v4512_v37 = vpop.f32.mrb[6].mxu1 }
 0x1b5   : > { %v4513_v40 = vpop.f32.mrb[7].mxu1 }
 0x1b6   : > { %v4514_v32 = vadd.f32 %v4513_v40, %v4512_v37  ;;  %v4445_v50 = vpop.f32.mrb[36].mxu0  ;;  %v7159_v55 = vadd.f32 %v4511_v54, %v7065_v45 }
 0x1b7   : > { %v4446_v9 = vpop.f32.mrb[37].mxu0 }
 0x1b8   : > { %v7167_v4 = vadd.f32 %v4446_v9, %v4445_v50  ;;  %v4448_v7 = vpop.f32.mrb[38].mxu0  ;;  %v7170_v25 = vadd.f32 %v4514_v32, %v7103_v27 }
 0x1b9   : > { %v4449_v39 = vpop.f32.mrb[39].mxu0 }
 0x1ba   : > { %v7172_v45 = vadd.f32 %v4449_v39, %v4448_v7  ;;  %v4515_v53 = vpop.f32.mrb[8].mxu1  ;;  %v5602_v39 = vld [vmem:[%s8471_s5 + $0x20] sm:$0xff]  }
 0x1bb   : > { %v4516_v44 = vpop.f32.mrb[9].mxu1  ;;  %4628 = vmatpush3.bf16.msra.mxu1 %v5602_v39 }
 0x1bc   : > { %v4517_v54 = vadd.f32 %v4516_v44, %v4515_v53  ;;  %v4518_v37 = vpop.f32.mrb[10].mxu1 }
 0x1bd   : > { %v4519_v40 = vpop.f32.mrb[11].mxu1 }
 0x1be   : > { %v4520_v50 = vadd.f32 %v4519_v40, %v4518_v37  ;;  %v4451_v9 = vpop.f32.mrb[40].mxu0  ;;  %v7178_v22 = vadd.f32 %v4517_v54, %v7105_v43 }
 0x1bf   : > { %v4452_v27 = vpop.f32.mrb[41].mxu0 }
 0x1c0   : > { %v7180_v32 = vadd.f32 %v4452_v27, %v4451_v9  ;;  %v4454_v49 = vpop.f32.mrb[42].mxu0  ;;  %v7183_v20 = vadd.f32 %v4520_v50, %v7108_v58 }
 0x1c1   : > { %v4455_v7 = vpop.f32.mrb[43].mxu0 }
 0x1c2   : > { %v7188_v53 = vadd.f32 %v4455_v7, %v4454_v49  ;;  %v4521_v44 = vpop.f32.mrb[12].mxu1 }
 0x1c3   : > { %v4522_v37 = vpop.f32.mrb[13].mxu1 }
 0x1c4   : > { %v4523_v43 = vadd.f32 %v4522_v37, %v4521_v44  ;;  %v4524_v54 = vpop.f32.mrb[14].mxu1 }
 0x1c5   : > { %v4525_v40 = vpop.f32.mrb[15].mxu1 }
 0x1c6   : > { %v4526_v12 = vadd.f32 %v4525_v40, %v4524_v54  ;;  %v4457_v9 = vpop.f32.mrb[44].mxu0  ;;  %v7191_v27 = vadd.f32 %v4523_v43, %v7113_v3  ;;  %v5603_v3 = vld [vmem:[%s8471_s5 + $0x68] sm:$0xff]  }
 0x1c7   : > { %v4458_v58 = vpop.f32.mrb[45].mxu0  ;;  %4629 = vmatprep.subr.bf16.mxu1 %v5603_v3 }
 0x1c8   : > { %v7193_v50 = vadd.f32 %v4458_v58, %v4457_v9  ;;  %v4460_v11 = vpop.f32.mrb[46].mxu0  ;;  %v7196_v26 = vadd.f32 %v4526_v12, %v7118_v18  ;;  %v5604_v58 = vld [vmem:[%s8471_s5 + $0x28] sm:$0xff]  }
 0x1c9   : > { %v4461_v49 = vpop.f32.mrb[47].mxu0  ;;  %4630 = vmatpush3.bf16.msra.mxu1 %v5604_v58 }
 0x1ca   : > { %v7198_v7 = vadd.f32 %v4461_v49, %v4460_v11  ;;  %v4527_v35 = vpop.f32.mrb[16].mxu1 }
 0x1cb   : > { %v4528_v39 = vpop.f32.mrb[17].mxu1 }
 0x1cc   : > { %v4529_v44 = vadd.f32 %v4528_v39, %v4527_v35  ;;  %v4530_v37 = vpop.f32.mrb[18].mxu1 }
 0x1cd   : > { %v4531_v15 = vpop.f32.mrb[19].mxu1 }
 0x1ce   : > { %v4532_v43 = vadd.f32 %v4531_v15, %v4530_v37  ;;  %v4463_v54 = vpop.f32.mrb[48].mxu0  ;;  %v7204_v40 = vadd.f32 %v4529_v44, %v7120_v19 }
 0x1cf   : > { %v4464_v9 = vpop.f32.mrb[49].mxu0 }
 0x1d0   : > { %v7206_v18 = vadd.f32 %v4464_v9, %v4463_v54  ;;  %v4466_v11 = vpop.f32.mrb[50].mxu0  ;;  %v7209_v12 = vadd.f32 %v4532_v43, %v7122_v34 }
 0x1d1   : > { %v4467_v35 = vpop.f32.mrb[51].mxu0 }
 0x1d2   : > { %v7214_v49 = vadd.f32 %v4467_v35, %v4466_v11  ;;  %v4533_v15 = vpop.f32.mrb[20].mxu1 }
 0x1d3   : > { %v4534_v39 = vpop.f32.mrb[21].mxu1 }
 0x1d4   : > { %v4535_v19 = vadd.f32 %v4534_v39, %v4533_v15  ;;  %v4536_v44 = vpop.f32.mrb[22].mxu1 }
 0x1d5   : > { %v4537_v37 = vpop.f32.mrb[23].mxu1 }
 0x1d6   : > { %v4538_v3 = vadd.f32 %v4537_v37, %v4536_v44  ;;  %v4469_v54 = vpop.f32.mrb[52].mxu0  ;;  %v7217_v9 = vadd.f32 %v4535_v19, %v7127_v57  ;;  %v5605_v57 = vld [vmem:[%s8471_s5 + $0x70] sm:$0xff]  }
 0x1d7   : > { %v4470_v34 = vpop.f32.mrb[53].mxu0  ;;  %4631 = vmatprep.subr.bf16.mxu1 %v5605_v57 }
 0x1d8   : > { %v7219_v43 = vadd.f32 %v4470_v34, %v4469_v54  ;;  %v4472_v42 = vpop.f32.mrb[54].mxu0  ;;  %v7222_v59 = vadd.f32 %v4538_v3, %v7132_v52  ;;  %v5606_v34 = vld [vmem:[%s8471_s5 + $0x30] sm:$0xff]  }
 0x1d9   : > { %v4473_v11 = vpop.f32.mrb[55].mxu0  ;;  %4632 = vmatpush3.bf16.msra.mxu1 %v5606_v34 }
 0x1da   : > { %v7224_v35 = vadd.f32 %v4473_v11, %v4472_v42  ;;  %v4539_v24 = vpop.f32.mrb[24].mxu1 }
 0x1db   : > { %v4540_v58 = vpop.f32.mrb[25].mxu1 }
 0x1dc   : > { %v4541_v15 = vadd.f32 %v4540_v58, %v4539_v24  ;;  %v4542_v39 = vpop.f32.mrb[26].mxu1 }
 0x1dd   : > { %v4543_v8 = vpop.f32.mrb[27].mxu1 }
 0x1de   : > { %v4544_v19 = vadd.f32 %v4543_v8, %v4542_v39  ;;  %v4475_v44 = vpop.f32.mrb[56].mxu0  ;;  %v7230_v37 = vadd.f32 %v4541_v15, %v7134_v31 }
 0x1df   : > { %v4476_v54 = vpop.f32.mrb[57].mxu0 }
 0x1e0   : > { %v7232_v52 = vadd.f32 %v4476_v54, %v4475_v44  ;;  %v4478_v42 = vpop.f32.mrb[58].mxu0  ;;  %v7235_v3 = vadd.f32 %v4544_v19, %v7136_v6 }
 0x1e1   : > { %v4479_v24 = vpop.f32.mrb[59].mxu0 }
 0x1e2   : > { %v7240_v11 = vadd.f32 %v4479_v24, %v4478_v42  ;;  %v4545_v8 = vpop.f32.mrb[28].mxu1 }
 0x1e3   : > { %v4546_v58 = vpop.f32.mrb[29].mxu1 }
 0x1e4   : > { %v4547_v31 = vadd.f32 %v4546_v58, %v4545_v8  ;;  %v4548_v15 = vpop.f32.mrb[30].mxu1 }
 0x1e5   : > { %v4549_v39 = vpop.f32.mrb[31].mxu1 }
 0x1e6   : > { %v4550_v57 = vadd.f32 %v4549_v39, %v4548_v15  ;;  %v4481_v44 = vpop.f32.mrb[60].mxu0  ;;  %v7243_v54 = vadd.f32 %v4547_v31, %v7141_v51  ;;  %v5607_v51 = vld [vmem:[%s8471_s5 + $0x78] sm:$0xff]   ;;  %v7258_v39 = vld [vmem:[%s8468_s2] ss:$0 sm:$0xff] }
 0x1e7   : > { %v4482_v6 = vpop.f32.mrb[61].mxu0  ;;  %4633 = vmatprep.subr.bf16.mxu1 %v5607_v51 }
 0x1e8   : > { %v7245_v19 = vadd.f32 %v4482_v6, %v4481_v44  ;;  %v4484_v16 = vpop.f32.mrb[62].mxu0  ;;  %v7248_v29 = vadd.f32 %v4550_v57, %v7146_v63 }
 0x1e9   : > { %v4485_v42 = vpop.f32.mrb[63].mxu0 }
 0x1ea   : > { %v7250_v24 = vadd.f32 %v4485_v42, %v4484_v16  ;;  %v4551_v5 = vpop.f32.mrb[32].mxu1 }
 0x1eb   : > { %v4552_v34 = vpop.f32.mrb[33].mxu1 }
 0x1ec   : > { %v4553_v8 = vadd.f32 %v4552_v34, %v4551_v5  ;;  %v4554_v58 = vpop.f32.mrb[34].mxu1  ;;  %v7267_v5 = vld [vmem:[%s8469_s3] ss:$0 sm:$0xff] }
 0x1ed   : > { %v4555_v56 = vpop.f32.mrb[35].mxu1 }
 0x1ee   : > { %v4556_v31 = vadd.f32 %v4555_v56, %v4554_v58  ;;  %v4873_v15 = vpop.f32.mrb[64].mxu0  ;;  %v7261_v63 = vadd.f32 %v4553_v8, %v7151_v10  ;;  %v7281_v8 = vld [vmem:[%s8470_s4] ss:$0 sm:$0xff] }
 0x1ef   : > { %v1831_v16 = vadd.f32 %v4873_v15, %v7159_v55  ;;  %v1822_v57 = vpop.f32.mrb[65].mxu0  ;;  %v5608_v55 = vld [vmem:[%s8471_s5 + $0x38] sm:$0xff]  }
 0x1f0   : > { %v1823_v56 = vadd.f32 %v1822_v57, %v7149_v47  ;;  %v4874_v44 = vpop.f32.mrb[66].mxu0  ;;  %v7271_v6 = vadd.f32 %v4556_v31, %v7156_v30  ;;  %4634 = vmatpush3.bf16.msra.mxu1 %v5608_v55 }
 0x1f1   : > { %v1958_v42 = vmul.f32 %v7258_v39, %v1831_v16  ;;  %v1834_v10 = vadd.f32 %v4874_v44, %v7170_v25  ;;  %v1825_v34 = vpop.f32.mrb[67].mxu0 }
 0x1f2   : > { %v1956_v47 = vmul.f32 %v7258_v39, %v1823_v56  ;;  %v1826_v58 = vadd.f32 %v1825_v34, %v7154_v13  ;;  %v4557_v30 = vpop.f32.mrb[36].mxu1 }
 0x1f3   : > { %v1997_v51 = vadd.f32 %v7267_v5, %v1958_v42  ;;  %v1959_v31 = vmul.f32 %v7258_v39, %v1834_v10  ;;  %v4558_v25 = vpop.f32.mrb[37].mxu1 }
 0x1f4   : > { %v1995_v15 = vadd.f32 %v7267_v5, %v1956_v47  ;;  %v1957_v16 = vmul.f32 %v7258_v39, %v1826_v58  ;;  %v4559_v57 = vadd.f32 %v4558_v25, %v4557_v30  ;;  %v4560_v44 = vpop.f32.mrb[38].mxu1 }
 0x1f5   : > { %vm2029_vm5 = vcmp.gt.f32.partialorder %v1997_v51, 0.0  ;;  %v2068_v38 = vmul.f32 %v7281_v8, %v1997_v51  ;;  %v1998_v56 = vadd.f32 %v7267_v5, %v1959_v31  ;;  %v4561_v14 = vpop.f32.mrb[39].mxu1 }
 0x1f6   : > { %vm2027_vm6 = vcmp.gt.f32.partialorder %v1995_v15, 0.0  ;;  %v2066_v13 = vmul.f32 %v7281_v8, %v1995_v15  ;;  %v1996_v42 = vadd.f32 %v7267_v5, %v1957_v16  ;;  %v4562_v10 = vadd.f32 %v4561_v14, %v4560_v44  ;;  %v4877_v34 = vpop.f32.mrb[68].mxu0 }
 0x1f7   : > { %v2100_v55 = vsel %vm2029_vm5, %v1997_v51, %v2068_v38  ;;  %vm2030_vm7 = vcmp.gt.f32.partialorder %v1998_v56, 0.0  ;;  %v2069_v47 = vmul.f32 %v7281_v8, %v1998_v56  ;;  %v1847_v58 = vadd.f32 %v4877_v34, %v7191_v27  ;;  %v1838_v30 = vpop.f32.mrb[69].mxu0 }
 0x1f8   : > { %2178 = vst.msk [vmem:[#allocation2 + $0x31] sm:$0xff] %vm963_vm2, %v2100_v55  ;;  %v2098_v25 = vsel %vm2027_vm6, %v1995_v15, %v2066_v13  ;;  %vm2028_vm8 = vcmp.gt.f32.partialorder %v1996_v42, 0.0  ;;  %v2067_v31 = vmul.f32 %v7281_v8, %v1996_v42  ;;  %v1839_v41 = vadd.f32 %v1838_v30, %v7178_v22  ;;  %v4878_v62 = vpop.f32.mrb[70].mxu0  ;;  %v5609_v15 = vld [vmem:[%s8471_s5 + $0xc0] sm:$0xff]  }
 0x1f9   : > { %2176 = vst.msk [vmem:[#allocation2 + $0x19] sm:$0xff] %vm963_vm2, %v2098_v25  ;;  %v2101_v14 = vsel %vm2030_vm7, %v1998_v56, %v2069_v47  ;;  %v1962_v38 = vmul.f32 %v7258_v39, %v1847_v58  ;;  %v1850_v51 = vadd.f32 %v4878_v62, %v7196_v26  ;;  %v1841_v16 = vpop.f32.mrb[71].mxu0  ;;  %v7302_v27 = vadd.f32 %v4559_v57, %v7167_v4  ;;  %v5610_v47 = vld [vmem:[%s8471_s5 + $0x80] sm:$0xff]  }
 0x1fa   : > { %2179 = vst.msk [vmem:[#allocation2 + $0x39] sm:$0xff] %vm963_vm2, %v2101_v14  ;;  %v2099_v44 = vsel %vm2028_vm8, %v1996_v42, %v2067_v31  ;;  %v1960_v22 = vmul.f32 %v7258_v39, %v1839_v41  ;;  %v1842_v13 = vadd.f32 %v1841_v16, %v7183_v20  ;;  %v4563_v56 = vpop.f32.mrb[40].mxu1  ;;  %v7311_v34 = vadd.f32 %v4562_v10, %v7172_v45  ;;  %v5611_v58 = vld [vmem:[%s8471_s5 + $0x100] sm:$0xff]  }
 0x1fb   : > { %2177 = vst.msk [vmem:[#allocation2 + $0x21] sm:$0xff] %vm963_vm2, %v2099_v44  ;;  %v2001_v62 = vadd.f32 %v7267_v5, %v1962_v38  ;;  %v1963_v26 = vmul.f32 %v7258_v39, %v1850_v51  ;;  %v4564_v4 = vpop.f32.mrb[41].mxu1  ;;  %4731 = vmatprep.subr.bf16.mxu0 %v5609_v15  ;;  %4903 = vmatprep.subr.bf16.mxu1 %v5611_v58 }
 0x1fc   : > { %v1999_v57 = vadd.f32 %v7267_v5, %v1960_v22  ;;  %v1961_v42 = vmul.f32 %v7258_v39, %v1842_v13  ;;  %v4565_v55 = vadd.f32 %v4564_v4, %v4563_v56  ;;  %v4566_v41 = vpop.f32.mrb[42].mxu1  ;;  %4732 = vmatpush3.bf16.msra.mxu0 %v5610_v47 }
 0x1fd   : > { %vm2033_vm9 = vcmp.gt.f32.partialorder %v2001_v62, 0.0  ;;  %v2072_v20 = vmul.f32 %v7281_v8, %v2001_v62  ;;  %v2002_v45 = vadd.f32 %v7267_v5, %v1963_v26  ;;  %v4567_v10 = vpop.f32.mrb[43].mxu1 }
 0x1fe   : > { %vm2031_vm10 = vcmp.gt.f32.partialorder %v1999_v57, 0.0  ;;  %v2070_v30 = vmul.f32 %v7281_v8, %v1999_v57  ;;  %v2000_v25 = vadd.f32 %v7267_v5, %v1961_v42  ;;  %v4568_v31 = vadd.f32 %v4567_v10, %v4566_v41  ;;  %v4881_v14 = vpop.f32.mrb[72].mxu0 }
 0x1ff   : > { %v2104_v38 = vsel %vm2033_vm9, %v2001_v62, %v2072_v20  ;;  %vm2034_vm11 = vcmp.gt.f32.partialorder %v2002_v45, 0.0  ;;  %v2073_v51 = vmul.f32 %v7281_v8, %v2002_v45  ;;  %v1863_v16 = vadd.f32 %v4881_v14, %v7217_v9  ;;  %v1854_v15 = vpop.f32.mrb[73].mxu0  ;;  %v7333_v26 = vld [vmem:[#allocation2 + $0x30] sm:$0xff] }
 0x200   : > { %2182 = vst.msk [vmem:[#allocation2 + $0x61] sm:$0xff] %vm963_vm2, %v2104_v38  ;;  %v2102_v44 = vsel %vm2031_vm10, %v1999_v57, %v2070_v30  ;;  %vm2032_vm12 = vcmp.gt.f32.partialorder %v2000_v25, 0.0  ;;  %v2071_v22 = vmul.f32 %v7281_v8, %v2000_v25  ;;  %v1855_v13 = vadd.f32 %v1854_v15, %v7204_v40  ;;  %v4882_v56 = vpop.f32.mrb[74].mxu0  ;;  %v2304_v41 = vld [vmem:[#allocation2 + $0x18] sm:$0xff] }
 0x201   : > { %2180 = vst.msk [vmem:[#allocation2 + $0x49] sm:$0xff] %vm963_vm2, %v2102_v44  ;;  %v2105_v62 = vsel %vm2034_vm11, %v2002_v45, %v2073_v51  ;;  %v1966_v4 = vmul.f32 %v7258_v39, %v1863_v16  ;;  %v1866_v9 = vadd.f32 %v4882_v56, %v7222_v59  ;;  %v1857_v42 = vpop.f32.mrb[75].mxu0  ;;  %v2307_v20 = vld [vmem:[#allocation2 + $0x38] sm:$0xff]  ;;  %v7339_v57 = vadd.f32 %v4565_v55, %v7180_v32 }
 0x202   : > { %v2245_v10 = vld [vmem:[#allocation2 + $0x39] sm:$0xff]  ;;  %2183 = vst.msk [vmem:[#allocation2 + $0x69] sm:$0xff] %vm963_vm2, %v2105_v62  ;;  %v2103_v40 = vsel %vm2032_vm12, %v2000_v25, %v2071_v22  ;;  %v1964_v47 = vmul.f32 %v7258_v39, %v1855_v13  ;;  %v1858_v58 = vadd.f32 %v1857_v42, %v7209_v12  ;;  %v4569_v30 = vpop.f32.mrb[44].mxu1  ;;  %v2243_v38 = vld [vmem:[#allocation2 + $0x21] sm:$0xff]  ;;  %v5247_v59 = vpack.i.bf16 %v2307_v20, %v7333_v26  ;;  %v2244_v25 = vld [vmem:[#allocation2 + $0x31] sm:$0xff] }
 0x203   : > { %v2305_v45 = vld [vmem:[#allocation2 + $0x20] sm:$0xff]  ;;  %2181 = vst.msk [vmem:[#allocation2 + $0x51] sm:$0xff] %vm963_vm2, %v2103_v40  ;;  %v2005_v51 = vadd.f32 %v7267_v5, %v1966_v4  ;;  %v1967_v32 = vmul.f32 %v7258_v39, %v1866_v9  ;;  %v4570_v55 = vpop.f32.mrb[45].mxu1  ;;  %v7352_v56 = vpack.i.bf16 %v2245_v10, %v2244_v25  ;;  %v5612_v26 = vld [vmem:[%s8471_s5 + $0xc8] sm:$0xff]  }
 0x204   : > { %v2242_v14 = vld [vmem:[#allocation2 + $0x19] sm:$0xff]  ;;  %v5237_v16 = vpack.i.bf16 %v2305_v45, %v2304_v41  ;;  %v2003_v44 = vadd.f32 %v7267_v5, %v1964_v47  ;;  %v1965_v12 = vmul.f32 %v7258_v39, %v1858_v58  ;;  %v7350_v22 = vadd.f32 %v4570_v55, %v4569_v30  ;;  %v4572_v13 = vpop.f32.mrb[46].mxu1  ;;  %v5613_v62 = vld [vmem:[%s8471_s5 + $0x88] sm:$0xff]   ;;  %4733 = vmatprep.subr.bf16.mxu0 %v5612_v26  ;;  %v5614_v58 = vld [vmem:[%s8471_s5 + $0xd0] sm:$0xff]  }
 0x205   : > { %v5252_v15 = vpack.i.bf16 %v2243_v38, %v2242_v14  ;;  %vm2037_vm13 = vcmp.gt.f32.partialorder %v2005_v51, 0.0  ;;  %v2076_v4 = vmul.f32 %v7281_v8, %v2005_v51  ;;  %v2006_v9 = vadd.f32 %v7267_v5, %v1967_v32  ;;  %v4573_v42 = vpop.f32.mrb[47].mxu1  ;;  %4734 = vmatpush3.bf16.msra.mxu0 %v5613_v62  ;;  %v5615_v14 = vld [vmem:[%s8471_s5 + $0x90] sm:$0xff]  }
 0x206   : > { %5238 = vrot.lane.b32.xlu0 %v5237_v16, %s5733_s19  ;;  %v7365_v41 = vadd.f32 %v4568_v31, %v7188_v53  ;;  %vm2035_vm14 = vcmp.gt.f32.partialorder %v2003_v44, 0.0  ;;  %v2074_v20 = vmul.f32 %v7281_v8, %v2003_v44  ;;  %v2004_v10 = vadd.f32 %v7267_v5, %v1965_v12  ;;  %v4885_v47 = vpop.f32.mrb[76].mxu0  ;;  %4735 = vmatprep.subr.bf16.mxu0 %v5614_v58 }
 0x207   : > { %5253 = vrot.lane.b32.xlu1 %v5252_v15, %s5733_s19  ;;  %v7369_v40 = vadd.f32 %v4573_v42, %v4572_v13  ;;  %v2108_v30 = vsel %vm2037_vm13, %v2005_v51, %v2076_v4  ;;  %vm2038_vm15 = vcmp.gt.f32.partialorder %v2006_v9, 0.0  ;;  %v2077_v45 = vmul.f32 %v7281_v8, %v2006_v9  ;;  %v1870_v31 = vpop.f32.mrb[77].mxu0  ;;  %v7382_v16 = vld [vmem:[#allocation2 + $0x60] sm:$0xff] }
 0x208   : > { %v1879_v53 = vadd.f32 %v4885_v47, %v7243_v54  ;;  %2186 = vst.msk [vmem:[#allocation2 + $0x91] sm:$0xff] %vm963_vm2, %v2108_v30  ;;  %v2106_v38 = vsel %vm2035_vm14, %v2003_v44, %v2074_v20  ;;  %vm2036_vm0 = vcmp.gt.f32.partialorder %v2004_v10, 0.0  ;;  %v2075_v32 = vmul.f32 %v7281_v8, %v2004_v10  ;;  %v4886_v51 = vpop.f32.mrb[78].mxu0  ;;  %v5616_v54 = vld [vmem:[%s8471_s5 + $0xd8] sm:$0xff]  }
 0x209   : > { %v1871_v55 = vadd.f32 %v1870_v31, %v7230_v37  ;;  %2184 = vst.msk [vmem:[#allocation2 + $0x79] sm:$0xff] %vm963_vm2, %v2106_v38  ;;  %v2109_v15 = vsel %vm2038_vm15, %v2006_v9, %v2077_v45  ;;  %v1882_v44 = vadd.f32 %v4886_v51, %v7248_v29  ;;  %v1873_v12 = vpop.f32.mrb[79].mxu0  ;;  %v2308_v37 = vld [vmem:[#allocation2 + $0x48] sm:$0xff]  ;;  %4736 = vmatpush3.bf16.msra.mxu0 %v5615_v14 }
 0x20a   : > { %v1970_v25 = vmul.f32 %v7258_v39, %v1879_v53  ;;  %5248 = vrot.lane.b32.xlu0 %v5247_v59, %s5733_s19  ;;  %v2311_v13 = vld [vmem:[#allocation2 + $0x68] sm:$0xff]  ;;  %2187 = vst.msk [vmem:[#allocation2 + $0x99] sm:$0xff] %vm963_vm2, %v2109_v15  ;;  %v2107_v62 = vsel %vm2036_vm0, %v2004_v10, %v2075_v32  ;;  %v1874_v9 = vadd.f32 %v1873_v12, %v7235_v3  ;;  %v4575_v42 = vpop.f32.mrb[48].mxu1  ;;  %v2309_v20 = vld [vmem:[#allocation2 + $0x50] sm:$0xff]  ;;  %v5617_v3 = vld [vmem:[%s8471_s5 + $0x98] sm:$0xff]  }
 0x20b   : > { %5263 = vrot.lane.b32.xlu1 %v7352_v56, %s5733_s19  ;;  %v2249_v26 = vld [vmem:[#allocation2 + $0x69] sm:$0xff]  ;;  %v1968_v4 = vmul.f32 %v7258_v39, %v1871_v55  ;;  %v2247_v47 = vld [vmem:[#allocation2 + $0x51] sm:$0xff]  ;;  %v5267_v59 = vpack.i.bf16 %v2311_v13, %v7382_v16  ;;  %2185 = vst.msk [vmem:[#allocation2 + $0x81] sm:$0xff] %vm963_vm2, %v2107_v62  ;;  %v1971_v30 = vmul.f32 %v7258_v39, %v1882_v44  ;;  %v4576_v45 = vpop.f32.mrb[49].mxu1  ;;  %v2248_v10 = vld [vmem:[#allocation2 + $0x61] sm:$0xff] }
 0x20c   : > { %v2246_v29 = vld [vmem:[#allocation2 + $0x49] sm:$0xff]  ;;  %v2009_v58 = vadd.f32 %v7267_v5, %v1970_v25  ;;  %v5257_v53 = vpack.i.bf16 %v2309_v20, %v2308_v37  ;;  %v1969_v32 = vmul.f32 %v7258_v39, %v1874_v9  ;;  %v7409_v55 = vadd.f32 %v4576_v45, %v4575_v42  ;;  %v4578_v51 = vpop.f32.mrb[50].mxu1  ;;  %4737 = vmatprep.subr.bf16.mxu0 %v5616_v54 }
 0x20d   : > { %v7402_v31 = vpack.i.bf16 %v2247_v47, %v2246_v29  ;;  %v2007_v38 = vadd.f32 %v7267_v5, %v1968_v4  ;;  %v7411_v16 = vpack.i.bf16 %v2249_v26, %v2248_v10  ;;  %v2010_v25 = vadd.f32 %v7267_v5, %v1971_v30  ;;  %v4579_v14 = vpop.f32.mrb[51].mxu1  ;;  %v5618_v26 = vld [vmem:[%s8471_s5 + $0xe0] sm:$0xff]   ;;  %4738 = vmatpush3.bf16.msra.mxu0 %v5617_v3 }
 0x20e   : > { %vm2041_vm1 = vcmp.gt.f32.partialorder %v2009_v58, 0.0  ;;  %v2080_v15 = vmul.f32 %v7281_v8, %v2009_v58  ;;  %5258 = vrot.lane.b32.xlu0 %v5257_v53, %s5733_s19  ;;  %v7420_v44 = vadd.f32 %v7350_v22, %v7193_v50  ;;  %v2008_v54 = vadd.f32 %v7267_v5, %v1969_v32  ;;  %v4889_v13 = vpop.f32.mrb[80].mxu0  ;;  %v5619_v22 = vld [vmem:[%s8471_s5 + $0xa0] sm:$0xff]   ;;  %4739 = vmatprep.subr.bf16.mxu0 %v5618_v26 }
 0x20f   : > { %5273 = vrot.lane.b32.xlu1 %v7402_v31, %s5733_s19  ;;  %vm2039_vm3 = vcmp.gt.f32.partialorder %v2007_v38, 0.0  ;;  %v2078_v12 = vmul.f32 %v7281_v8, %v2007_v38  ;;  %v7424_v37 = vadd.f32 %v4579_v14, %v4578_v51  ;;  %vm2042_vm4 = vcmp.gt.f32.partialorder %v2010_v25, 0.0  ;;  %v1886_v50 = vpop.f32.mrb[81].mxu0 }
 0x210   : > { %v2112_v62 = vsel %vm2041_vm1, %v2009_v58, %v2080_v15  ;;  %v2081_v4 = vmul.f32 %v7281_v8, %v2010_v25  ;;  %v1895_v9 = vadd.f32 %v4889_v13, %v7302_v27  ;;  %vm2040_vm5 = vcmp.gt.f32.partialorder %v2008_v54, 0.0  ;;  %v4890_v47 = vpop.f32.mrb[82].mxu0  ;;  %v5620_v27 = vld [vmem:[%s8471_s5 + $0xe8] sm:$0xff]   ;;  %v2250_v10 = vld [vmem:[#allocation2 + $0x79] sm:$0xff] }
 0x211   : > { %2190 = vst.msk [vmem:[#allocation2 + $0xc1] sm:$0xff] %vm963_vm2, %v2112_v62  ;;  %v2110_v42 = vsel %vm2039_vm3, %v2007_v38, %v2078_v12  ;;  %v2079_v20 = vmul.f32 %v7281_v8, %v2008_v54  ;;  %v1887_v29 = vadd.f32 %v1886_v50, %v7261_v63  ;;  %v1898_v45 = vadd.f32 %v4890_v47, %v7311_v34  ;;  %v1889_v53 = vpop.f32.mrb[83].mxu0  ;;  %v2312_v63 = vld [vmem:[#allocation2 + $0x78] sm:$0xff] }
 0x212   : > { %2188 = vst.msk [vmem:[#allocation2 + $0xa9] sm:$0xff] %vm963_vm2, %v2110_v42  ;;  %v2113_v58 = vsel %vm2042_vm4, %v2010_v25, %v2081_v4  ;;  %v1974_v30 = vmul.f32 %v7258_v39, %v1895_v9  ;;  %5268 = vrot.lane.b32.xlu0 %v5267_v59, %s5733_s19  ;;  %v2315_v3 = vld [vmem:[#allocation2 + $0x98] sm:$0xff]  ;;  %v1890_v51 = vadd.f32 %v1889_v53, %v7271_v6  ;;  %v4581_v15 = vpop.f32.mrb[52].mxu1  ;;  %v2313_v25 = vld [vmem:[#allocation2 + $0x80] sm:$0xff]  ;;  %v2314_v4 = vld [vmem:[#allocation2 + $0x90] sm:$0xff] }
 0x213   : > { %5283 = vrot.lane.b32.xlu1 %v7411_v16, %s5733_s19  ;;  %2191 = vst.msk [vmem:[#allocation2 + $0xc9] sm:$0xff] %vm963_vm2, %v2113_v58  ;;  %v2111_v38 = vsel %vm2040_vm5, %v2008_v54, %v2079_v20  ;;  %v1972_v32 = vmul.f32 %v7258_v39, %v1887_v29  ;;  %v2251_v34 = vld [vmem:[#allocation2 + $0x81] sm:$0xff]  ;;  %v1753_v59 = vadd.f32 %v7369_v40, %v7198_v7  ;;  %v2253_v14 = vld [vmem:[#allocation2 + $0x99] sm:$0xff]  ;;  %v4582_v26 = vpop.f32.mrb[53].mxu1  ;;  %v2252_v20 = vld [vmem:[#allocation2 + $0x91] sm:$0xff] }
 0x214   : > { %2189 = vst.msk [vmem:[#allocation2 + $0xb1] sm:$0xff] %vm963_vm2, %v2111_v38  ;;  %v2013_v12 = vadd.f32 %v7267_v5, %v1974_v30  ;;  %v1975_v13 = vmul.f32 %v7258_v39, %v1898_v45  ;;  %v5277_v62 = vpack.i.bf16 %v2313_v25, %v2312_v63  ;;  %v7455_v54 = vpack.i.bf16 %v2251_v34, %v2250_v10  ;;  %v5621_v6 = vld [vmem:[%s8471_s5 + $0xa8] sm:$0xff]   ;;  %v4584_v50 = vpop.f32.mrb[54].mxu1 }
 0x215   : > { %4740 = vmatpush3.bf16.msra.mxu0 %v5619_v22  ;;  %v2011_v9 = vadd.f32 %v7267_v5, %v1972_v32  ;;  %v1973_v7 = vmul.f32 %v7258_v39, %v1890_v51  ;;  %v4583_v40 = vadd.f32 %v4582_v26, %v4581_v15  ;;  %v5287_v42 = vpack.i.bf16 %v2315_v3, %v2314_v4  ;;  %v4585_v58 = vpop.f32.mrb[55].mxu1 }
 0x216   : > { %4741 = vmatprep.subr.bf16.mxu0 %v5620_v27  ;;  %vm2045_vm6 = vcmp.gt.f32.partialorder %v2013_v12, 0.0  ;;  %v2084_v29 = vmul.f32 %v7281_v8, %v2013_v12  ;;  %v2014_v47 = vadd.f32 %v7267_v5, %v1975_v13  ;;  %5278 = vrot.lane.b32.xlu0 %v5277_v62, %s5733_s19  ;;  %v7467_v22 = vpack.i.bf16 %v2253_v14, %v2252_v20  ;;  %v4893_v27 = vpop.f32.mrb[84].mxu0 }
 0x217   : > { %5293 = vrot.lane.b32.xlu1 %v7455_v54, %s5733_s19  ;;  %vm2043_vm7 = vcmp.gt.f32.partialorder %v2011_v9, 0.0  ;;  %v2082_v30 = vmul.f32 %v7281_v8, %v2011_v9  ;;  %v2012_v45 = vadd.f32 %v7267_v5, %v1973_v7  ;;  %v4586_v53 = vadd.f32 %v4585_v58, %v4584_v50  ;;  %v1902_v38 = vpop.f32.mrb[85].mxu0 }
 0x218   : > { %v2116_v63 = vsel %vm2045_vm6, %v2013_v12, %v2084_v29  ;;  %vm2046_vm8 = vcmp.gt.f32.partialorder %v2014_v47, 0.0  ;;  %v2085_v10 = vmul.f32 %v7281_v8, %v2014_v47  ;;  %v1911_v3 = vadd.f32 %v4893_v27, %v7420_v44  ;;  %v4894_v25 = vpop.f32.mrb[86].mxu0  ;;  %v5623_v27 = vld [vmem:[%s8471_s5 + $0xb0] sm:$0xff]  }
 0x219   : > { %4742 = vmatpush3.bf16.msra.mxu0 %v5621_v6  ;;  %2194 = vst.msk [vmem:[#allocation2 + $0xf1] sm:$0xff] %vm963_vm2, %v2116_v63  ;;  %v2114_v32 = vsel %vm2043_vm7, %v2011_v9, %v2082_v30  ;;  %vm2044_vm9 = vcmp.gt.f32.partialorder %v2012_v45, 0.0  ;;  %v2083_v51 = vmul.f32 %v7281_v8, %v2012_v45  ;;  %v1903_v15 = vadd.f32 %v1902_v38, %v7339_v57  ;;  %v1905_v13 = vpop.f32.mrb[87].mxu0  ;;  %v2316_v44 = vld [vmem:[#allocation2 + $0xa8] sm:$0xff]  ;;  %v5624_v63 = vld [vmem:[%s8471_s5 + $0xf8] sm:$0xff]  }
 0x21a   : > { %2192 = vst.msk [vmem:[#allocation2 + $0xd9] sm:$0xff] %vm963_vm2, %v2114_v32  ;;  %v2117_v34 = vsel %vm2046_vm8, %v2014_v47, %v2085_v10  ;;  %v1978_v14 = vmul.f32 %v7258_v39, %v1911_v3  ;;  %v1914_v12 = vadd.f32 %v4894_v25, %v1753_v59  ;;  %5288 = vrot.lane.b32.xlu0 %v5287_v42, %s5733_s19  ;;  %v4587_v4 = vpop.f32.mrb[56].mxu1  ;;  %v2254_v9 = vld [vmem:[#allocation2 + $0xa9] sm:$0xff]  ;;  %v7513_v25 = vld [vmem:[#allocation2 + $0x1a] sm:$0xff] }
 0x21b   : > { %5303 = vrot.lane.b32.xlu1 %v7467_v22, %s5733_s19  ;;  %2195 = vst.msk [vmem:[#allocation2 + $0xf9] sm:$0xff] %vm963_vm2, %v2117_v34  ;;  %v2115_v26 = vsel %vm2044_vm9, %v2012_v45, %v2083_v51  ;;  %v1976_v62 = vmul.f32 %v7258_v39, %v1903_v15  ;;  %v1906_v57 = vadd.f32 %v1905_v13, %v7365_v41  ;;  %v2317_v6 = vld [vmem:[#allocation2 + $0xb0] sm:$0xff]  ;;  %v4588_v20 = vpop.f32.mrb[57].mxu1 }
 0x21c   : > { %v2255_v7 = vld [vmem:[#allocation2 + $0xb1] sm:$0xff]  ;;  %v1766_v59 = vadd.f32 %v4583_v40, %v7219_v43  ;;  %2193 = vst.msk [vmem:[#allocation2 + $0xe1] sm:$0xff] %vm963_vm2, %v2115_v26  ;;  %v2017_v50 = vadd.f32 %v7267_v5, %v1978_v14  ;;  %v1979_v42 = vmul.f32 %v7258_v39, %v1914_v12  ;;  %v5297_v29 = vpack.i.bf16 %v2317_v6, %v2316_v44  ;;  %v4590_v43 = vpop.f32.mrb[58].mxu1  ;;  %v2319_v44 = vld [vmem:[#allocation2 + $0xc8] sm:$0xff] }
 0x21d   : > { %v7488_v47 = vpack.i.bf16 %v2255_v7, %v2254_v9  ;;  %v5622_v41 = vld [vmem:[%s8471_s5 + $0xf0] sm:$0xff]   ;;  %v2015_v58 = vadd.f32 %v7267_v5, %v1976_v62  ;;  %v1977_v30 = vmul.f32 %v7258_v39, %v1906_v57  ;;  %v4589_v45 = vadd.f32 %v4588_v20, %v4587_v4  ;;  %v4591_v38 = vpop.f32.mrb[59].mxu1  ;;  %v7516_v26 = vld [vmem:[#allocation2 + $0x22] sm:$0xff] }
 0x21e   : > { %v1758_v40 = vadd.f32 %v7409_v55, %v7206_v18  ;;  %vm2049_vm10 = vcmp.gt.f32.partialorder %v2017_v50, 0.0  ;;  %v2088_v10 = vmul.f32 %v7281_v8, %v2017_v50  ;;  %v2018_v3 = vadd.f32 %v7267_v5, %v1979_v42  ;;  %5298 = vrot.lane.b32.xlu0 %v5297_v29, %s5733_s19  ;;  %v4897_v15 = vpop.f32.mrb[88].mxu0  ;;  %4743 = vmatprep.subr.bf16.mxu0 %v5622_v41  ;;  %v2257_v6 = vld [vmem:[#allocation2 + $0xc9] sm:$0xff]  ;;  %v2318_v20 = vld [vmem:[#allocation2 + $0xc0] sm:$0xff] }
 0x21f   : > { %5318 = vrot.lane.b32.xlu1 %v7488_v47, %s5733_s19  ;;  %v1769_v18 = vadd.f32 %v4586_v53, %v7224_v35  ;;  %vm2047_vm11 = vcmp.gt.f32.partialorder %v2015_v58, 0.0  ;;  %v2086_v55 = vmul.f32 %v7281_v8, %v2015_v58  ;;  %v2016_v32 = vadd.f32 %v7267_v5, %v1977_v30  ;;  %v1918_v13 = vpop.f32.mrb[89].mxu0  ;;  %4744 = vmatpush3.bf16.msra.mxu0 %v5623_v27  ;;  %v5625_v35 = vld [vmem:[%s8471_s5 + $0xb8] sm:$0xff]  }
 0x220   : > { %v7511_v51 = vadd.f32 %v4591_v38, %v4590_v43  ;;  %v2120_v34 = vsel %vm2049_vm10, %v2017_v50, %v2088_v10  ;;  %vm2050_vm12 = vcmp.gt.f32.partialorder %v2018_v3, 0.0  ;;  %v2089_v14 = vmul.f32 %v7281_v8, %v2018_v3  ;;  %v4898_v4 = vpop.f32.mrb[90].mxu0  ;;  %4745 = vmatprep.subr.bf16.mxu0 %v5624_v63 }
 0x221   : > { %v1927_v12 = vadd.f32 %v4897_v15, %v1766_v59  ;;  %2198 = vst.msk [vmem:[#allocation2 + $0x121] sm:$0xff] %vm963_vm2, %v2120_v34  ;;  %v2118_v53 = vsel %vm2047_vm11, %v2015_v58, %v2086_v55  ;;  %vm2048_vm13 = vcmp.gt.f32.partialorder %v2016_v32, 0.0  ;;  %v2087_v62 = vmul.f32 %v7281_v8, %v2016_v32  ;;  %v1921_v42 = vpop.f32.mrb[91].mxu0 }
 0x222   : > { %v1919_v57 = vadd.f32 %v1918_v13, %v1758_v40  ;;  %2196 = vst.msk [vmem:[#allocation2 + $0x109] sm:$0xff] %vm963_vm2, %v2118_v53  ;;  %v2121_v9 = vsel %vm2050_vm12, %v2018_v3, %v2089_v14  ;;  %v1930_v59 = vadd.f32 %v4898_v4, %v1769_v18  ;;  %v1761_v50 = vadd.f32 %v7424_v37, %v7214_v49  ;;  %v4593_v43 = vpop.f32.mrb[60].mxu1  ;;  %v2256_v40 = vld [vmem:[#allocation2 + $0xc1] sm:$0xff] }
 0x223   : > { %v1982_v7 = vmul.f32 %v7258_v39, %v1927_v12  ;;  %2199 = vst.msk [vmem:[#allocation2 + $0x129] sm:$0xff] %vm963_vm2, %v2121_v9  ;;  %v2119_v29 = vsel %vm2048_vm13, %v2016_v32, %v2087_v62  ;;  %v5307_v58 = vpack.i.bf16 %v2319_v44, %v2318_v20  ;;  %v5322_v30 = vpack.i.bf16 %v7516_v26, %v7513_v25  ;;  %v4594_v37 = vpop.f32.mrb[61].mxu1 }
 0x224   : > { %v1980_v41 = vmul.f32 %v7258_v39, %v1919_v57  ;;  %2197 = vst.msk [vmem:[#allocation2 + $0x111] sm:$0xff] %vm963_vm2, %v2119_v29  ;;  %v1983_v63 = vmul.f32 %v7258_v39, %v1930_v59  ;;  %v1922_v49 = vadd.f32 %v1921_v42, %v1761_v50  ;;  %v7536_v10 = vpack.i.bf16 %v2257_v6, %v2256_v40  ;;  %v4596_v18 = vpop.f32.mrb[62].mxu1  ;;  %v2321_v57 = vld [vmem:[#allocation2 + $0xe0] sm:$0xff] }
 0x225   : > { %v2021_v27 = vadd.f32 %v7267_v5, %v1982_v7  ;;  %4746 = vmatpush3.bf16.msra.mxu0 %v5625_v35  ;;  %5308 = vrot.lane.b32.xlu0 %v5307_v58, %s5733_s19  ;;  %v4595_v38 = vadd.f32 %v4594_v37, %v4593_v43  ;;  %v1774_v55 = vadd.f32 %v4589_v45, %v7232_v52  ;;  %v4597_v14 = vpop.f32.mrb[63].mxu1  ;;  %v7554_v7 = vld [vmem:[#allocation2 + $0x32] sm:$0xff]  ;;  %v7556_v59 = vld [vmem:[#allocation2 + $0x3a] sm:$0xff] }
 0x226   : > { %v2019_v3 = vadd.f32 %v7267_v5, %v1980_v41  ;;  %5323 = vrot.lane.b32.xlu1 %v5322_v30, %s5733_s19  ;;  %v2022_v15 = vadd.f32 %v7267_v5, %v1983_v63  ;;  %v1981_v34 = vmul.f32 %v7258_v39, %v1922_v49  ;;  %v4598_v13 = vadd.f32 %v4597_v14, %v4596_v18  ;;  %v4901_v35 = vpop.f32.mrb[92].mxu0  ;;  %v2258_v18 = vld [vmem:[#allocation2 + $0xd9] sm:$0xff] }
 0x227   : > { %vm2053_vm14 = vcmp.gt.f32.partialorder %v2021_v27, 0.0  ;;  %v2092_v32 = vmul.f32 %v7281_v8, %v2021_v27  ;;  %v1782_v44 = vadd.f32 %v4595_v38, %v7245_v19  ;;  %v1934_v45 = vpop.f32.mrb[93].mxu0  ;;  %v1777_v30 = vadd.f32 %v7511_v51, %v7240_v11 }
 0x228   : > { %vm2051_vm15 = vcmp.gt.f32.partialorder %v2019_v3, 0.0  ;;  %v2090_v12 = vmul.f32 %v7281_v8, %v2019_v3  ;;  %vm2054_vm0 = vcmp.gt.f32.partialorder %v2022_v15, 0.0  ;;  %v2093_v62 = vmul.f32 %v7281_v8, %v2022_v15  ;;  %v4902_v9 = vpop.f32.mrb[94].mxu0 }
 0x229   : > { %v2124_v53 = vsel %vm2053_vm14, %v2021_v27, %v2092_v32  ;;  %v2020_v52 = vadd.f32 %v7267_v5, %v1981_v34  ;;  %5313 = vrot.lane.b32.xlu0 %v7352_v56, %s5733_s19  ;;  %v1943_v6 = vadd.f32 %v4901_v35, %v1782_v44  ;;  %v1935_v19 = vadd.f32 %v1934_v45, %v1774_v55  ;;  %v1937_v29 = vpop.f32.mrb[95].mxu0  ;;  %v2320_v56 = vld [vmem:[#allocation2 + $0xd8] sm:$0xff] }
 0x22a   : > { %2202 = vst.msk [vmem:[#allocation2 + $0x151] sm:$0xff] %vm963_vm2, %v2124_v53  ;;  %v2122_v4 = vsel %vm2051_vm15, %v2019_v3, %v2090_v12  ;;  %5328 = vrot.lane.b32.xlu1 %v7536_v10, %s5733_s19  ;;  %v2125_v50 = vsel %vm2054_vm0, %v2022_v15, %v2093_v62  ;;  %v1785_v20 = vadd.f32 %v4598_v13, %v7250_v24  ;;  %v2259_v3 = vld [vmem:[#allocation2 + $0xe1] sm:$0xff]  ;;  %v2323_v34 = vld [vmem:[#allocation2 + $0xf8] sm:$0xff]  ;;  %v7582_v13 = vld [vmem:[#allocation2 + $0x4a] sm:$0xff] }
 0x22b   : > { %2200 = vst.msk [vmem:[#allocation2 + $0x139] sm:$0xff] %vm963_vm2, %v2122_v4  ;;  %vm2052_vm1 = vcmp.gt.f32.partialorder %v2020_v52, 0.0  ;;  %v2091_v42 = vmul.f32 %v7281_v8, %v2020_v52  ;;  %2203 = vst.msk [vmem:[#allocation2 + $0x159] sm:$0xff] %vm963_vm2, %v2125_v50  ;;  %v1986_v41 = vmul.f32 %v7258_v39, %v1943_v6  ;;  %v1984_v58 = vmul.f32 %v7258_v39, %v1935_v19  ;;  %v7584_v44 = vld [vmem:[#allocation2 + $0x52] sm:$0xff]  ;;  %v2324_v50 = vld [vmem:[#allocation2 + $0x108] sm:$0xff] }
 0x22c   : > { %v5332_v43 = vpack.i.bf16 %v2321_v57, %v2320_v56  ;;  %v1946_v27 = vadd.f32 %v4902_v9, %v1785_v20  ;;  %v5342_v63 = vpack.i.bf16 %v7556_v59, %v7554_v7  ;;  %v1938_v37 = vadd.f32 %v1937_v29, %v1777_v30  ;;  %v2322_v53 = vld [vmem:[#allocation2 + $0xf0] sm:$0xff]  ;;  %v2261_v57 = vld [vmem:[#allocation2 + $0xf9] sm:$0xff]  ;;  %v2327_v30 = vld [vmem:[#allocation2 + $0x128] sm:$0xff] }
 0x22d   : > { %v2123_v40 = vsel %vm2052_vm1, %v2020_v52, %v2091_v42  ;;  %v2025_v24 = vadd.f32 %v7267_v5, %v1986_v41  ;;  %v2023_v49 = vadd.f32 %v7267_v5, %v1984_v58  ;;  %v7578_v15 = vpack.i.bf16 %v2259_v3, %v2258_v18  ;;  %v2325_v19 = vld [vmem:[#allocation2 + $0x110] sm:$0xff]  ;;  %v2264_v3 = vld [vmem:[#allocation2 + $0x121] sm:$0xff] }
 0x22e   : > { %2201 = vst.msk [vmem:[#allocation2 + $0x141] sm:$0xff] %vm963_vm2, %v2123_v40  ;;  %5333 = vrot.lane.b32.xlu0 %v5332_v43, %s5733_s19  ;;  %v1987_v38 = vmul.f32 %v7258_v39, %v1946_v27  ;;  %5343 = vrot.lane.b32.xlu1 %v5342_v63, %s5733_s19  ;;  %v1985_v32 = vmul.f32 %v7258_v39, %v1938_v37  ;;  %v7605_v9 = vld [vmem:[#allocation2 + $0x6a] sm:$0xff]  ;;  %v7623_v40 = vld [vmem:[#allocation2 + $0x7a] sm:$0xff]  ;;  %v7625_v27 = vld [vmem:[#allocation2 + $0x82] sm:$0xff] }
 0x22f   : > { %vm2057_vm3 = vcmp.gt.f32.partialorder %v2025_v24, 0.0  ;;  %v2096_v11 = vmul.f32 %v7281_v8, %v2025_v24  ;;  %vm2055_vm4 = vcmp.gt.f32.partialorder %v2023_v49, 0.0  ;;  %v2094_v51 = vmul.f32 %v7281_v8, %v2023_v49  ;;  %v2263_v29 = vld [vmem:[#allocation2 + $0x111] sm:$0xff]  ;;  %v2262_v56 = vld [vmem:[#allocation2 + $0x109] sm:$0xff]  ;;  %v2326_v63 = vld [vmem:[#allocation2 + $0x120] sm:$0xff] }
 0x230   : > { %v2026_v55 = vadd.f32 %v7267_v5, %v1987_v38  ;;  %v2024_v39 = vadd.f32 %v7267_v5, %v1985_v32  ;;  %v5347_v62 = vpack.i.bf16 %v2323_v34, %v2322_v53  ;;  %v5362_v45 = vpack.i.bf16 %v7584_v44, %v7582_v13  ;;  %v2260_v5 = vld [vmem:[#allocation2 + $0xf1] sm:$0xff]  ;;  %v2265_v37 = vld [vmem:[#allocation2 + $0x129] sm:$0xff] }
 0x231   : > { %v2128_v14 = vsel %vm2057_vm3, %v2025_v24, %v2096_v11  ;;  %v2126_v12 = vsel %vm2055_vm4, %v2023_v49, %v2094_v51  ;;  %v7599_v6 = vpack.i.bf16 %v2261_v57, %v2260_v5  ;;  %v5372_v42 = vpack.i.bf16 %v2325_v19, %v2324_v50  ;;  %v7637_v11 = vld [vmem:[#allocation2 + $0x92] sm:$0xff]  ;;  %v7639_v51 = vld [vmem:[#allocation2 + $0x9a] sm:$0xff]  ;;  %v7662_v5 = vld [vmem:[#allocation2 + $0xca] sm:$0xff] }
 0x232   : > { %5338 = vrot.lane.b32.xlu0 %v7402_v31, %s5733_s19  ;;  %2206 = vst.msk [vmem:[#allocation2 + $0x181] sm:$0xff] %vm963_vm2, %v2128_v14  ;;  %2204 = vst.msk [vmem:[#allocation2 + $0x169] sm:$0xff] %vm963_vm2, %v2126_v12  ;;  %vm2058_vm5 = vcmp.gt.f32.partialorder %v2026_v55, 0.0  ;;  %v2097_v35 = vmul.f32 %v7281_v8, %v2026_v55  ;;  %5358 = vrot.lane.b32.xlu1 %v7578_v15, %s5733_s19  ;;  %vm2056_vm6 = vcmp.gt.f32.partialorder %v2024_v39, 0.0  ;;  %v2328_v18 = vld [vmem:[#allocation2 + $0x138] sm:$0xff]  ;;  %v2330_v53 = vld [vmem:[#allocation2 + $0x150] sm:$0xff] }
 0x233   : > { %v2095_v31 = vmul.f32 %v7281_v8, %v2024_v39  ;;  %v7603_v8 = vld [vmem:[#allocation2 + $0x62] sm:$0xff]  ;;  %v7617_v58 = vpack.i.bf16 %v2263_v29, %v2262_v56  ;;  %v5387_v24 = vpack.i.bf16 %v2327_v30, %v2326_v63  ;;  %v5402_v49 = vpack.i.bf16 %v7625_v27, %v7623_v40  ;;  %v2266_v14 = vld [vmem:[#allocation2 + $0x139] sm:$0xff] }
 0x234   : > { %v2129_v52 = vsel %vm2058_vm5, %v2026_v55, %v2097_v35  ;;  %v5382_v20 = vpack.i.bf16 %v7605_v9, %v7603_v8  ;;  %v7633_v38 = vpack.i.bf16 %v2265_v37, %v2264_v3  ;;  %v5422_v32 = vpack.i.bf16 %v7639_v51, %v7637_v11  ;;  %v7649_v35 = vld [vmem:[#allocation2 + $0xaa] sm:$0xff]  ;;  %v7673_v63 = vld [vmem:[#allocation2 + $0xe2] sm:$0xff]  ;;  %v7679_v3 = vld [vmem:[#allocation2 + $0xf2] sm:$0xff] }
 0x235   : > { %2207 = vst.msk [vmem:[#allocation2 + $0x189] sm:$0xff] %vm963_vm2, %v2129_v52  ;;  %v2127_v4 = vsel %vm2056_vm6, %v2024_v39, %v2095_v31  ;;  %v2267_v34 = vld [vmem:[#allocation2 + $0x141] sm:$0xff]  ;;  %v7651_v39 = vld [vmem:[#allocation2 + $0xb2] sm:$0xff] }
 0x236   : > { %5348 = vrot.lane.b32.xlu0 %v5347_v62, %s5733_s19  ;;  %5363 = vrot.lane.b32.xlu1 %v5362_v45, %s5733_s19  ;;  %2205 = vst.msk [vmem:[#allocation2 + $0x171] sm:$0xff] %vm963_vm2, %v2127_v4  ;;  %v5437_v12 = vpack.i.bf16 %v2267_v34, %v2266_v14  ;;  %v5442_v52 = vpack.i.bf16 %v7651_v39, %v7649_v35  ;;  %v2269_v31 = vld [vmem:[#allocation2 + $0x159] sm:$0xff]  ;;  %v2268_v45 = vld [vmem:[#allocation2 + $0x151] sm:$0xff]  ;;  %v2390_v34 = vld [vmem:[#allocation2 + $0x122] sm:$0xff] }
 0x237   : > { %v5447_v57 = vpack.i.bf16 %v2269_v31, %v2268_v45  ;;  %v2391_v14 = vld [vmem:[#allocation2 + $0x12a] sm:$0xff]  ;;  %v2208_v31 = vld [vmem:[#allocation2] sm:$0xff] }
 0x239   : > { %v2332_v19 = vld [vmem:[#allocation2 + $0x168] sm:$0xff] }
 0x23a   : > { %5353 = vrot.lane.b32.xlu0 %v7411_v16, %s5733_s19  ;;  %5368 = vrot.lane.b32.xlu1 %v7599_v6, %s5733_s19  ;;  %v2270_v29 = vld [vmem:[#allocation2 + $0x169] sm:$0xff] }
 0x23c   : > { %v2335_v30 = vld [vmem:[#allocation2 + $0x188] sm:$0xff] }
 0x23d   : > { %v7613_v41 = vld [vmem:[#allocation2 + $0x16a] sm:$0xff]  ;;  %v7615_v16 = vld [vmem:[#allocation2 + $0x172] sm:$0xff] }
 0x23e   : > { %5373 = vrot.lane.b32.xlu0 %v5372_v42, %s5733_s19  ;;  %5383 = vrot.lane.b32.xlu1 %v5382_v20, %s5733_s19  ;;  %v3206_v43 = vpack.c.bf16 %v7615_v16, %v7613_v41  ;;  %v2333_v4 = vld [vmem:[#allocation2 + $0x170] sm:$0xff] }
 0x23f   : > { %v5452_v50 = vpack.i.bf16 %v2333_v4, %v2332_v19  ;;  %v2271_v20 = vld [vmem:[#allocation2 + $0x171] sm:$0xff] }
 0x240   : > { %v5477_v56 = vpack.i.bf16 %v2271_v20, %v2270_v29  ;;  %v2394_v19 = vld [vmem:[#allocation2 + $0x152] sm:$0xff] }
 0x242   : > { %5378 = vrot.lane.b32.xlu0 %v7455_v54, %s5733_s19  ;;  %5398 = vrot.lane.b32.xlu1 %v7617_v58, %s5733_s19  ;;  %v2329_v54 = vld [vmem:[#allocation2 + $0x140] sm:$0xff] }
 0x243   : > { %v5412_v55 = vpack.i.bf16 %v2329_v54, %v2328_v18  ;;  %v7681_v54 = vld [vmem:[#allocation2 + $0xfa] sm:$0xff]  ;;  %v7688_v18 = vld [vmem:[#allocation2 + $0x10a] sm:$0xff] }
 0x246   : > { %5388 = vrot.lane.b32.xlu0 %v5387_v24, %s5733_s19  ;;  %5403 = vrot.lane.b32.xlu1 %v5402_v49, %s5733_s19  ;;  %v2334_v24 = vld [vmem:[#allocation2 + $0x180] sm:$0xff] }
 0x247   : > { %v5467_v49 = vpack.i.bf16 %v2335_v30, %v2334_v24  ;;  %v2272_v24 = vld [vmem:[#allocation2 + $0x2] sm:$0xff] }
 0x24a   : > { %5393 = vrot.lane.b32.xlu0 %v7467_v22, %s5733_s19  ;;  %5408 = vrot.lane.b32.xlu1 %v7633_v38, %s5733_s19  ;;  %v2331_v22 = vld [vmem:[#allocation2 + $0x158] sm:$0xff] }
 0x24b   : > { %v5427_v62 = vpack.i.bf16 %v2331_v22, %v2330_v53  ;;  %v5512_v22 = vpack.i.bf16 %v2391_v14, %v2390_v34  ;;  %v2393_v53 = vld [vmem:[#allocation2 + $0x142] sm:$0xff] }
 0x24e   : > { %5413 = vrot.lane.b32.xlu0 %v5412_v55, %s5733_s19  ;;  %5423 = vrot.lane.b32.xlu1 %v5422_v32, %s5733_s19  ;;  %v7690_v55 = vld [vmem:[#allocation2 + $0x112] sm:$0xff] }
 0x24f   : > { %v5502_v32 = vpack.i.bf16 %v7690_v55, %v7688_v18 }
 0x252   : > { %5418 = vrot.lane.b32.xlu0 %v7488_v47, %s5733_s19  ;;  %5438 = vrot.lane.b32.xlu1 %v5437_v12, %s5733_s19  ;;  %v7660_v47 = vld [vmem:[#allocation2 + $0xc2] sm:$0xff] }
 0x253   : > { %v5462_v42 = vpack.i.bf16 %v7662_v5, %v7660_v47 }
 0x256   : > { %5428 = vrot.lane.b32.xlu0 %v5427_v62, %s5733_s19  ;;  %5443 = vrot.lane.b32.xlu1 %v5442_v52, %s5733_s19  ;;  %v5244_v62 = vpop.permute.xlu1 %5243 }
 0x257   : > { %v5246_v45 = vunpack.i.h.bf16 %v5244_v62  ;;  %v5245_v4 = vunpack.i.l.bf16 %v5244_v62 }
 0x25a   : > { %5433 = vrot.lane.b32.xlu0 %v7536_v10, %s5733_s19  ;;  %5448 = vrot.lane.b32.xlu1 %v5447_v57, %s5733_s19  ;;  %v7671_v10 = vld [vmem:[#allocation2 + $0xda] sm:$0xff] }
 0x25b   : > { %v5482_v37 = vpack.i.bf16 %v7673_v63, %v7671_v10 }
 0x25e   : > { %5453 = vrot.lane.b32.xlu0 %v5452_v50, %s5733_s19  ;;  %5463 = vrot.lane.b32.xlu1 %v5462_v42, %s5733_s19  ;;  %v2395_v50 = vld [vmem:[#allocation2 + $0x15a] sm:$0xff] }
 0x25f   : > { %v5532_v20 = vpack.i.bf16 %v2395_v50, %v2394_v19  ;;  %v5626_v19 = vld [vmem:[%s8471_s5 + $0x108] sm:$0xff]  }
 0x262   : > { %5458 = vrot.lane.b32.xlu0 %v7578_v15, %s5733_s19  ;;  %5478 = vrot.lane.b32.xlu1 %v5477_v56, %s5733_s19  ;;  %v5492_v15 = vpack.i.bf16 %v7681_v54, %v7679_v3 }
 0x266   : > { %5468 = vrot.lane.b32.xlu0 %v5467_v49, %s5733_s19  ;;  %5483 = vrot.lane.b32.xlu1 %v5482_v37, %s5733_s19  ;;  %v2273_v49 = vld [vmem:[#allocation2 + $0xa] sm:$0xff] }
 0x26a   : > { %5473 = vrot.lane.b32.xlu0 %v7599_v6, %s5733_s19  ;;  %5493 = vrot.lane.b32.xlu1 %v5492_v15, %s5733_s19  ;;  %v2392_v6 = vld [vmem:[#allocation2 + $0x13a] sm:$0xff] }
 0x26b   : > { %v5522_v52 = vpack.i.bf16 %v2393_v53, %v2392_v6 }
 0x26e   : > { %5488 = vrot.lane.b32.xlu0 %v7617_v58, %s5733_s19  ;;  %5503 = vrot.lane.b32.xlu1 %v5502_v32, %s5733_s19  ;;  %v2209_v58 = vld [vmem:[#allocation2 + $0x8] sm:$0xff] }
 0x26f   : > { %v3010_v42 = vsel %vm963_vm2, %v2209_v58, %v5246_v45  ;;  %v2396_v32 = vld [vmem:[#allocation2 + $0x16a] sm:$0xff] }
 0x270   : > { %v2399_v58 = vld [vmem:[#allocation2 + $0x18a] sm:$0xff] }
 0x272   : > { %5498 = vrot.lane.b32.xlu0 %v7633_v38, %s5733_s19  ;;  %5513 = vrot.lane.b32.xlu1 %v5512_v22, %s5733_s19  ;;  %v3009_v38 = vsel %vm963_vm2, %v2208_v31, %v5245_v4  ;;  %v2398_v4 = vld [vmem:[#allocation2 + $0x182] sm:$0xff] }
 0x273   : > { %v3137_v34 = vpack.c.bf16 %v3010_v42, %v3009_v38  ;;  %v2461_v38 = vld [vmem:[#allocation2 + $0x181] sm:$0xff] }
 0x276   : > { %5508 = vrot.lane.b32.xlu0 %v5437_v12, %s5733_s19  ;;  %5523 = vrot.lane.b32.xlu1 %v5522_v52, %s5733_s19  ;;  %v2397_v12 = vld [vmem:[#allocation2 + $0x172] sm:$0xff]  ;;  %v2462_v52 = vld [vmem:[#allocation2 + $0x189] sm:$0xff] }
 0x277   : > { %v5542_v6 = vpack.i.bf16 %v2397_v12, %v2396_v32 }
 0x278   : > { %v5239_v29 = vpop.permute.xlu0 %5238 }
 0x279   : > { %v5254_v30 = vpop.permute.xlu1 %5253  ;;  %v5241_v37 = vunpack.i.h.bf16 %v5239_v29  ;;  %v5240_v15 = vunpack.i.l.bf16 %v5239_v29  ;;  %v2464_v29 = vld [vmem:[#allocation2 + $0x1a1] sm:$0xff] }
 0x27a   : > { %5518 = vrot.lane.b32.xlu0 %v5447_v57, %s5733_s19  ;;  %5533 = vrot.lane.b32.xlu1 %v5532_v20, %s5733_s19  ;;  %v5256_v50 = vunpack.i.h.bf16 %v5254_v30  ;;  %v5255_v42 = vunpack.i.l.bf16 %v5254_v30  ;;  %v2463_v20 = vld [vmem:[#allocation2 + $0x199] sm:$0xff] }
 0x27b   : > { %v3041_v14 = vsel %vm963_vm2, %v2272_v24, %v5240_v15  ;;  %v3042_v22 = vsel %vm963_vm2, %v2273_v49, %v5241_v37  ;;  %v5537_v24 = vpack.i.bf16 %v2462_v52, %v2461_v38  ;;  %v5552_v37 = vpack.i.bf16 %v2399_v58, %v2398_v4  ;;  %v5666_v15 = vld [vmem:[%s8471_s5 + $0x100] sm:$0xff]   ;;  %v5628_v38 = vld [vmem:[%s8471_s5 + $0x118] sm:$0xff]  }
 0x27c   : > { %v5249_v53 = vpop.permute.xlu0 %5248  ;;  %v3138_v31 = vpack.c.bf16 %v3042_v22, %v3041_v14 }
 0x27d   : > { %v7709_v62 = vpop.permute.xlu1 %5263  ;;  %v5251_v57 = vunpack.i.h.bf16 %v5249_v53  ;;  %v5250_v45 = vunpack.i.l.bf16 %v5249_v53  ;;  %v5547_v53 = vpack.i.bf16 %v2464_v29, %v2463_v20 }
 0x27e   : > { %5528 = vrot.lane.b32.xlu0 %v5477_v56, %s5733_s19  ;;  %5543 = vrot.lane.b32.xlu1 %v5542_v6, %s5733_s19  ;;  %v2211_v6 = vld [vmem:[#allocation2 + $0x20] sm:$0xff] }
 0x27f   : > { %3585 = vmatprep.mubr.bf16.mxu1 %v3138_v31  ;;  %v3043_v56 = vsel %vm963_vm2, %v7513_v25, %v5250_v45  ;;  %v3044_v49 = vsel %vm963_vm2, %v7516_v26, %v5251_v57  ;;  %v5627_v25 = vld [vmem:[%s8471_s5 + $0x110] sm:$0xff]   ;;  %v3012_v52 = vsel %vm963_vm2, %v2211_v6, %v5256_v50  ;;  %v5265_v50 = vunpack.i.l.bf16 %v7709_v62 }
 0x280   : > { %3586 = vmatmul.mubr.bf16.vlgmr.msra.gmra.mrb[64].mxu1 %v3137_v34  ;;  %v5259_v30 = vpop.permute.xlu0 %5258  ;;  %v3143_v12 = vpack.c.bf16 %v3044_v49, %v3043_v56  ;;  %v2210_v34 = vld [vmem:[#allocation2 + $0x18] sm:$0xff] }
 0x281   : > { %4904 = vmatpush3.bf16.msra.mxu1 %v5666_v15  ;;  %v5274_v32 = vpop.permute.xlu1 %5273  ;;  %v5261_v14 = vunpack.i.h.bf16 %v5259_v30  ;;  %v5260_v22 = vunpack.i.l.bf16 %v5259_v30  ;;  %v3011_v26 = vsel %vm963_vm2, %v2210_v34, %v5255_v42  ;;  %v5266_v42 = vunpack.i.h.bf16 %v7709_v62  ;;  %v2213_v56 = vld [vmem:[#allocation2 + $0x38] sm:$0xff] }
 0x282   : > { %5538 = vrot.lane.b32.xlu0 %v5537_v24, %s5733_s19  ;;  %4905 = vmatprep.subr.bf16.mxu1 %v5626_v19  ;;  %v3142_v58 = vpack.c.bf16 %v3012_v52, %v3011_v26  ;;  %v5275_v34 = vunpack.i.l.bf16 %v5274_v32 }
 0x283   : > { %5553 = vrot.lane.b32.xlu1 %v5552_v37, %s5733_s19  ;;  %3593 = vmatprep.mubr.bf16.mxu1 %v3143_v12  ;;  %v3045_v31 = vsel %vm963_vm2, %v7554_v7, %v5260_v22  ;;  %v3046_v57 = vsel %vm963_vm2, %v7556_v59, %v5261_v14  ;;  %v3014_v37 = vsel %vm963_vm2, %v2213_v56, %v5266_v42  ;;  %v5276_v22 = vunpack.i.h.bf16 %v5274_v32 }
 0x284   : > { %v5269_v45 = vpop.permute.xlu0 %5268  ;;  %v3148_v20 = vpack.c.bf16 %v3046_v57, %v3045_v31  ;;  %v7752_v31 = vld [vmem:[#allocation2 + $0x48] sm:$0xff] }
 0x285   : > { %v5284_v4 = vpop.permute.xlu1 %5283  ;;  %4906 = vmatpush3.bf16.msra.mxu1 %v5626_v19  ;;  %v5271_v7 = vunpack.i.h.bf16 %v5269_v45  ;;  %v5270_v29 = vunpack.i.l.bf16 %v5269_v45  ;;  %v2212_v19 = vld [vmem:[#allocation2 + $0x30] sm:$0xff] }
 0x286   : > { %5548 = vrot.lane.b32.xlu0 %v5547_v53, %s5733_s19  ;;  %4907 = vmatprep.subr.bf16.mxu1 %v5627_v25  ;;  %v3013_v49 = vsel %vm963_vm2, %v2212_v19, %v5265_v50  ;;  %v5285_v42 = vunpack.i.l.bf16 %v5284_v4  ;;  %s296_s19 = sand.u32 1, %s5723_s28  }
 0x287   : > { %v3047_v15 = vsel %vm963_vm2, %v7582_v13, %v5270_v29  ;;  %v3048_v62 = vsel %vm963_vm2, %v7584_v44, %v5271_v7  ;;  %v3147_v14 = vpack.c.bf16 %v3014_v37, %v3013_v49  ;;  %v7754_v13 = vld [vmem:[#allocation2 + $0x50] sm:$0xff]  ;;  %v3015_v44 = vsel %vm963_vm2, %v7752_v31, %v5275_v34  ;;  %v2336_v34 = vld [vmem:[#allocation2 + $0x19] sm:$0xff]  ;;  %s4258_s18 = sshll.u32 %s296_s19, 8  ;;  %s8425_s9 = scalar_lea.sflag [#allocation4], %s296_s19 }
 0x288   : > { %3594 = vmatmul.mubr.bf16.gmra.mrb[68].mxu1 %v3142_v58  ;;  %v5279_v59 = vpop.permute.xlu0 %5278  ;;  %v3153_v6 = vpack.c.bf16 %v3048_v62, %v3047_v15  ;;  %v3016_v57 = vsel %vm963_vm2, %v7754_v13, %v5276_v22  ;;  %v7766_v15 = vld [vmem:[#allocation2 + $0x60] sm:$0xff]  ;;  %v7768_v62 = vld [vmem:[#allocation2 + $0x68] sm:$0xff]  ;;  %s8213_s10 = scalar_lea.vmem [#allocation3], %s4258_s18 }
 0x289   : > { %v7740_v24 = vpop.permute.xlu1 %5293  ;;  %3601 = vmatprep.mubr.bf16.mxu1 %v3148_v20  ;;  %4908 = vmatpush3.bf16.msra.mxu1 %v5627_v25  ;;  %v5281_v53 = vunpack.i.h.bf16 %v5279_v59  ;;  %v5280_v25 = vunpack.i.l.bf16 %v5279_v59  ;;  %v3152_v58 = vpack.c.bf16 %v3016_v57, %v3015_v44  ;;  %s4192_s13 = sshll.u32 %s8213_s10, 4  ;;  %s8414_s13 = int_to_ptr.vmem [resolvable:$true] %s4192_s13 }
 0x28a   : > { %4909 = vmatprep.subr.bf16.mxu1 %v5628_v38  ;;  %v5296_v44 = vunpack.i.h.bf16 %v7740_v24  ;;  %s5669_s22 = scalar_lea.vmem %s8414_s13, 4096  ;;  %p5676_p0 = scmp.lt.s32.totalorder %s8414_s13, %s5674_s24 }
 0x28b   : > { %v3049_v32 = vsel %vm963_vm2, %v7603_v8, %v5280_v25  ;;  %v3050_v45 = vsel %vm963_vm2, %v7605_v9, %v5281_v53  ;;  %v3017_v8 = vsel %vm963_vm2, %v7766_v15, %v5285_v42  ;;  %p5670_p11 = scmp.ne.s32.totalorder %s8414_s13, %s5669_s22  ;;  %p5677_p1 = scmp.lt.s32.totalorder %s5675_s25, %s5669_s22 }
 0x28c   : > { %v5289_v30 = vpop.permute.xlu0 %5288  ;;  %v3158_v50 = vpack.c.bf16 %v3050_v45, %v3049_v32 }
 0x28d   : > { %v7748_v12 = vpop.permute.xlu1 %5303  ;;  %4910 = vmatpush3.bf16.msra.mxu1 %v5628_v38  ;;  %v5286_v38 = vunpack.i.h.bf16 %v5284_v4  ;;  %v5291_v20 = vunpack.i.h.bf16 %v5289_v30  ;;  %v5290_v7 = vunpack.i.l.bf16 %v5289_v30  ;;  %p5671_p12 = pnand %p5670_p11, %p5821_p5  ;;  %p5678_p2 = por %p5677_p1, %p5676_p0 }
 0x28f   : > { %v3018_v9 = vsel %vm963_vm2, %v7768_v62, %v5286_v38  ;;  %v3051_v30 = vsel %vm963_vm2, %v7623_v40, %v5290_v7  ;;  %v3052_v22 = vsel %vm963_vm2, %v7625_v27, %v5291_v20  ;;  %p5672_p13 = pneg %p5671_p12 }
 0x290   : > { %3602 = vmatmul.mubr.bf16.gmra.mrb[72].mxu1 %v3147_v14  ;;  %v5299_v26 = vpop.permute.xlu0 %5298  ;;  %v3157_v45 = vpack.c.bf16 %v3018_v9, %v3017_v8  ;;  %v3163_v42 = vpack.c.bf16 %v3052_v22, %v3051_v30 }
 0x291   : > { %3609 = vmatprep.mubr.bf16.mxu1 %v3153_v6  ;;  %v7750_v52 = vpop.permute.xlu1 %5318  ;;  %v2337_v6 = vld [vmem:[#allocation2 + $0x21] sm:$0xff]  ;;  %v5300_v27 = vunpack.i.l.bf16 %v5299_v26  ;;  %p5679_p3 = pnand %p5678_p2, %p5672_p13 }
 0x293   : > { %v3053_v8 = vsel %vm963_vm2, %v7637_v11, %v5300_v27 }
 0x297   : > { %v7764_v29 = vpop.permute.xlu0 %5308 }
 0x298   : > { %v5324_v59 = vpop.permute.xlu1 %5323  ;;  %3610 = vmatmul.mubr.bf16.gmra.mrb[76].mxu1 %v3152_v58  ;;  %v5295_v58 = vunpack.i.l.bf16 %v7740_v24  ;;  %v7790_v24 = vld [vmem:[#allocation2 + $0x80] sm:$0xff] }
 0x299   : > { %3617 = vmatprep.mubr.bf16.mxu1 %v3158_v50  ;;  %v5326_v49 = vunpack.i.h.bf16 %v5324_v59  ;;  %v5325_v37 = vunpack.i.l.bf16 %v5324_v59  ;;  %v5301_v50 = vunpack.i.h.bf16 %v5299_v26 }
 0x29b   : > { %v5314_v4 = vpop.permute.xlu0 %5313  ;;  %v3074_v57 = vsel %vm963_vm2, %v2337_v6, %v5326_v49  ;;  %v3073_v32 = vsel %vm963_vm2, %v2336_v34, %v5325_v37  ;;  %v7788_v37 = vld [vmem:[#allocation2 + $0x78] sm:$0xff]  ;;  %v3054_v9 = vsel %vm963_vm2, %v7639_v51, %v5301_v50 }
 0x29c   : > { %v7774_v14 = vpop.permute.xlu1 %5328  ;;  %v5316_v53 = vunpack.i.h.bf16 %v5314_v4  ;;  %v5315_v25 = vunpack.i.l.bf16 %v5314_v4  ;;  %v3139_v59 = vpack.c.bf16 %v3074_v57, %v3073_v32  ;;  %v5306_v57 = vunpack.i.h.bf16 %v7748_v12 }
 0x29e   : > { %v3105_v38 = vsel %vm963_vm2, %v2212_v19, %v5315_v25  ;;  %v3106_v40 = vsel %vm963_vm2, %v2213_v56, %v5316_v53  ;;  %v3019_v19 = vsel %vm963_vm2, %v7788_v37, %v5295_v58  ;;  %v3020_v56 = vsel %vm963_vm2, %v7790_v24, %v5296_v44  ;;  %v2338_v53 = vld [vmem:[#allocation2 + $0x31] sm:$0xff]  ;;  %v2339_v25 = vld [vmem:[#allocation2 + $0x39] sm:$0xff] }
 0x29f   : > { %v3140_v7 = vpack.c.bf16 %v3106_v40, %v3105_v38  ;;  %v3162_v32 = vpack.c.bf16 %v3020_v56, %v3019_v19  ;;  %v5305_v58 = vunpack.i.l.bf16 %v7748_v12  ;;  %v3168_v38 = vpack.c.bf16 %v3054_v9, %v3053_v8 }
 0x2a0   : > { %v7786_v20 = vpop.permute.xlu0 %5333  ;;  %3618 = vmatmul.mubr.bf16.gmra.mrb[80].mxu1 %v3157_v45  ;;  %v5344_v4 = vpop.permute.xlu1 %5343  ;;  %v5311_v40 = vunpack.i.h.bf16 %v7764_v29 }
 0x2a1   : > { %3625 = vmatprep.mubr.bf16.mxu1 %v3163_v42  ;;  %v5346_v49 = vunpack.i.h.bf16 %v5344_v4  ;;  %v5345_v6 = vunpack.i.l.bf16 %v5344_v4  ;;  %3746 = vmatprep.mubr.bf16.mxu0 %v3140_v7  ;;  %v5310_v42 = vunpack.i.l.bf16 %v7764_v29 }
 0x2a2   : > { %3747 = vmatmul.mubr.bf16.vlgmr.msra.gmra.mrb[96].mxu0 %v3139_v59  ;;  %v3056_v56 = vsel %vm963_vm2, %v7651_v39, %v5311_v40 }
 0x2a3   : > { %v3075_v45 = vsel %vm963_vm2, %v2338_v53, %v5345_v6  ;;  %v3076_v44 = vsel %vm963_vm2, %v2339_v25, %v5346_v49  ;;  %v7814_v49 = vld [vmem:[#allocation2 + $0x90] sm:$0xff]  ;;  %v3055_v19 = vsel %vm963_vm2, %v7649_v35, %v5310_v42  ;;  %v5321_v53 = vunpack.i.h.bf16 %v7750_v52 }
 0x2a4   : > { %v5339_v26 = vpop.permute.xlu0 %5338  ;;  %v7800_v34 = vpop.permute.xlu1 %5358  ;;  %v3144_v59 = vpack.c.bf16 %v3076_v44, %v3075_v45  ;;  %v5320_v45 = vunpack.i.l.bf16 %v7750_v52  ;;  %v3173_v44 = vpack.c.bf16 %v3056_v56, %v3055_v19  ;;  %v2342_v19 = vld [vmem:[#allocation2 + $0x61] sm:$0xff]  ;;  %v2343_v56 = vld [vmem:[#allocation2 + $0x69] sm:$0xff] }
 0x2a5   : > { %v5341_v30 = vunpack.i.h.bf16 %v5339_v26  ;;  %v5340_v22 = vunpack.i.l.bf16 %v5339_v26 }
 0x2a7   : > { %v3107_v11 = vsel %vm963_vm2, %v7752_v31, %v5340_v22  ;;  %v3108_v51 = vsel %vm963_vm2, %v7754_v13, %v5341_v30  ;;  %v7816_v31 = vld [vmem:[#allocation2 + $0x98] sm:$0xff]  ;;  %v3021_v13 = vsel %vm963_vm2, %v7814_v49, %v5305_v58  ;;  %v2340_v30 = vld [vmem:[#allocation2 + $0x49] sm:$0xff]  ;;  %v5336_v58 = vunpack.i.h.bf16 %v7786_v20 }
 0x2a8   : > { %v7812_v50 = vpop.permute.xlu0 %5348  ;;  %v3145_v27 = vpack.c.bf16 %v3108_v51, %v3107_v11  ;;  %3626 = vmatmul.mubr.bf16.gmra.mrb[84].mxu1 %v3162_v32  ;;  %v5364_v7 = vpop.permute.xlu1 %5363  ;;  %v3022_v29 = vsel %vm963_vm2, %v7816_v31, %v5306_v57  ;;  %v2341_v22 = vld [vmem:[#allocation2 + $0x51] sm:$0xff]  ;;  %v5335_v11 = vunpack.i.l.bf16 %v7786_v20 }
 0x2a9   : > { %3633 = vmatprep.mubr.bf16.mxu1 %v3168_v38  ;;  %v5366_v4 = vunpack.i.h.bf16 %v5364_v7  ;;  %v5365_v12 = vunpack.i.l.bf16 %v5364_v7  ;;  %v3167_v25 = vpack.c.bf16 %v3022_v29, %v3021_v13  ;;  %v7840_v7 = vld [vmem:[#allocation2 + $0xa8] sm:$0xff] }
 0x2aa   : > { %3754 = vmatprep.mubr.bf16.mxu0 %v3145_v27 }
 0x2ab   : > { %3755 = vmatmul.mubr.bf16.gmra.mrb[100].mxu0 %v3144_v59  ;;  %v3077_v32 = vsel %vm963_vm2, %v2340_v30, %v5365_v12  ;;  %v3078_v57 = vsel %vm963_vm2, %v2341_v22, %v5366_v4  ;;  %v3057_v4 = vsel %vm963_vm2, %v7660_v47, %v5335_v11  ;;  %v3058_v12 = vsel %vm963_vm2, %v7662_v5, %v5336_v58  ;;  %v7866_v11 = vld [vmem:[#allocation2 + $0xc0] sm:$0xff] }
 0x2ac   : > { %v5354_v6 = vpop.permute.xlu0 %5353  ;;  %v7826_v9 = vpop.permute.xlu1 %5368  ;;  %v3149_v42 = vpack.c.bf16 %v3078_v57, %v3077_v32  ;;  %v5351_v32 = vunpack.i.h.bf16 %v7812_v50  ;;  %v5350_v57 = vunpack.i.l.bf16 %v7812_v50 }
 0x2ad   : > { %v5356_v26 = vunpack.i.h.bf16 %v5354_v6  ;;  %v5355_v8 = vunpack.i.l.bf16 %v5354_v6 }
 0x2af   : > { %v3109_v35 = vsel %vm963_vm2, %v7766_v15, %v5355_v8  ;;  %v3110_v39 = vsel %vm963_vm2, %v7768_v62, %v5356_v26  ;;  %v7842_v15 = vld [vmem:[#allocation2 + $0xb0] sm:$0xff]  ;;  %v3023_v62 = vsel %vm963_vm2, %v7840_v7, %v5320_v45  ;;  %v5331_v26 = vunpack.i.h.bf16 %v7774_v14 }
 0x2b0   : > { %v7838_v51 = vpop.permute.xlu0 %5373  ;;  %v3150_v38 = vpack.c.bf16 %v3110_v39, %v3109_v35  ;;  %3634 = vmatmul.mubr.bf16.gmra.mrb[88].mxu1 %v3167_v25  ;;  %v5384_v40 = vpop.permute.xlu1 %5383  ;;  %v3024_v20 = vsel %vm963_vm2, %v7842_v15, %v5321_v53  ;;  %v5330_v53 = vunpack.i.l.bf16 %v7774_v14  ;;  %v3178_v25 = vpack.c.bf16 %v3058_v12, %v3057_v4 }
 0x2b1   : > { %3641 = vmatprep.mubr.bf16.mxu1 %v3173_v44  ;;  %v5386_v27 = vunpack.i.h.bf16 %v5384_v40  ;;  %v5385_v52 = vunpack.i.l.bf16 %v5384_v40  ;;  %v3172_v8 = vpack.c.bf16 %v3024_v20, %v3023_v62  ;;  %v3059_v40 = vsel %vm963_vm2, %v7671_v10, %v5350_v57  ;;  %v2344_v20 = vld [vmem:[#allocation2 + $0x79] sm:$0xff] }
 0x2b2   : > { %3762 = vmatprep.mubr.bf16.mxu0 %v3150_v38  ;;  %v5361_v4 = vunpack.i.h.bf16 %v7800_v34 }
 0x2b3   : > { %3763 = vmatmul.mubr.bf16.gmra.mrb[104].mxu0 %v3149_v42  ;;  %v3079_v30 = vsel %vm963_vm2, %v2342_v19, %v5385_v52  ;;  %v3080_v22 = vsel %vm963_vm2, %v2343_v56, %v5386_v27  ;;  %v3060_v42 = vsel %vm963_vm2, %v7673_v63, %v5351_v32  ;;  %v5360_v19 = vunpack.i.l.bf16 %v7800_v34 }
 0x2b4   : > { %v5379_v59 = vpop.permute.xlu0 %5378  ;;  %v7852_v6 = vpop.permute.xlu1 %5398  ;;  %v3154_v44 = vpack.c.bf16 %v3080_v22, %v3079_v30  ;;  %v3183_v56 = vpack.c.bf16 %v3060_v42, %v3059_v40 }
 0x2b5   : > { %v5381_v13 = vunpack.i.h.bf16 %v5379_v59  ;;  %v5380_v29 = vunpack.i.l.bf16 %v5379_v59  ;;  %v2345_v59 = vld [vmem:[#allocation2 + $0x81] sm:$0xff] }
 0x2b7   : > { %v3111_v47 = vsel %vm963_vm2, %v7788_v37, %v5380_v29  ;;  %v3112_v5 = vsel %vm963_vm2, %v7790_v24, %v5381_v13  ;;  %v7868_v37 = vld [vmem:[#allocation2 + $0xc8] sm:$0xff]  ;;  %v3025_v24 = vsel %vm963_vm2, %v7866_v11, %v5330_v53 }
 0x2b8   : > { %v7864_v45 = vpop.permute.xlu0 %5388  ;;  %v3155_v35 = vpack.c.bf16 %v3112_v5, %v3111_v47  ;;  %3642 = vmatmul.mubr.bf16.gmra.mrb[92].mxu1 %v3172_v8  ;;  %v5404_v39 = vpop.permute.xlu1 %5403  ;;  %v3026_v50 = vsel %vm963_vm2, %v7868_v37, %v5331_v26  ;;  %v5376_v26 = vunpack.i.h.bf16 %v7838_v51  ;;  %v5375_v8 = vunpack.i.l.bf16 %v7838_v51 }
 0x2b9   : > { %3649 = vmatprep.mubr.bf16.mxu1 %v3178_v25  ;;  %v5406_v58 = vunpack.i.h.bf16 %v5404_v39  ;;  %v5405_v14 = vunpack.i.l.bf16 %v5404_v39  ;;  %v3177_v12 = vpack.c.bf16 %v3026_v50, %v3025_v24  ;;  %v7892_v25 = vld [vmem:[#allocation2 + $0xd8] sm:$0xff]  ;;  %v5371_v50 = vunpack.i.h.bf16 %v7826_v9 }
 0x2ba   : > { %3770 = vmatprep.mubr.bf16.mxu0 %v3155_v35  ;;  %v3061_v57 = vsel %vm963_vm2, %v7679_v3, %v5375_v8  ;;  %v3062_v35 = vsel %vm963_vm2, %v7681_v54, %v5376_v26  ;;  %v2347_v24 = vld [vmem:[#allocation2 + $0x99] sm:$0xff] }
 0x2bb   : > { %3771 = vmatmul.mubr.bf16.gmra.mrb[108].mxu0 %v3154_v44  ;;  %v3081_v13 = vsel %vm963_vm2, %v2344_v20, %v5405_v14  ;;  %v3082_v29 = vsel %vm963_vm2, %v2345_v59, %v5406_v58  ;;  %v2346_v14 = vld [vmem:[#allocation2 + $0x91] sm:$0xff]  ;;  %v5391_v20 = vunpack.i.h.bf16 %v7864_v45  ;;  %v5390_v59 = vunpack.i.l.bf16 %v7864_v45 }
 0x2bc   : > { %v5394_v38 = vpop.permute.xlu0 %5393  ;;  %v7878_v62 = vpop.permute.xlu1 %5408  ;;  %v3159_v47 = vpack.c.bf16 %v3082_v29, %v3081_v13 }
 0x2bd   : > { %v5396_v27 = vunpack.i.h.bf16 %v5394_v38  ;;  %v5395_v52 = vunpack.i.l.bf16 %v5394_v38  ;;  %v3064_v26 = vsel %vm963_vm2, %v7690_v55, %v5391_v20 }
 0x2bf   : > { %v3113_v10 = vsel %vm963_vm2, %v7814_v49, %v5395_v52  ;;  %v3114_v63 = vsel %vm963_vm2, %v7816_v31, %v5396_v27  ;;  %v7894_v49 = vld [vmem:[#allocation2 + $0xe0] sm:$0xff]  ;;  %v3027_v31 = vsel %vm963_vm2, %v7892_v25, %v5360_v19  ;;  %v5370_v27 = vunpack.i.l.bf16 %v7826_v9 }
 0x2c0   : > { %v7890_v30 = vpop.permute.xlu0 %5413  ;;  %v3160_v22 = vpack.c.bf16 %v3114_v63, %v3113_v10  ;;  %3650 = vmatmul.mubr.bf16.gmra.mrb[96].mxu1 %v3177_v12  ;;  %v5424_v53 = vpop.permute.xlu1 %5423  ;;  %v3028_v51 = vsel %vm963_vm2, %v7894_v49, %v5361_v4  ;;  %v3188_v52 = vpack.c.bf16 %v3062_v35, %v3061_v57  ;;  %v7918_v10 = vld [vmem:[#allocation2 + $0xf0] sm:$0xff]  ;;  %v5400_v57 = vunpack.i.l.bf16 %v7852_v6 }
 0x2c1   : > { %3657 = vmatprep.mubr.bf16.mxu1 %v3183_v56  ;;  %v5426_v5 = vunpack.i.h.bf16 %v5424_v53  ;;  %v5425_v34 = vunpack.i.l.bf16 %v5424_v53  ;;  %v3182_v38 = vpack.c.bf16 %v3028_v51, %v3027_v31  ;;  %v3063_v56 = vsel %vm963_vm2, %v7688_v18, %v5390_v59 }
 0x2c2   : > { %3778 = vmatprep.mubr.bf16.mxu0 %v3160_v22  ;;  %v3193_v35 = vpack.c.bf16 %v3064_v26, %v3063_v56  ;;  %v5410_v56 = vunpack.i.l.bf16 %v7878_v62 }
 0x2c3   : > { %3779 = vmatmul.mubr.bf16.gmra.mrb[112].mxu0 %v3159_v47  ;;  %v3083_v40 = vsel %vm963_vm2, %v2346_v14, %v5425_v34  ;;  %v3084_v42 = vsel %vm963_vm2, %v2347_v24, %v5426_v5  ;;  %v2348_v47 = vld [vmem:[#allocation2 + $0xa9] sm:$0xff]  ;;  %v2349_v5 = vld [vmem:[#allocation2 + $0xb1] sm:$0xff]  ;;  %v5401_v34 = vunpack.i.h.bf16 %v7852_v6 }
 0x2c4   : > { %v5419_v32 = vpop.permute.xlu0 %5418  ;;  %v7904_v58 = vpop.permute.xlu1 %5438  ;;  %v3164_v29 = vpack.c.bf16 %v3084_v42, %v3083_v40  ;;  %v7944_v42 = vld [vmem:[#allocation2 + $0x108] sm:$0xff] }
 0x2c5   : > { %v5421_v39 = vunpack.i.h.bf16 %v5419_v32  ;;  %v5420_v44 = vunpack.i.l.bf16 %v5419_v32 }
 0x2c7   : > { %v3115_v3 = vsel %vm963_vm2, %v7840_v7, %v5420_v44  ;;  %v3116_v54 = vsel %vm963_vm2, %v7842_v15, %v5421_v39  ;;  %v7920_v7 = vld [vmem:[#allocation2 + $0xf8] sm:$0xff]  ;;  %v3029_v15 = vsel %vm963_vm2, %v7918_v10, %v5370_v27  ;;  %v5416_v39 = vunpack.i.h.bf16 %v7890_v30  ;;  %v7952_v27 = vld [vmem:[#allocation2 + $0x122] sm:$0xff] }
 0x2c8   : > { %v7916_v4 = vpop.permute.xlu0 %5428  ;;  %v3165_v12 = vpack.c.bf16 %v3116_v54, %v3115_v3  ;;  %3658 = vmatmul.mubr.bf16.gmra.mrb[100].mxu1 %v3182_v38  ;;  %v5444_v13 = vpop.permute.xlu1 %5443  ;;  %v3030_v45 = vsel %vm963_vm2, %v7920_v7, %v5371_v50  ;;  %v5415_v44 = vunpack.i.l.bf16 %v7890_v30  ;;  %v7954_v3 = vld [vmem:[#allocation2 + $0x12a] sm:$0xff] }
 0x2c9   : > { %3665 = vmatprep.mubr.bf16.mxu1 %v3188_v52  ;;  %v5446_v19 = vunpack.i.h.bf16 %v5444_v13  ;;  %v5445_v9 = vunpack.i.l.bf16 %v5444_v13  ;;  %v3187_v31 = vpack.c.bf16 %v3030_v45, %v3029_v15  ;;  %v3066_v20 = vsel %vm963_vm2, %v7954_v3, %v5416_v39 }
 0x2ca   : > { %3786 = vmatprep.mubr.bf16.mxu0 %v3165_v12  ;;  %v3065_v52 = vsel %vm963_vm2, %v7952_v27, %v5415_v44 }
 0x2cb   : > { %3787 = vmatmul.mubr.bf16.gmra.mrb[116].mxu0 %v3164_v29  ;;  %v3085_v51 = vsel %vm963_vm2, %v2348_v47, %v5445_v9  ;;  %v3086_v32 = vsel %vm963_vm2, %v2349_v5, %v5446_v19  ;;  %v2350_v29 = vld [vmem:[#allocation2 + $0xc1] sm:$0xff]  ;;  %v2351_v19 = vld [vmem:[#allocation2 + $0xc9] sm:$0xff]  ;;  %v5411_v9 = vunpack.i.h.bf16 %v7878_v62  ;;  %v5431_v47 = vunpack.i.h.bf16 %v7916_v4 }
 0x2cc   : > { %v5434_v63 = vpop.permute.xlu0 %5433  ;;  %v7930_v53 = vpop.permute.xlu1 %5448  ;;  %v3169_v38 = vpack.c.bf16 %v3086_v32, %v3085_v51  ;;  %v5430_v5 = vunpack.i.l.bf16 %v7916_v4  ;;  %v7978_v4 = vld [vmem:[#allocation2 + $0x142] sm:$0xff] }
 0x2cd   : > { %v5436_v8 = vunpack.i.h.bf16 %v5434_v63  ;;  %v5435_v22 = vunpack.i.l.bf16 %v5434_v63 }
 0x2cf   : > { %v3117_v18 = vsel %vm963_vm2, %v7866_v11, %v5435_v22  ;;  %v3118_v55 = vsel %vm963_vm2, %v7868_v37, %v5436_v8  ;;  %v7946_v11 = vld [vmem:[#allocation2 + $0x110] sm:$0xff]  ;;  %v3031_v37 = vsel %vm963_vm2, %v7944_v42, %v5400_v57  ;;  %v3198_v22 = vpack.c.bf16 %v3066_v20, %v3065_v52 }
 0x2d0   : > { %v7942_v14 = vpop.permute.xlu0 %5453  ;;  %v3170_v24 = vpack.c.bf16 %v3118_v55, %v3117_v18  ;;  %3666 = vmatmul.mubr.bf16.gmra.mrb[104].mxu1 %v3187_v31  ;;  %v5464_v50 = vpop.permute.xlu1 %5463  ;;  %v3032_v30 = vsel %vm963_vm2, %v7946_v11, %v5401_v34  ;;  %v2232_v18 = vld [vmem:[#allocation2 + $0x120] sm:$0xff]  ;;  %v5440_v20 = vunpack.i.l.bf16 %v7904_v58 }
 0x2d1   : > { %3673 = vmatprep.mubr.bf16.mxu1 %v3193_v35  ;;  %v5466_v40 = vunpack.i.h.bf16 %v5464_v50  ;;  %v5465_v6 = vunpack.i.l.bf16 %v5464_v50  ;;  %v3192_v15 = vpack.c.bf16 %v3032_v30, %v3031_v37  ;;  %v7976_v35 = vld [vmem:[#allocation2 + $0x13a] sm:$0xff]  ;;  %v5441_v37 = vunpack.i.h.bf16 %v7904_v58 }
 0x2d2   : > { %3794 = vmatprep.mubr.bf16.mxu0 %v3170_v24  ;;  %v3067_v44 = vsel %vm963_vm2, %v7976_v35, %v5430_v5  ;;  %v3068_v24 = vsel %vm963_vm2, %v7978_v4, %v5431_v47  ;;  %v2234_v47 = vld [vmem:[#allocation2 + $0x138] sm:$0xff] }
 0x2d3   : > { %3795 = vmatmul.mubr.bf16.gmra.mrb[120].mxu0 %v3169_v38  ;;  %v3087_v45 = vsel %vm963_vm2, %v2350_v29, %v5465_v6  ;;  %v3088_v63 = vsel %vm963_vm2, %v2351_v19, %v5466_v40  ;;  %v2352_v40 = vld [vmem:[#allocation2 + $0xd9] sm:$0xff]  ;;  %v2353_v6 = vld [vmem:[#allocation2 + $0xe1] sm:$0xff]  ;;  %v3203_v19 = vpack.c.bf16 %v3068_v24, %v3067_v44  ;;  %v2354_v44 = vld [vmem:[#allocation2 + $0xf1] sm:$0xff]  ;;  %v5451_v24 = vunpack.i.h.bf16 %v7930_v53 }
 0x2d4   : > { %v5459_v54 = vpop.permute.xlu0 %5458  ;;  %v7960_v13 = vpop.permute.xlu1 %5478  ;;  %v3174_v32 = vpack.c.bf16 %v3088_v63, %v3087_v45 }
 0x2d5   : > { %v5461_v59 = vunpack.i.h.bf16 %v5459_v54  ;;  %v5460_v12 = vunpack.i.l.bf16 %v5459_v54 }
 0x2d7   : > { %v3119_v26 = vsel %vm963_vm2, %v7892_v25, %v5460_v12  ;;  %v3120_v8 = vsel %vm963_vm2, %v7894_v49, %v5461_v59  ;;  %v2233_v25 = vld [vmem:[#allocation2 + $0x128] sm:$0xff]  ;;  %v3033_v49 = vsel %vm963_vm2, %v2232_v18, %v5410_v56 }
 0x2d8   : > { %v7972_v34 = vpop.permute.xlu0 %5468  ;;  %v3175_v31 = vpack.c.bf16 %v3120_v8, %v3119_v26  ;;  %3674 = vmatmul.mubr.bf16.gmra.mrb[108].mxu1 %v3192_v15  ;;  %v5484_v51 = vpop.permute.xlu1 %5483  ;;  %v3034_v55 = vsel %vm963_vm2, %v2233_v25, %v5411_v9  ;;  %v5456_v9 = vunpack.i.h.bf16 %v7942_v14  ;;  %v5455_v15 = vunpack.i.l.bf16 %v7942_v14 }
 0x2d9   : > { %3681 = vmatprep.mubr.bf16.mxu1 %v3198_v22  ;;  %v5486_v57 = vunpack.i.h.bf16 %v5484_v51  ;;  %v5485_v62 = vunpack.i.l.bf16 %v5484_v51  ;;  %v3197_v30 = vpack.c.bf16 %v3034_v55, %v3033_v49  ;;  %v3035_v14 = vsel %vm963_vm2, %v2234_v47, %v5440_v20  ;;  %v8000_v51 = vld [vmem:[#allocation2 + $0x152] sm:$0xff] }
 0x2da   : > { %3802 = vmatprep.mubr.bf16.mxu0 %v3175_v31  ;;  %v3069_v49 = vsel %vm963_vm2, %v8000_v51, %v5455_v15  ;;  %v5471_v20 = vunpack.i.h.bf16 %v7972_v34 }
 0x2db   : > { %3803 = vmatmul.mubr.bf16.gmra.mrb[124].mxu0 %v3174_v32  ;;  %v3089_v54 = vsel %vm963_vm2, %v2352_v40, %v5485_v62  ;;  %v3090_v52 = vsel %vm963_vm2, %v2353_v6, %v5486_v57  ;;  %v8002_v32 = vld [vmem:[#allocation2 + $0x15a] sm:$0xff]  ;;  %v5450_v6 = vunpack.i.l.bf16 %v7930_v53 }
 0x2dc   : > { %v5474_v39 = vpop.permute.xlu0 %5473  ;;  %v5494_v59 = vpop.permute.xlu1 %5493  ;;  %v3179_v8 = vpack.c.bf16 %v3090_v52, %v3089_v54  ;;  %v3070_v55 = vsel %vm963_vm2, %v8002_v32, %v5456_v9 }
 0x2dd   : > { %v5476_v50 = vunpack.i.h.bf16 %v5474_v39  ;;  %v5475_v38 = vunpack.i.l.bf16 %v5474_v39  ;;  %v5496_v58 = vunpack.i.h.bf16 %v5494_v59  ;;  %v5495_v22 = vunpack.i.l.bf16 %v5494_v59 }
 0x2de   : > { %v5470_v59 = vunpack.i.l.bf16 %v7972_v34 }
 0x2df   : > { %v3121_v12 = vsel %vm963_vm2, %v7918_v10, %v5475_v38  ;;  %v3122_v29 = vsel %vm963_vm2, %v7920_v7, %v5476_v50  ;;  %v2235_v10 = vld [vmem:[#allocation2 + $0x140] sm:$0xff]  ;;  %v3091_v38 = vsel %vm963_vm2, %v2354_v44, %v5495_v22  ;;  %v2356_v22 = vld [vmem:[#allocation2 + $0x109] sm:$0xff] }
 0x2e0   : > { %v5489_v45 = vpop.permute.xlu0 %5488  ;;  %v3180_v63 = vpack.c.bf16 %v3122_v29, %v3121_v12  ;;  %3682 = vmatmul.mubr.bf16.gmra.mrb[112].mxu1 %v3197_v30  ;;  %v3036_v31 = vsel %vm963_vm2, %v2235_v10, %v5441_v37  ;;  %v5504_v37 = vpop.permute.xlu1 %5503  ;;  %v3208_v30 = vpack.c.bf16 %v3070_v55, %v3069_v49 }
 0x2e1   : > { %v5491_v56 = vunpack.i.h.bf16 %v5489_v45  ;;  %v5490_v26 = vunpack.i.l.bf16 %v5489_v45  ;;  %3689 = vmatprep.mubr.bf16.mxu1 %v3203_v19  ;;  %v3202_v50 = vpack.c.bf16 %v3036_v31, %v3035_v14  ;;  %v5506_v19 = vunpack.i.h.bf16 %v5504_v37  ;;  %v2236_v45 = vld [vmem:[#allocation2 + $0x150] sm:$0xff] }
 0x2e2   : > { %3810 = vmatprep.mubr.bf16.mxu0 %v3180_v63  ;;  %v5505_v9 = vunpack.i.l.bf16 %v5504_v37  ;;  %v2237_v63 = vld [vmem:[#allocation2 + $0x158] sm:$0xff] }
 0x2e3   : > { %3811 = vmatmul.mubr.bf16.gmra.mrb[128].mxu0 %v3179_v8  ;;  %v3123_v7 = vsel %vm963_vm2, %v7944_v42, %v5490_v26  ;;  %v3124_v5 = vsel %vm963_vm2, %v7946_v11, %v5491_v56  ;;  %v2355_v11 = vld [vmem:[#allocation2 + $0xf9] sm:$0xff]  ;;  %v5667_v26 = vld [vmem:[#allocation2 + $0x16a] sm:$0xff] }
 0x2e4   : > { %v5499_v57 = vpop.permute.xlu0 %5498  ;;  %v3185_v62 = vpack.c.bf16 %v3124_v5, %v3123_v7  ;;  %v3092_v40 = vsel %vm963_vm2, %v2355_v11, %v5496_v58  ;;  %v3071_v34 = vsel %vm963_vm2, %v5667_v26, %v5470_v59  ;;  %v5668_v8 = vld [vmem:[#allocation2 + $0x172] sm:$0xff]  ;;  %v5481_v5 = vunpack.i.h.bf16 %v7960_v13  ;;  %v5514_v49 = vpop.permute.xlu1 %5513 }
 0x2e5   : > { %v5501_v42 = vunpack.i.h.bf16 %v5499_v57  ;;  %v5500_v39 = vunpack.i.l.bf16 %v5499_v57  ;;  %v3184_v29 = vpack.c.bf16 %v3092_v40, %v3091_v38  ;;  %v3072_v58 = vsel %vm963_vm2, %v5668_v8, %v5471_v20  ;;  %v2357_v7 = vld [vmem:[#allocation2 + $0x111] sm:$0xff]  ;;  %v2238_v40 = vld [vmem:[#allocation2 + $0x168] sm:$0xff] }
 0x2e6   : > { %3818 = vmatprep.mubr.bf16.mxu0 %v3185_v62  ;;  %v3093_v31 = vsel %vm963_vm2, %v2356_v22, %v5505_v9  ;;  %v3094_v57 = vsel %vm963_vm2, %v2357_v7, %v5506_v19  ;;  %v5480_v62 = vunpack.i.l.bf16 %v7960_v13  ;;  %v3213_v55 = vpack.c.bf16 %v3072_v58, %v3071_v34  ;;  %v2359_v20 = vld [vmem:[#allocation2 + $0x129] sm:$0xff]  ;;  %v2468_v7 = vld [vmem:[#allocation2 + $0x52] sm:$0xff] }
 0x2e7   : > { %v3125_v54 = vsel %vm963_vm2, %v2232_v18, %v5500_v39  ;;  %v3126_v52 = vsel %vm963_vm2, %v2233_v25, %v5501_v42  ;;  %v3037_v18 = vsel %vm963_vm2, %v2236_v45, %v5450_v6  ;;  %v3038_v25 = vsel %vm963_vm2, %v2237_v63, %v5451_v24  ;;  %v2239_v6 = vld [vmem:[#allocation2 + $0x170] sm:$0xff] }
 0x2e8   : > { %v5509_v12 = vpop.permute.xlu0 %5508  ;;  %3690 = vmatmul.mubr.bf16.gmra.mrb[116].mxu1 %v3202_v50  ;;  %v3190_v15 = vpack.c.bf16 %v3126_v52, %v3125_v54  ;;  %v3207_v14 = vpack.c.bf16 %v3038_v25, %v3037_v18  ;;  %v3189_v11 = vpack.c.bf16 %v3094_v57, %v3093_v31  ;;  %v5516_v24 = vunpack.i.h.bf16 %v5514_v49  ;;  %v2466_v52 = vld [vmem:[#allocation2 + $0x3a] sm:$0xff]  ;;  %v5524_v19 = vpop.permute.xlu1 %5523  ;;  %v2467_v22 = vld [vmem:[#allocation2 + $0x4a] sm:$0xff] }
 0x2e9   : > { %3697 = vmatprep.mubr.bf16.mxu1 %v3208_v30  ;;  %v5511_v53 = vunpack.i.h.bf16 %v5509_v12  ;;  %v5510_v56 = vunpack.i.l.bf16 %v5509_v12  ;;  %v5515_v50 = vunpack.i.l.bf16 %v5514_v49  ;;  %v3039_v13 = vsel %vm963_vm2, %v2238_v40, %v5480_v62  ;;  %v2361_v31 = vld [vmem:[#allocation2 + $0x141] sm:$0xff] }
 0x2ea   : > { %v3040_v54 = vsel %vm963_vm2, %v2239_v6, %v5481_v5  ;;  %v5526_v25 = vunpack.i.h.bf16 %v5524_v19  ;;  %v5525_v26 = vunpack.i.l.bf16 %v5524_v19  ;;  %v2469_v5 = vld [vmem:[#allocation2 + $0x62] sm:$0xff]  ;;  %v3146_v62 = vpack.c.bf16 %v2468_v7, %v2467_v22  ;;  %v2431_v22 = vld [vmem:[#allocation2 + $0x198] sm:$0xff] }
 0x2eb   : > { %3819 = vmatmul.mubr.bf16.gmra.mrb[132].mxu0 %v3184_v29  ;;  %v3127_v42 = vsel %vm963_vm2, %v2234_v47, %v5510_v56  ;;  %v3128_v39 = vsel %vm963_vm2, %v2235_v10, %v5511_v53  ;;  %v2465_v47 = vld [vmem:[#allocation2 + $0x32] sm:$0xff]  ;;  %v2358_v10 = vld [vmem:[#allocation2 + $0x121] sm:$0xff]  ;;  %v3212_v59 = vpack.c.bf16 %v3040_v54, %v3039_v13  ;;  %v3096_v29 = vsel %vm963_vm2, %v2359_v20, %v5516_v24 }
 0x2ec   : > { %3826 = vmatprep.mubr.bf16.mxu0 %v3190_v15  ;;  %v5519_v44 = vpop.permute.xlu0 %5518  ;;  %v3195_v38 = vpack.c.bf16 %v3128_v39, %v3127_v42  ;;  %v3095_v12 = vsel %vm963_vm2, %v2358_v10, %v5515_v50  ;;  %v3141_v53 = vpack.c.bf16 %v2466_v52, %v2465_v47  ;;  %v3098_v57 = vsel %vm963_vm2, %v2361_v31, %v5526_v25  ;;  %v5534_v49 = vpop.permute.xlu1 %5533  ;;  %v2471_v13 = vld [vmem:[#allocation2 + $0x7a] sm:$0xff]  ;;  %v2472_v54 = vld [vmem:[#allocation2 + $0x82] sm:$0xff]  ;;  %v2473_v47 = vld [vmem:[#allocation2 + $0x92] sm:$0xff] }
 0x2ed   : > { %v5521_v37 = vunpack.i.h.bf16 %v5519_v44  ;;  %v5520_v30 = vunpack.i.l.bf16 %v5519_v44  ;;  %v3194_v18 = vpack.c.bf16 %v3096_v29, %v3095_v12  ;;  %v5536_v24 = vunpack.i.h.bf16 %v5534_v49  ;;  %v2362_v52 = vld [vmem:[#allocation2 + $0x151] sm:$0xff]  ;;  %v2429_v12 = vld [vmem:[#allocation2 + $0x180] sm:$0xff]  ;;  %v2430_v29 = vld [vmem:[#allocation2 + $0x188] sm:$0xff] }
 0x2ee   : > { %v5535_v50 = vunpack.i.l.bf16 %v5534_v49  ;;  %v2432_v7 = vld [vmem:[#allocation2 + $0x1a0] sm:$0xff]  ;;  %v2478_v31 = vld [vmem:[#allocation2 + $0xca] sm:$0xff] }
 0x2ef   : > { %v3129_v9 = vsel %vm963_vm2, %v2236_v45, %v5520_v30  ;;  %v3130_v15 = vsel %vm963_vm2, %v2237_v63, %v5521_v37  ;;  %v2360_v45 = vld [vmem:[#allocation2 + $0x139] sm:$0xff] }
 0x2f0   : > { %3698 = vmatmul.mubr.bf16.gmra.mrb[120].mxu1 %v3207_v14  ;;  %v5529_v56 = vpop.permute.xlu0 %5528  ;;  %v3200_v34 = vpack.c.bf16 %v3130_v15, %v3129_v9  ;;  %v2470_v14 = vld [vmem:[#allocation2 + $0x6a] sm:$0xff]  ;;  %v3097_v63 = vsel %vm963_vm2, %v2360_v45, %v5525_v26  ;;  %v3099_v10 = vsel %vm963_vm2, %v2362_v52, %v5535_v50  ;;  %v5544_v9 = vpop.permute.xlu1 %5543  ;;  %v2477_v45 = vld [vmem:[#allocation2 + $0xc2] sm:$0xff] }
 0x2f1   : > { %3705 = vmatprep.mubr.bf16.mxu1 %v3213_v55  ;;  %v5531_v8 = vunpack.i.h.bf16 %v5529_v56  ;;  %v5530_v58 = vunpack.i.l.bf16 %v5529_v56  ;;  %v3151_v39 = vpack.c.bf16 %v2470_v14, %v2469_v5  ;;  %v2475_v5 = vld [vmem:[#allocation2 + $0xaa] sm:$0xff]  ;;  %v2476_v14 = vld [vmem:[#allocation2 + $0xb2] sm:$0xff] }
 0x2f2   : > { %v2367_v52 = vld [vmem:[#allocation2 + $0x189] sm:$0xff] }
 0x2f3   : > { %3827 = vmatmul.mubr.bf16.gmra.mrb[136].mxu0 %v3189_v11  ;;  %v3131_v55 = vsel %vm963_vm2, %v2238_v40, %v5530_v58  ;;  %v3132_v42 = vsel %vm963_vm2, %v2239_v6, %v5531_v8  ;;  %v3199_v11 = vpack.c.bf16 %v3098_v57, %v3097_v63  ;;  %v2474_v40 = vld [vmem:[#allocation2 + $0x9a] sm:$0xff]  ;;  %v5545_v8 = vunpack.i.l.bf16 %v5544_v9  ;;  %v2364_v63 = vld [vmem:[#allocation2 + $0x169] sm:$0xff]  ;;  %v2365_v57 = vld [vmem:[#allocation2 + $0x171] sm:$0xff] }
 0x2f4   : > { %3834 = vmatprep.mubr.bf16.mxu0 %v3195_v38  ;;  %v5539_v44 = vpop.permute.xlu0 %5538  ;;  %v3205_v38 = vpack.c.bf16 %v3132_v42, %v3131_v55  ;;  %v2363_v6 = vld [vmem:[#allocation2 + $0x159] sm:$0xff]  ;;  %v3161_v56 = vpack.c.bf16 %v2474_v40, %v2473_v47  ;;  %v2366_v40 = vld [vmem:[#allocation2 + $0x181] sm:$0xff] }
 0x2f5   : > { %v5541_v37 = vunpack.i.h.bf16 %v5539_v44  ;;  %v5540_v30 = vunpack.i.l.bf16 %v5539_v44  ;;  %v3100_v20 = vsel %vm963_vm2, %v2363_v6, %v5536_v24  ;;  %v3101_v55 = vsel %vm963_vm2, %v2364_v63, %v5545_v8  ;;  %v5554_v44 = vpop.permute.xlu1 %5553  ;;  %v2482_v47 = vld [vmem:[#allocation2 + $0xfa] sm:$0xff] }
 0x2f7   : > { %v3133_v15 = vsel %vm963_vm2, %v2429_v12, %v5540_v30  ;;  %v2479_v30 = vld [vmem:[#allocation2 + $0xda] sm:$0xff] }
 0x2f8   : > { %3706 = vmatmul.mubr.bf16.gmra.mrb[124].mxu1 %v3212_v59  ;;  %v3156_v59 = vpack.c.bf16 %v2472_v54, %v2471_v13  ;;  %v5549_v19 = vpop.permute.xlu0 %5548  ;;  %v2480_v13 = vld [vmem:[#allocation2 + $0xe2] sm:$0xff]  ;;  %v2481_v54 = vld [vmem:[#allocation2 + $0xf2] sm:$0xff] }
 0x2f9   : > { %4911 = vmatprep.mubr.msk.bf16.mxu1 %vm963_vm2, %v3141_v53  ;;  %v3134_v53 = vsel %vm963_vm2, %v2430_v29, %v5541_v37  ;;  %v5551_v25 = vunpack.i.h.bf16 %v5549_v19  ;;  %v5550_v26 = vunpack.i.l.bf16 %v5549_v19  ;;  %v5555_v37 = vunpack.i.l.bf16 %v5554_v44  ;;  %v2483_v29 = vld [vmem:[#allocation2 + $0x10a] sm:$0xff]  ;;  %v2484_v19 = vld [vmem:[#allocation2 + $0x112] sm:$0xff] }
 0x2fa   : > { %v3210_v58 = vpack.c.bf16 %v3134_v53, %v3133_v15  ;;  %v3191_v15 = vpack.c.bf16 %v7954_v3, %v7952_v27  ;;  %v3196_v53 = vpack.c.bf16 %v7978_v4, %v7976_v35  ;;  %v2495_v27 = vld [vmem:[#allocation2 + $0x19a] sm:$0xff]  ;;  %v2496_v3 = vld [vmem:[#allocation2 + $0x1a2] sm:$0xff] }
 0x2fb   : > { %3835 = vmatmul.mubr.bf16.gmra.mrb[140].mxu0 %v3194_v18  ;;  %v3204_v18 = vpack.c.bf16 %v3100_v20, %v3099_v10  ;;  %v3136_v49 = vsel %vm963_vm2, %v2432_v7, %v5551_v25  ;;  %v3103_v6 = vsel %vm963_vm2, %v2366_v40, %v5555_v37  ;;  %v3176_v20 = vpack.c.bf16 %v2480_v13, %v2479_v30  ;;  %v2494_v25 = vld [vmem:[#allocation2 + $0x18a] sm:$0xff] }
 0x2fc   : > { %3842 = vmatprep.mubr.bf16.mxu0 %v3200_v34  ;;  %v5546_v34 = vunpack.i.h.bf16 %v5544_v9  ;;  %v3186_v9 = vpack.c.bf16 %v2484_v19, %v2483_v29  ;;  %v3216_v35 = vpack.c.bf16 %v2496_v3, %v2495_v27 }
 0x2fe   : > { %v3102_v42 = vsel %vm963_vm2, %v2365_v57, %v5546_v34 }
 0x2ff   : > { %v3209_v50 = vpack.c.bf16 %v3102_v42, %v3101_v55 }
 0x300   : > { %4912 = vmatmul.mubr.msk.bf16.vlgmr.msra.gmra.mrb[128].mxu1 %vm963_vm2, %v3146_v62  ;;  %v3135_v62 = vsel %vm963_vm2, %v2431_v22, %v5550_v26 }
 0x301   : > { %4915 = vmatprep.mubr.msk.bf16.mxu1 %vm963_vm2, %v3151_v39  ;;  %v3166_v39 = vpack.c.bf16 %v2476_v14, %v2475_v5  ;;  %v3215_v24 = vpack.c.bf16 %v3136_v49, %v3135_v62 }
 0x303   : > { %3843 = vmatmul.mubr.bf16.gmra.mrb[144].mxu0 %v3199_v11  ;;  %v3171_v11 = vpack.c.bf16 %v2478_v31, %v2477_v45 }
 0x304   : > { %3850 = vmatprep.mubr.bf16.mxu0 %v3205_v38  ;;  %v5556_v38 = vunpack.i.h.bf16 %v5554_v44 }
 0x306   : > { %v3104_v10 = vsel %vm963_vm2, %v2367_v52, %v5556_v38 }
 0x307   : > { %v3214_v12 = vpack.c.bf16 %v3104_v10, %v3103_v6 }
 0x308   : > { %4916 = vmatmul.mubr.msk.bf16.gmra.mrb[132].mxu1 %vm963_vm2, %v3156_v59  ;;  %v3181_v59 = vpack.c.bf16 %v2482_v47, %v2481_v54 }
 0x309   : > { %4919 = vmatprep.mubr.msk.bf16.mxu1 %vm963_vm2, %v3161_v56  ;;  %v3201_v56 = vpack.c.bf16 %v8002_v32, %v8000_v51 }
 0x30b   : > { %3851 = vmatmul.mubr.bf16.gmra.mrb[148].mxu0 %v3204_v18  ;;  %v2493_v18 = vld [vmem:[#allocation2 + $0x182] sm:$0xff] }
 0x30c   : > { %3858 = vmatprep.mubr.bf16.mxu0 %v3210_v58  ;;  %v3211_v26 = vpack.c.bf16 %v2494_v25, %v2493_v18 }
 0x310   : > { %4920 = vmatmul.mubr.msk.bf16.gmra.mrb[136].mxu1 %vm963_vm2, %v3166_v39 }
 0x311   : > { %4923 = vmatprep.mubr.msk.bf16.mxu1 %vm963_vm2, %v3171_v11 }
 0x313   : > { %3859 = vmatmul.mubr.bf16.gmra.mrb[152].mxu0 %v3209_v50 }
 0x314   : > { %3866 = vmatprep.mubr.bf16.mxu0 %v3215_v24 }
 0x318   : > { %4924 = vmatmul.mubr.msk.bf16.gmra.mrb[140].mxu1 %vm963_vm2, %v3176_v20 }
 0x319   : > { %4927 = vmatprep.mubr.msk.bf16.mxu1 %vm963_vm2, %v3181_v59 }
 0x31b   : > { %3867 = vmatmul.mubr.bf16.gmra.mrb[156].mxu0 %v3214_v12 }
 0x320   : > { %4928 = vmatmul.mubr.msk.bf16.gmra.mrb[144].mxu1 %vm963_vm2, %v3186_v9 }
 0x321   : > { %4931 = vmatprep.mubr.msk.bf16.mxu1 %vm963_vm2, %v3191_v15 }
 0x328   : > { %4932 = vmatmul.mubr.msk.bf16.gmra.mrb[148].mxu1 %vm963_vm2, %v3196_v53 }
 0x329   : > { %4935 = vmatprep.mubr.msk.bf16.mxu1 %vm963_vm2, %v3201_v56 }
 0x330   : > { %4936 = vmatmul.mubr.msk.bf16.gmra.mrb[152].mxu1 %vm963_vm2, %v3206_v43 }
 0x331   : > { %4939 = vmatprep.mubr.msk.bf16.mxu1 %vm963_vm2, %v3211_v26 }
 0x338   : > { %4940 = vmatmul.mubr.msk.bf16.gmra.mrb[156].mxu1 %vm963_vm2, %v3216_v35 }
 0x353   : > { %v4635_v4 = vpop.f32.mrb[64].mxu1 }
 0x354   : > { %v4636_v51 = vpop.f32.mrb[65].mxu1 }
 0x355   : > { %v4637_v32 = vadd.f32 %v4636_v51, %v4635_v4  ;;  %v4638_v34 = vpop.f32.mrb[66].mxu1 }
 0x356   : > { %v4639_v8 = vpop.f32.mrb[67].mxu1 }
 0x357   : > { %v4640_v58 = vadd.f32 %v4639_v8, %v4638_v34 }
 0x35b   : > { %v4641_v22 = vpop.f32.mrb[68].mxu1 }
 0x35c   : > { %v4642_v7 = vpop.f32.mrb[69].mxu1 }
 0x35d   : > { %v4643_v5 = vadd.f32 %v4642_v7, %v4641_v22  ;;  %v4644_v14 = vpop.f32.mrb[70].mxu1 }
 0x35e   : > { %v4645_v41 = vpop.f32.mrb[71].mxu1 }
 0x35f   : > { %v4646_v16 = vadd.f32 %v4645_v41, %v4644_v14 }
 0x363   : > { %v4647_v43 = vpop.f32.mrb[72].mxu1 }
 0x364   : > { %v4648_v45 = vpop.f32.mrb[73].mxu1 }
 0x365   : > { %v4649_v31 = vadd.f32 %v4648_v45, %v4647_v43  ;;  %v4650_v63 = vpop.f32.mrb[74].mxu1 }
 0x366   : > { %v4651_v57 = vpop.f32.mrb[75].mxu1 }
 0x367   : > { %v4652_v62 = vadd.f32 %v4651_v57, %v4650_v63 }
 0x36b   : > { %v4653_v49 = vpop.f32.mrb[76].mxu1 }
 0x36c   : > { %v4654_v55 = vpop.f32.mrb[77].mxu1 }
 0x36d   : > { %v4655_v42 = vadd.f32 %v4654_v55, %v4653_v49  ;;  %v4656_v39 = vpop.f32.mrb[78].mxu1 }
 0x36e   : > { %v4657_v44 = vpop.f32.mrb[79].mxu1 }
 0x36f   : > { %v4658_v11 = vadd.f32 %v4657_v44, %v4656_v39 }
 0x373   : > { %v4659_v24 = vpop.f32.mrb[80].mxu1 }
 0x374   : > { %v4660_v50 = vpop.f32.mrb[81].mxu1 }
 0x375   : > { %v8071_v38 = vadd.f32 %v4660_v50, %v4659_v24  ;;  %v4662_v37 = vpop.f32.mrb[82].mxu1  ;;  %v4747_v30 = vpop.f32.mrb[96].mxu0 }
 0x376   : > { %v4663_v13 = vpop.f32.mrb[83].mxu1  ;;  %v4748_v54 = vpop.f32.mrb[97].mxu0 }
 0x377   : > { %v8073_v47 = vadd.f32 %v4663_v13, %v4662_v37  ;;  %v4749_v40 = vadd.f32 %v4748_v54, %v4747_v30  ;;  %v4750_v52 = vpop.f32.mrb[98].mxu0 }
 0x378   : > { %v4751_v6 = vpop.f32.mrb[99].mxu0 }
 0x379   : > { %v4752_v10 = vadd.f32 %v4751_v6, %v4750_v52  ;;  %v8075_v20 = vadd.f32 %v4749_v40, %v4637_v32 }
 0x37b   : > { %v4665_v59 = vpop.f32.mrb[84].mxu1  ;;  %v8077_v29 = vadd.f32 %v4752_v10, %v4640_v58 }
 0x37c   : > { %v4666_v12 = vpop.f32.mrb[85].mxu1 }
 0x37d   : > { %v8079_v19 = vadd.f32 %v4666_v12, %v4665_v59  ;;  %v4668_v9 = vpop.f32.mrb[86].mxu1 }
 0x37e   : > { %v4753_v15 = vpop.f32.mrb[100].mxu0  ;;  %v4669_v53 = vpop.f32.mrb[87].mxu1 }
 0x37f   : > { %v4754_v56 = vpop.f32.mrb[101].mxu0  ;;  %v8081_v18 = vadd.f32 %v4669_v53, %v4668_v9 }
 0x380   : > { %v4755_v25 = vadd.f32 %v4754_v56, %v4753_v15  ;;  %v4756_v26 = vpop.f32.mrb[102].mxu0 }
 0x381   : > { %v4757_v27 = vpop.f32.mrb[103].mxu0 }
 0x382   : > { %v4758_v3 = vadd.f32 %v4757_v27, %v4756_v26  ;;  %v8083_v35 = vadd.f32 %v4755_v25, %v4643_v5 }
 0x383   : > { %v4671_v4 = vpop.f32.mrb[88].mxu1 }
 0x384   : > { %v4672_v51 = vpop.f32.mrb[89].mxu1  ;;  %v8085_v32 = vadd.f32 %v4758_v3, %v4646_v16 }
 0x385   : > { %v8087_v34 = vadd.f32 %v4672_v51, %v4671_v4  ;;  %v4674_v8 = vpop.f32.mrb[90].mxu1 }
 0x386   : > { %v4759_v58 = vpop.f32.mrb[104].mxu0  ;;  %v4675_v22 = vpop.f32.mrb[91].mxu1 }
 0x387   : > { %v4760_v7 = vpop.f32.mrb[105].mxu0  ;;  %v8089_v14 = vadd.f32 %v4675_v22, %v4674_v8 }
 0x388   : > { %v4761_v41 = vadd.f32 %v4760_v7, %v4759_v58  ;;  %v4762_v43 = vpop.f32.mrb[106].mxu0 }
 0x389   : > { %v4763_v45 = vpop.f32.mrb[107].mxu0 }
 0x38a   : > { %v4764_v63 = vadd.f32 %v4763_v45, %v4762_v43  ;;  %v8091_v57 = vadd.f32 %v4761_v41, %v4649_v31 }
 0x38b   : > { %v4677_v5 = vpop.f32.mrb[92].mxu1 }
 0x38c   : > { %v4678_v49 = vpop.f32.mrb[93].mxu1  ;;  %v8093_v55 = vadd.f32 %v4764_v63, %v4652_v62 }
 0x38d   : > { %v8095_v16 = vadd.f32 %v4678_v49, %v4677_v5  ;;  %v4680_v39 = vpop.f32.mrb[94].mxu1 }
 0x38e   : > { %v4765_v44 = vpop.f32.mrb[108].mxu0  ;;  %v4681_v24 = vpop.f32.mrb[95].mxu1 }
 0x38f   : > { %v4766_v50 = vpop.f32.mrb[109].mxu0  ;;  %v8097_v37 = vadd.f32 %v4681_v24, %v4680_v39 }
 0x390   : > { %v4767_v30 = vadd.f32 %v4766_v50, %v4765_v44  ;;  %v4768_v13 = vpop.f32.mrb[110].mxu0 }
 0x391   : > { %v4769_v54 = vpop.f32.mrb[111].mxu0 }
 0x392   : > { %v4770_v40 = vadd.f32 %v4769_v54, %v4768_v13  ;;  %v8099_v52 = vadd.f32 %v4767_v30, %v4655_v42 }
 0x393   : > { %v4683_v31 = vpop.f32.mrb[96].mxu1 }
 0x394   : > { %v4684_v6 = vpop.f32.mrb[97].mxu1  ;;  %v8101_v10 = vadd.f32 %v4770_v40, %v4658_v11 }
 0x395   : > { %v8103_v62 = vadd.f32 %v4684_v6, %v4683_v31  ;;  %v4686_v59 = vpop.f32.mrb[98].mxu1 }
 0x396   : > { %v4771_v12 = vpop.f32.mrb[112].mxu0  ;;  %v4687_v9 = vpop.f32.mrb[99].mxu1 }
 0x397   : > { %v4772_v15 = vpop.f32.mrb[113].mxu0  ;;  %v8105_v53 = vadd.f32 %v4687_v9, %v4686_v59 }
 0x398   : > { %v4773_v56 = vadd.f32 %v4772_v15, %v4771_v12  ;;  %v4774_v25 = vpop.f32.mrb[114].mxu0 }
 0x399   : > { %v4775_v26 = vpop.f32.mrb[115].mxu0 }
 0x39a   : > { %v4776_v27 = vadd.f32 %v4775_v26, %v4774_v25  ;;  %v8108_v3 = vadd.f32 %v4773_v56, %v8071_v38 }
 0x39b   : > { %v4689_v42 = vpop.f32.mrb[100].mxu1 }
 0x39c   : > { %v4690_v4 = vpop.f32.mrb[101].mxu1  ;;  %v8111_v11 = vadd.f32 %v4776_v27, %v8073_v47 }
 0x39d   : > { %v8113_v51 = vadd.f32 %v4690_v4, %v4689_v42  ;;  %v4692_v8 = vpop.f32.mrb[102].mxu1 }
 0x39e   : > { %v4777_v58 = vpop.f32.mrb[116].mxu0  ;;  %v4693_v22 = vpop.f32.mrb[103].mxu1 }
 0x39f   : > { %v4778_v7 = vpop.f32.mrb[117].mxu0  ;;  %v8115_v41 = vadd.f32 %v4693_v22, %v4692_v8 }
 0x3a0   : > { %v4779_v43 = vadd.f32 %v4778_v7, %v4777_v58  ;;  %v4780_v45 = vpop.f32.mrb[118].mxu0 }
 0x3a1   : > { %v4781_v63 = vpop.f32.mrb[119].mxu0 }
 0x3a2   : > { %v4782_v5 = vadd.f32 %v4781_v63, %v4780_v45  ;;  %v8118_v38 = vadd.f32 %v4779_v43, %v8079_v19 }
 0x3a3   : > { %v4695_v49 = vpop.f32.mrb[104].mxu1 }
 0x3a4   : > { %v4696_v39 = vpop.f32.mrb[105].mxu1  ;;  %v8121_v47 = vadd.f32 %v4782_v5, %v8081_v18 }
 0x3a5   : > { %v8123_v44 = vadd.f32 %v4696_v39, %v4695_v49  ;;  %v4698_v24 = vpop.f32.mrb[106].mxu1 }
 0x3a6   : > { %v4783_v50 = vpop.f32.mrb[120].mxu0  ;;  %v4699_v30 = vpop.f32.mrb[107].mxu1 }
 0x3a7   : > { %v4784_v13 = vpop.f32.mrb[121].mxu0  ;;  %v8125_v54 = vadd.f32 %v4699_v30, %v4698_v24 }
 0x3a8   : > { %v4785_v40 = vadd.f32 %v4784_v13, %v4783_v50  ;;  %v4786_v31 = vpop.f32.mrb[122].mxu0 }
 0x3a9   : > { %v4787_v6 = vpop.f32.mrb[123].mxu0 }
 0x3aa   : > { %v4788_v59 = vadd.f32 %v4787_v6, %v4786_v31  ;;  %v8128_v19 = vadd.f32 %v4785_v40, %v8087_v34 }
 0x3ab   : > { %v4701_v12 = vpop.f32.mrb[108].mxu1 }
 0x3ac   : > { %v4702_v9 = vpop.f32.mrb[109].mxu1  ;;  %v8131_v18 = vadd.f32 %v4788_v59, %v8089_v14 }
 0x3ad   : > { %v8133_v15 = vadd.f32 %v4702_v9, %v4701_v12  ;;  %v4704_v56 = vpop.f32.mrb[110].mxu1 }
 0x3ae   : > { %v4789_v25 = vpop.f32.mrb[124].mxu0  ;;  %v4705_v26 = vpop.f32.mrb[111].mxu1 }
 0x3af   : > { %v4790_v27 = vpop.f32.mrb[125].mxu0  ;;  %v8135_v42 = vadd.f32 %v4705_v26, %v4704_v56 }
 0x3b0   : > { %v4791_v4 = vadd.f32 %v4790_v27, %v4789_v25  ;;  %v4792_v8 = vpop.f32.mrb[126].mxu0 }
 0x3b1   : > { %v4793_v58 = vpop.f32.mrb[127].mxu0 }
 0x3b2   : > { %v4794_v22 = vadd.f32 %v4793_v58, %v4792_v8  ;;  %v8138_v34 = vadd.f32 %v4791_v4, %v8095_v16 }
 0x3b3   : > { %v4707_v7 = vpop.f32.mrb[112].mxu1 }
 0x3b4   : > { %v4708_v43 = vpop.f32.mrb[113].mxu1  ;;  %v8141_v14 = vadd.f32 %v4794_v22, %v8097_v37 }
 0x3b5   : > { %v8143_v45 = vadd.f32 %v4708_v43, %v4707_v7  ;;  %v4710_v63 = vpop.f32.mrb[114].mxu1 }
 0x3b6   : > { %v4795_v5 = vpop.f32.mrb[128].mxu0  ;;  %v4711_v49 = vpop.f32.mrb[115].mxu1 }
 0x3b7   : > { %v4796_v39 = vpop.f32.mrb[129].mxu0  ;;  %v8145_v24 = vadd.f32 %v4711_v49, %v4710_v63 }
 0x3b8   : > { %v4797_v50 = vadd.f32 %v4796_v39, %v4795_v5  ;;  %v4798_v30 = vpop.f32.mrb[130].mxu0 }
 0x3b9   : > { %v4799_v13 = vpop.f32.mrb[131].mxu0 }
 0x3ba   : > { %v4800_v40 = vadd.f32 %v4799_v13, %v4798_v30  ;;  %v8148_v16 = vadd.f32 %v4797_v50, %v8103_v62 }
 0x3bb   : > { %v4713_v31 = vpop.f32.mrb[116].mxu1 }
 0x3bc   : > { %v4714_v6 = vpop.f32.mrb[117].mxu1  ;;  %v8151_v37 = vadd.f32 %v4800_v40, %v8105_v53 }
 0x3bd   : > { %v8153_v59 = vadd.f32 %v4714_v6, %v4713_v31  ;;  %v4716_v12 = vpop.f32.mrb[118].mxu1 }
 0x3be   : > { %v4801_v9 = vpop.f32.mrb[132].mxu0  ;;  %v4717_v56 = vpop.f32.mrb[119].mxu1 }
 0x3bf   : > { %v4802_v25 = vpop.f32.mrb[133].mxu0  ;;  %v8155_v26 = vadd.f32 %v4717_v56, %v4716_v12 }
 0x3c0   : > { %v4803_v27 = vadd.f32 %v4802_v25, %v4801_v9  ;;  %v4804_v4 = vpop.f32.mrb[134].mxu0 }
 0x3c1   : > { %v4805_v8 = vpop.f32.mrb[135].mxu0 }
 0x3c2   : > { %v4806_v58 = vadd.f32 %v4805_v8, %v4804_v4  ;;  %v8158_v62 = vadd.f32 %v4803_v27, %v8113_v51 }
 0x3c3   : > { %v4719_v22 = vpop.f32.mrb[120].mxu1 }
 0x3c4   : > { %v4720_v7 = vpop.f32.mrb[121].mxu1  ;;  %v8161_v53 = vadd.f32 %v4806_v58, %v8115_v41 }
 0x3c5   : > { %v8163_v43 = vadd.f32 %v4720_v7, %v4719_v22  ;;  %v4722_v63 = vpop.f32.mrb[122].mxu1 }
 0x3c6   : > { %v4807_v5 = vpop.f32.mrb[136].mxu0  ;;  %v4723_v49 = vpop.f32.mrb[123].mxu1 }
 0x3c7   : > { %v4808_v39 = vpop.f32.mrb[137].mxu0  ;;  %v8165_v50 = vadd.f32 %v4723_v49, %v4722_v63 }
 0x3c8   : > { %v4809_v30 = vadd.f32 %v4808_v39, %v4807_v5  ;;  %v4810_v13 = vpop.f32.mrb[138].mxu0 }
 0x3c9   : > { %v4811_v40 = vpop.f32.mrb[139].mxu0 }
 0x3ca   : > { %v4812_v31 = vadd.f32 %v4811_v40, %v4810_v13  ;;  %v8168_v51 = vadd.f32 %v4809_v30, %v8123_v44  ;;  %v8193_v13 = vld [vmem:[%s8473_s7] ss:$0 sm:$0xff] }
 0x3cb   : > { %v4725_v6 = vpop.f32.mrb[124].mxu1 }
 0x3cc   : > { %v4726_v12 = vpop.f32.mrb[125].mxu1  ;;  %v8171_v41 = vadd.f32 %v4812_v31, %v8125_v54  ;;  %v8184_v54 = vld [vmem:[%s8472_s6] ss:$0 sm:$0xff] }
 0x3cd   : > { %v8173_v9 = vadd.f32 %v4726_v12, %v4725_v6  ;;  %v4728_v56 = vpop.f32.mrb[126].mxu1 }
 0x3ce   : > { %v4813_v25 = vpop.f32.mrb[140].mxu0  ;;  %v4729_v27 = vpop.f32.mrb[127].mxu1 }
 0x3cf   : > { %v4814_v4 = vpop.f32.mrb[141].mxu0  ;;  %v8175_v8 = vadd.f32 %v4729_v27, %v4728_v56 }
 0x3d0   : > { %v4815_v58 = vadd.f32 %v4814_v4, %v4813_v25  ;;  %v4816_v22 = vpop.f32.mrb[142].mxu0 }
 0x3d1   : > { %v4817_v7 = vpop.f32.mrb[143].mxu0 }
 0x3d2   : > { %v4818_v63 = vadd.f32 %v4817_v7, %v4816_v22  ;;  %v8178_v44 = vadd.f32 %v4815_v58, %v8133_v15 }
 0x3d3   : > { %v4913_v5 = vpop.f32.mrb[128].mxu1 }
 0x3d4   : > { %v3918_v49 = vadd.f32 %v4913_v5, %v8083_v35  ;;  %v3909_v39 = vpop.f32.mrb[129].mxu1  ;;  %v8188_v30 = vadd.f32 %v4818_v63, %v8135_v42 }
 0x3d5   : > { %v3910_v15 = vadd.f32 %v3909_v39, %v8075_v20  ;;  %v4914_v40 = vpop.f32.mrb[130].mxu1 }
 0x3d6   : > { %v4819_v31 = vpop.f32.mrb[144].mxu0  ;;  %v4045_v6 = vmul.f32 %v8184_v54, %v3918_v49  ;;  %v3921_v12 = vadd.f32 %v4914_v40, %v8085_v32  ;;  %v3912_v35 = vpop.f32.mrb[131].mxu1 }
 0x3d7   : > { %v4820_v56 = vpop.f32.mrb[145].mxu0  ;;  %v4043_v42 = vmul.f32 %v8184_v54, %v3910_v15  ;;  %v3913_v25 = vadd.f32 %v3912_v35, %v8077_v29 }
 0x3d8   : > { %v4084_v27 = vadd.f32 %v8193_v13, %v4045_v6  ;;  %v4821_v4 = vadd.f32 %v4820_v56, %v4819_v31  ;;  %v4822_v58 = vpop.f32.mrb[146].mxu0  ;;  %v4046_v20 = vmul.f32 %v8184_v54, %v3921_v12 }
 0x3d9   : > { %v4082_v22 = vadd.f32 %v8193_v13, %v4043_v42  ;;  %v4823_v7 = vpop.f32.mrb[147].mxu0  ;;  %v4044_v63 = vmul.f32 %v8184_v54, %v3913_v25 }
 0x3da   : > { %v4116_v5 = vadd.f32 %v4084_v27, %v8675_v60  ;;  %v4085_v32 = vadd.f32 %v8193_v13, %v4046_v20  ;;  %v4824_v49 = vadd.f32 %v4823_v7, %v4822_v58  ;;  %v8209_v39 = vadd.f32 %v4821_v4, %v8143_v45 }
 0x3db   : > { %v4114_v29 = vadd.f32 %v4082_v22, %v8673_v1  ;;  %v4083_v15 = vadd.f32 %v8193_v13, %v4044_v63  ;;  %v4917_v40 = vpop.f32.mrb[132].mxu1  ;;  %v8710_v1 = vld [vmem:[#allocation11_spill] sm:$0xff] }
 0x3dc   : > { %4148 = vst.msk [vmem:[%s8213_s10 + $0x10] sm:$0xff] %vm963_vm2, %v4116_v5  ;;  %v4117_v60 = vadd.f32 %v4085_v32, %v8676_v28  ;;  %v3934_v31 = vadd.f32 %v4917_v40, %v8099_v52  ;;  %v3925_v6 = vpop.f32.mrb[133].mxu1  ;;  %v8220_v45 = vadd.f32 %v4824_v49, %v8145_v24 }
 0x3dd   : > { %4146 = vst.msk [vmem:[%s8213_s10] sm:$0xff] %vm963_vm2, %v4114_v29  ;;  %v4115_v12 = vadd.f32 %v4083_v15, %v8710_v1  ;;  %v3926_v35 = vadd.f32 %v3925_v6, %v8091_v57  ;;  %v4918_v56 = vpop.f32.mrb[134].mxu1 }
 0x3de   : > { %4149 = vst.msk [vmem:[%s8213_s10 + $0x18] sm:$0xff] %vm963_vm2, %v4117_v60  ;;  %v4825_v42 = vpop.f32.mrb[148].mxu0  ;;  %v4049_v25 = vmul.f32 %v8184_v54, %v3934_v31  ;;  %v3937_v28 = vadd.f32 %v4918_v56, %v8101_v10  ;;  %v3928_v27 = vpop.f32.mrb[135].mxu1 }
 0x3df   : > { %4147 = vst.msk [vmem:[%s8213_s10 + $0x8] sm:$0xff] %vm963_vm2, %v4115_v12  ;;  %v4826_v52 = vpop.f32.mrb[149].mxu0  ;;  %v4047_v24 = vmul.f32 %v8184_v54, %v3926_v35  ;;  %v3929_v4 = vadd.f32 %v3928_v27, %v8093_v55 }
 0x3e0   : > { %v4088_v58 = vadd.f32 %v8193_v13, %v4049_v25  ;;  %v4827_v57 = vadd.f32 %v4826_v52, %v4825_v42  ;;  %v4828_v20 = vpop.f32.mrb[150].mxu0  ;;  %v4050_v22 = vmul.f32 %v8184_v54, %v3937_v28 }
 0x3e1   : > { %v4086_v7 = vadd.f32 %v8193_v13, %v4047_v24  ;;  %v4829_v63 = vpop.f32.mrb[151].mxu0  ;;  %v4048_v10 = vmul.f32 %v8184_v54, %v3929_v4 }
 0x3e2   : > { %v4120_v5 = vadd.f32 %v4088_v58, %v8679_v17  ;;  %v4089_v32 = vadd.f32 %v8193_v13, %v4050_v22  ;;  %v4830_v49 = vadd.f32 %v4829_v63, %v4828_v20  ;;  %v8241_v55 = vadd.f32 %v4827_v57, %v8153_v59 }
 0x3e3   : > { %v4118_v29 = vadd.f32 %v4086_v7, %v8677_v61  ;;  %v4087_v15 = vadd.f32 %v8193_v13, %v4048_v10  ;;  %v4921_v40 = vpop.f32.mrb[136].mxu1 }
 0x3e4   : > { %4152 = vst.msk [vmem:[%s8213_s10 + $0x30] sm:$0xff] %vm963_vm2, %v4120_v5  ;;  %v4121_v60 = vadd.f32 %v4089_v32, %v8680_v46  ;;  %v3950_v31 = vadd.f32 %v4921_v40, %v8118_v38  ;;  %v3941_v17 = vpop.f32.mrb[137].mxu1  ;;  %v8250_v6 = vadd.f32 %v4830_v49, %v8155_v26 }
 0x3e5   : > { %4150 = vst.msk [vmem:[%s8213_s10 + $0x20] sm:$0xff] %vm963_vm2, %v4118_v29  ;;  %v4119_v59 = vadd.f32 %v4087_v15, %v8678_v48  ;;  %v3942_v61 = vadd.f32 %v3941_v17, %v8108_v3  ;;  %v4922_v1 = vpop.f32.mrb[138].mxu1 }
 0x3e6   : > { %4153 = vst.msk [vmem:[%s8213_s10 + $0x38] sm:$0xff] %vm963_vm2, %v4121_v60  ;;  %v4831_v12 = vpop.f32.mrb[152].mxu0  ;;  %v4053_v35 = vmul.f32 %v8184_v54, %v3950_v31  ;;  %v3953_v46 = vadd.f32 %v4922_v1, %v8121_v47  ;;  %v3944_v56 = vpop.f32.mrb[139].mxu1 }
 0x3e7   : > { %4151 = vst.msk [vmem:[%s8213_s10 + $0x28] sm:$0xff] %vm963_vm2, %v4119_v59  ;;  %v4832_v38 = vpop.f32.mrb[153].mxu0  ;;  %v4051_v26 = vmul.f32 %v8184_v54, %v3942_v61  ;;  %v3945_v42 = vadd.f32 %v3944_v56, %v8111_v11  ;;  %v8711_v56 = vld [vmem:[#allocation26_spill] sm:$0xff] }
 0x3e8   : > { %v4092_v48 = vadd.f32 %v8193_v13, %v4053_v35  ;;  %v4833_v3 = vadd.f32 %v4832_v38, %v4831_v12  ;;  %v4834_v25 = vpop.f32.mrb[154].mxu0  ;;  %v4054_v28 = vmul.f32 %v8184_v54, %v3953_v46 }
 0x3e9   : > { %v4090_v27 = vadd.f32 %v8193_v13, %v4051_v26  ;;  %v4835_v52 = vpop.f32.mrb[155].mxu0  ;;  %v4052_v47 = vmul.f32 %v8184_v54, %v3945_v42 }
 0x3ea   : > { %v4124_v24 = vadd.f32 %v4092_v48, %v8683_v23  ;;  %v4093_v4 = vadd.f32 %v8193_v13, %v4054_v28  ;;  %v4836_v58 = vadd.f32 %v4835_v52, %v4834_v25  ;;  %v8271_v11 = vadd.f32 %v4833_v3, %v8163_v43 }
 0x3eb   : > { %v4122_v57 = vadd.f32 %v4090_v27, %v8681_v33  ;;  %v4091_v20 = vadd.f32 %v8193_v13, %v4052_v47  ;;  %v4925_v22 = vpop.f32.mrb[140].mxu1 }
 0x3ec   : > { %4156 = vst.msk [vmem:[%s8213_s10 + $0x50] sm:$0xff] %vm963_vm2, %v4124_v24  ;;  %v4125_v7 = vadd.f32 %v4093_v4, %v8684_v0  ;;  %v3966_v63 = vadd.f32 %v4925_v22, %v8138_v34  ;;  %v3957_v23 = vpop.f32.mrb[141].mxu1  ;;  %v8280_v10 = vadd.f32 %v4836_v58, %v8165_v50  ;;  %v8713_v4 = vld [vmem:[#allocation32_spill] sm:$0xff] }
 0x3ed   : > { %4154 = vst.msk [vmem:[%s8213_s10 + $0x40] sm:$0xff] %vm963_vm2, %v4122_v57  ;;  %v4123_v43 = vadd.f32 %v4091_v20, %v8682_v36  ;;  %v3958_v33 = vadd.f32 %v3957_v23, %v8128_v19  ;;  %v4926_v5 = vpop.f32.mrb[142].mxu1  ;;  %v8714_v57 = vld [vmem:[#allocation29_spill] sm:$0xff] }
 0x3ee   : > { %4157 = vst.msk [vmem:[%s8213_s10 + $0x58] sm:$0xff] %vm963_vm2, %v4125_v7  ;;  %v4837_v32 = vpop.f32.mrb[156].mxu0  ;;  %v4057_v49 = vmul.f32 %v8184_v54, %v3966_v63  ;;  %v3969_v0 = vadd.f32 %v4926_v5, %v8141_v14  ;;  %v3960_v29 = vpop.f32.mrb[143].mxu1 }
 0x3ef   : > { %4155 = vst.msk [vmem:[%s8213_s10 + $0x48] sm:$0xff] %vm963_vm2, %v4123_v43  ;;  %v4838_v34 = vpop.f32.mrb[157].mxu0  ;;  %v4055_v50 = vmul.f32 %v8184_v54, %v3958_v33  ;;  %v3961_v15 = vadd.f32 %v3960_v29, %v8131_v18  ;;  %v8716_v33 = vld [vmem:[#allocation30_spill] sm:$0xff] }
 0x3f0   : > { %v4096_v36 = vadd.f32 %v8193_v13, %v4057_v49  ;;  %v4839_v19 = vadd.f32 %v4838_v34, %v4837_v32  ;;  %v4840_v40 = vpop.f32.mrb[158].mxu0  ;;  %v4058_v60 = vmul.f32 %v8184_v54, %v3969_v0 }
 0x3f1   : > { %v4094_v31 = vadd.f32 %v8193_v13, %v4055_v50  ;;  %v4841_v17 = vpop.f32.mrb[159].mxu0  ;;  %v4056_v14 = vmul.f32 %v8184_v54, %v3961_v15 }
 0x3f2   : > { %v4128_v59 = vadd.f32 %v4096_v36, %v8687_v2  ;;  %v4097_v61 = vadd.f32 %v8193_v13, %v4058_v60  ;;  %v4842_v1 = vadd.f32 %v4841_v17, %v4840_v40  ;;  %v8301_v18 = vadd.f32 %v4839_v19, %v8173_v9  ;;  %v8712_v9 = vld [vmem:[#allocation22_spill] sm:$0xff]  ;;  %v8717_v40 = vld [vmem:[#allocation36_spill] sm:$0xff] }
 0x3f3   : > { %v4126_v12 = vadd.f32 %v4094_v31, %v8685_v21  ;;  %v4095_v35 = vadd.f32 %v8193_v13, %v4056_v14  ;;  %v4929_v46 = vpop.f32.mrb[144].mxu1  ;;  %v8718_v31 = vld [vmem:[#allocation34_spill] sm:$0xff] }
 0x3f4   : > { %4160 = vst.msk [vmem:[%s8213_s10 + $0x70] sm:$0xff] %vm963_vm2, %v4128_v59  ;;  %v4129_v38 = vadd.f32 %v4097_v61, %v8711_v56  ;;  %v3982_v26 = vadd.f32 %v4929_v46, %v8158_v62  ;;  %v3973_v2 = vpop.f32.mrb[145].mxu1  ;;  %v8310_v42 = vadd.f32 %v4842_v1, %v8175_v8 }
 0x3f5   : > { %4158 = vst.msk [vmem:[%s8213_s10 + $0x60] sm:$0xff] %vm963_vm2, %v4126_v12  ;;  %v4127_v48 = vadd.f32 %v4095_v35, %v8712_v9  ;;  %v3974_v21 = vadd.f32 %v3973_v2, %v8148_v16  ;;  %v4930_v3 = vpop.f32.mrb[146].mxu1  ;;  %v8720_v35 = vld [vmem:[#allocation35_spill] sm:$0xff] }
 0x3f6   : > { %4161 = vst.msk [vmem:[%s8213_s10 + $0x78] sm:$0xff] %vm963_vm2, %v4129_v38  ;;  %v4061_v25 = vmul.f32 %v8184_v54, %v3982_v26  ;;  %v3985_v28 = vadd.f32 %v4930_v3, %v8161_v53  ;;  %v3976_v27 = vpop.f32.mrb[147].mxu1 }
 0x3f7   : > { %4159 = vst.msk [vmem:[%s8213_s10 + $0x68] sm:$0xff] %vm963_vm2, %v4127_v48  ;;  %v4059_v62 = vmul.f32 %v8184_v54, %v3974_v21  ;;  %v3977_v8 = vadd.f32 %v3976_v27, %v8151_v37  ;;  %v8715_v37 = vld [vmem:[#allocation33_spill] sm:$0xff] }
 0x3f8   : > { %v4100_v52 = vadd.f32 %v8193_v13, %v4061_v25  ;;  %v4062_v16 = vmul.f32 %v8184_v54, %v3985_v28  ;;  %v8721_v28 = vld [vmem:[#allocation40_spill] sm:$0xff] }
 0x3f9   : > { %v4098_v47 = vadd.f32 %v8193_v13, %v4059_v62  ;;  %v4060_v24 = vmul.f32 %v8184_v54, %v3977_v8  ;;  %v8722_v62 = vld [vmem:[#allocation38_spill] sm:$0xff] }
 0x3fa   : > { %v4132_v58 = vadd.f32 %v4100_v52, %v8713_v4  ;;  %v4101_v53 = vadd.f32 %v8193_v13, %v4062_v16 }
 0x3fb   : > { %v4130_v20 = vadd.f32 %v4098_v47, %v8714_v57  ;;  %v4099_v22 = vadd.f32 %v8193_v13, %v4060_v24  ;;  %v4933_v7 = vpop.f32.mrb[148].mxu1 }
 0x3fc   : > { %4164 = vst.msk [vmem:[%s8213_s10 + $0x90] sm:$0xff] %vm963_vm2, %v4132_v58  ;;  %v4133_v63 = vadd.f32 %v4101_v53, %v8715_v37  ;;  %v3998_v23 = vadd.f32 %v4933_v7, %v8178_v44  ;;  %v3989_v43 = vpop.f32.mrb[149].mxu1  ;;  %v8724_v58 = vld [vmem:[#allocation39_spill] sm:$0xff] }
 0x3fd   : > { %4162 = vst.msk [vmem:[%s8213_s10 + $0x80] sm:$0xff] %vm963_vm2, %v4130_v20  ;;  %v4131_v5 = vadd.f32 %v4099_v22, %v8716_v33  ;;  %v3990_v32 = vadd.f32 %v3989_v43, %v8168_v51  ;;  %v4934_v49 = vpop.f32.mrb[150].mxu1 }
 0x3fe   : > { %4165 = vst.msk [vmem:[%s8213_s10 + $0x98] sm:$0xff] %vm963_vm2, %v4133_v63  ;;  %v4065_v0 = vmul.f32 %v8184_v54, %v3998_v23  ;;  %v4001_v29 = vadd.f32 %v4934_v49, %v8188_v30  ;;  %v3992_v34 = vpop.f32.mrb[151].mxu1  ;;  %v8726_v49 = vld [vmem:[#allocation45_spill] sm:$0xff] }
 0x3ff   : > { %4163 = vst.msk [vmem:[%s8213_s10 + $0x88] sm:$0xff] %vm963_vm2, %v4131_v5  ;;  %v4063_v44 = vmul.f32 %v8184_v54, %v3990_v32  ;;  %v3993_v50 = vadd.f32 %v3992_v34, %v8171_v41  ;;  %v8719_v41 = vld [vmem:[#allocation37_spill] sm:$0xff] }
 0x400   : > { %v4104_v15 = vadd.f32 %v8193_v13, %v4065_v0  ;;  %v4066_v51 = vmul.f32 %v8184_v54, %v4001_v29  ;;  %v8727_v29 = vld [vmem:[#allocation41_spill] sm:$0xff] }
 0x401   : > { %v4102_v36 = vadd.f32 %v8193_v13, %v4063_v44  ;;  %v4064_v19 = vmul.f32 %v8184_v54, %v3993_v50 }
 0x402   : > { %v4136_v60 = vadd.f32 %v4104_v15, %v8717_v40  ;;  %v4105_v30 = vadd.f32 %v8193_v13, %v4066_v51 }
 0x403   : > { %v4134_v17 = vadd.f32 %v4102_v36, %v8718_v31  ;;  %v4103_v14 = vadd.f32 %v8193_v13, %v4064_v19  ;;  %v4937_v59 = vpop.f32.mrb[152].mxu1 }
 0x404   : > { %4168 = vst.msk [vmem:[%s8213_s10 + $0xb0] sm:$0xff] %vm963_vm2, %v4136_v60  ;;  %v4137_v61 = vadd.f32 %v4105_v30, %v8719_v41  ;;  %v4014_v1 = vadd.f32 %v4937_v59, %v8241_v55  ;;  %v4005_v12 = vpop.f32.mrb[153].mxu1 }
 0x405   : > { %4166 = vst.msk [vmem:[%s8213_s10 + $0xa0] sm:$0xff] %vm963_vm2, %v4134_v17  ;;  %v4135_v46 = vadd.f32 %v4103_v14, %v8720_v35  ;;  %v4006_v56 = vadd.f32 %v4005_v12, %v8209_v39  ;;  %v4938_v38 = vpop.f32.mrb[154].mxu1 }
 0x406   : > { %4169 = vst.msk [vmem:[%s8213_s10 + $0xb8] sm:$0xff] %vm963_vm2, %v4137_v61  ;;  %v4069_v26 = vmul.f32 %v8184_v54, %v4014_v1  ;;  %v4017_v2 = vadd.f32 %v4938_v38, %v8250_v6  ;;  %v4008_v9 = vpop.f32.mrb[155].mxu1 }
 0x407   : > { %4167 = vst.msk [vmem:[%s8213_s10 + $0xa8] sm:$0xff] %vm963_vm2, %v4135_v46  ;;  %v4067_v55 = vmul.f32 %v8184_v54, %v4006_v56  ;;  %v4009_v48 = vadd.f32 %v4008_v9, %v8220_v45  ;;  %v8723_v45 = vld [vmem:[#allocation42_spill] sm:$0xff] }
 0x408   : > { %v4108_v21 = vadd.f32 %v8193_v13, %v4069_v26  ;;  %v4070_v39 = vmul.f32 %v8184_v54, %v4017_v2 }
 0x409   : > { %v4106_v3 = vadd.f32 %v8193_v13, %v4067_v55  ;;  %v4068_v25 = vmul.f32 %v8184_v54, %v4009_v48 }
 0x40a   : > { %v4140_v27 = vadd.f32 %v4108_v21, %v8721_v28  ;;  %v4109_v6 = vadd.f32 %v8193_v13, %v4070_v39 }
 0x40b   : > { %v4138_v8 = vadd.f32 %v4106_v3, %v8722_v62  ;;  %v4107_v52 = vadd.f32 %v8193_v13, %v4068_v25  ;;  %v4941_v16 = vpop.f32.mrb[156].mxu1 }
 0x40c   : > { %4172 = vst.msk [vmem:[%s8213_s10 + $0xd0] sm:$0xff] %vm963_vm2, %v4140_v27  ;;  %v4141_v47 = vadd.f32 %v4109_v6, %v8723_v45  ;;  %v4030_v24 = vadd.f32 %v4941_v16, %v8301_v18  ;;  %v4021_v4 = vpop.f32.mrb[157].mxu1 }
 0x40d   : > { %4170 = vst.msk [vmem:[%s8213_s10 + $0xc0] sm:$0xff] %vm963_vm2, %v4138_v8  ;;  %v4139_v53 = vadd.f32 %v4107_v52, %v8724_v58  ;;  %v4022_v57 = vadd.f32 %v4021_v4, %v8271_v11  ;;  %v4942_v20 = vpop.f32.mrb[158].mxu1 }
 0x40e   : > { %4173 = vst.msk [vmem:[%s8213_s10 + $0xd8] sm:$0xff] %vm963_vm2, %v4141_v47  ;;  %v4073_v22 = vmul.f32 %v8184_v54, %v4030_v24  ;;  %v4033_v7 = vadd.f32 %v4942_v20, %v8310_v42  ;;  %v4024_v37 = vpop.f32.mrb[159].mxu1  ;;  %v8725_v42 = vld [vmem:[#allocation23_spill] sm:$0xff] }
 0x40f   : > { %4171 = vst.msk [vmem:[%s8213_s10 + $0xc8] sm:$0xff] %vm963_vm2, %v4139_v53  ;;  %v4071_v18 = vmul.f32 %v8184_v54, %v4022_v57  ;;  %v4025_v63 = vadd.f32 %v4024_v37, %v8280_v10 }
 0x410   : > { %v4112_v23 = vadd.f32 %v8193_v13, %v4073_v22  ;;  %v4074_v11 = vmul.f32 %v8184_v54, %v4033_v7 }
 0x411   : > { %v4110_v43 = vadd.f32 %v8193_v13, %v4071_v18  ;;  %v4072_v33 = vmul.f32 %v8184_v54, %v4025_v63  ;;  %v8728_v54 = vld [vmem:[#allocation46_spill] sm:$0xff] }
 0x412   : > { %v4144_v5 = vadd.f32 %v4112_v23, %v8725_v42  ;;  %v4113_v32 = vadd.f32 %v8193_v13, %v4074_v11 }
 0x413   : > { %v4142_v10 = vadd.f32 %v4110_v43, %v8726_v49  ;;  %v4111_v0 = vadd.f32 %v8193_v13, %v4072_v33 }
 0x414   : > { %4176 = vst.msk [vmem:[%s8213_s10 + $0xf0] sm:$0xff] %vm963_vm2, %v4144_v5  ;;  %v4145_v34 = vadd.f32 %v4113_v32, %v8727_v29 }
 0x415   : > { %4174 = vst.msk [vmem:[%s8213_s10 + $0xe0] sm:$0xff] %vm963_vm2, %v4142_v10  ;;  %v4143_v44 = vadd.f32 %v4111_v0, %v8728_v54 }
 0x416   : > { %4177 = vst.msk [vmem:[%s8213_s10 + $0xf8] sm:$0xff] %vm963_vm2, %v4145_v34 }
 0x417   : > { %4175 = vst.msk [vmem:[%s8213_s10 + $0xe8] sm:$0xff] %vm963_vm2, %v4143_v44 }
 0x418   : > { %5682 = shalt.err (!%p5679_p3)
}
 0x419   : > { %s5683_s19 = scalar_lea.hbm %s8412_s21, 4096  ;;  %s5687_s10 = scalar_lea.hbm %s8474_s8, 8192 }
 0x41a   : > { %p5684_p4 = scmp.ne.s32.totalorder %s8412_s21, %s5683_s19  ;;  %p5688_p9 = scmp.lt.u32.totalorder %s8412_s21, %s8474_s8 }
 0x41b   : > { %p5689_p10 = scmp.lt.u32.totalorder %s5687_s10, %s5683_s19  ;;  %p5691_p12 = scmp.lt.u32.totalorder %s5683_s19, %s8412_s21 }
 0x41c   : > { %p5685_p7 = pnand %p5684_p4, %p5821_p5 }
 0x41d   : > { %p5690_p11 = por %p5689_p10, %p5688_p9 }
 0x41e   : > { %p5686_p8 = pneg %p5685_p7 }
 0x41f   : > { %p5692_p13 = por %p5691_p12, %p5690_p11 }
 0x421   : > { %p5693_p0 = pnand %p5692_p13, %p5686_p8 }
 0x423   : > { %5696 = shalt.err (!%p5693_p0)
}
 0x424   : > { %s5736_s20 = smov 128   ;;  %s5737_s22 = smov 8  }
 0x425   : > { %4944 = dma.vmem_to_hbm [thread:$0]  (%p5821_p5), %s8414_s13, 4096, %s8412_s21, %s8425_s9, %s5736_s20, %s5736_s20, %s5737_s22  }
 0x426 PF: > { %p4950_p1 = scmp.ge.s32.totalorder %s5731_s30, 2  ;;  %s4207_s23 = sand.u32 1, %s5719_s27  }
 0x427   : > { %s4208_s24 = scalar_lea.sflag [#allocation4], %s4207_s23 }
 0x428   : > { %p4947_p2 = pnand %p4950_p1, %p5825_p6 }
 0x42a   : > { %5714 = dma.done.wait (!%p4947_p2), %s4208_s24, 4096  }
 0x42b   : > { %5716 = vsyncadd (!%p4947_p2), %s4208_s24, 4294963200  ;;  %p18_p3 = scmp.ge.s32.totalorder %s5808_s11, 4   ;;  %s8729_s27 = smov %s5723_s28 }
 0x42c   : > { %s8730_s28 = smov %s5727_s29  ;;  %s8731_s29 = smov %s5819_s14 }
 0x42d   : > { %s8732_s30 = smov %s5808_s11  ;;  %20 = sbr.rel (!%p18_p3) target bundleno = 3 (0x3), region = 90 }
 0x434   :  { %4213 = vsyncpa [#allocation4], 1 }
 0x435   :  { %4215 = vsyncpa [#allocation4 + $0x1], 1 }

</bundles_post_ra>
